<compile_context>
chip_gen: v7x
topology: tpu7x:2x2x1
jax: 0.10.0
libtpu: 0.0.40
codegen_flags: <defaults>
</compile_context>

<pallas_src>
import functools

import jax
import jax.numpy as jnp
from jax.experimental import pallas as pl
from jax.experimental.pallas import tpu as pltpu

EPS = 1e-5                                   # PyTorch BatchNorm2d default eps
_STAT_PREC = jax.lax.Precision.HIGHEST       # tiny BN-stats matmul: keep exact


def _split_bf16(v):
    """Split an f32 value into (hi, lo) bf16 parts with v ~= hi + lo."""
    hi = v.astype(jnp.bfloat16)
    lo = (v - hi.astype(jnp.float32)).astype(jnp.bfloat16)
    return hi, lo


def _dot3(a_hi, a_lo, w_hi, w_lo):
    """bf16_3x matmul (== Precision.HIGH): drops only the lo*lo term (~1e-5)."""
    out = jnp.dot(a_hi, w_hi, preferred_element_type=jnp.float32)
    out = out + jnp.dot(a_hi, w_lo, preferred_element_type=jnp.float32)
    out = out + jnp.dot(a_lo, w_hi, preferred_element_type=jnp.float32)
    return out


def _recurrent_block_kernel(a_ref, whi_ref, wlo_ref, p_ref, bias_ref,
                            gamma_ref, beta_ref, o_ref, *, t, h, inv_count):
    f32 = jnp.float32
    nbh, gwc = a_ref.shape

    x0 = a_ref[...]                          # (NB*H, G*W*C) activation tile
    p_mat = p_ref[...]                       # (G*W*C, G*W*C) channel selector
    bias_cols = bias_ref[...]                # (1, G*W*C) conv bias per column
    gamma_cols = gamma_ref[...]
    beta_cols = beta_ref[...]

    # Row-validity masks for the dy = +/-1 shifts: they implement the conv's
    # zero padding along h and kill the circular-roll wraparound between the
    # images stacked on the row axis.  Hoisted out of the recurrence.
    row_h = jax.lax.broadcasted_iota(jnp.int32, (nbh, gwc), 0) % h
    mask_m1 = (row_h >= 1).astype(f32)       # rows whose h-1 neighbour exists
    mask_p1 = (row_h <= h - 2).astype(f32)   # rows whose h+1 neighbour exists

    def conv_bn_relu(a):
        # ---- 3x3 "same" conv: 3 block-tridiagonal MXU matmuls (one per dy).
        # dx taps live on the block off-diagonals of the weights, so no lane
        # shifts / dx masks are needed; only the dy row roll + row mask.
        a_m1 = pltpu.roll(a, 1, axis=0) * mask_m1        # row h holds x[h-1]
        a_p1 = pltpu.roll(a, nbh - 1, axis=0) * mask_p1  # row h holds x[h+1]

        acc = _dot3(*_split_bf16(a_m1), whi_ref[0], wlo_ref[0])        # dy=-1
        acc = acc + _dot3(*_split_bf16(a), whi_ref[1], wlo_ref[1])     # dy= 0
        acc = acc + _dot3(*_split_bf16(a_p1), whi_ref[2], wlo_ref[2])  # dy=+1
        acc = acc + bias_cols

        # ---- BatchNorm2d, training-mode (biased) batch statistics ----------
        # Reduce rows first, then replicate per-channel totals across the
        # column groups with the tiny 0/1 selector matmul:
        #   sum_rows(A @ P) == sum_rows(A) @ P.
        # TODO(synk): running_mean / running_var buffer updates (module state)
        # are not materialized; only the forward output is produced.
        col_sum = jnp.sum(acc, axis=0, keepdims=True)                 # (1,GWC)
        mean_cols = jnp.dot(jnp.broadcast_to(col_sum, (8, gwc)), p_mat,
                            precision=_STAT_PREC,
                            preferred_element_type=f32)[0:1, :] * inv_count
        d = acc - mean_cols
        sq_sum = jnp.sum(d * d, axis=0, keepdims=True)
        var_cols = jnp.dot(jnp.broadcast_to(sq_sum, (8, gwc)), p_mat,
                           precision=_STAT_PREC,
                           preferred_element_type=f32)[0:1, :] * inv_count
        scale_cols = gamma_cols * jax.lax.rsqrt(var_cols + EPS)       # EUP

        # ---- fused BN affine + ReLU ----------------------------------------
        return jnp.maximum(d * scale_cols + beta_cols, 0.0)

    # x1 = f(x); then t times: x1 = f(x + x1)   (mirrors the PyTorch forward)
    x1 = conv_bn_relu(x0)
    x1 = jax.lax.fori_loop(0, t, lambda i, a: conv_bn_relu(x0 + a), x1,
                           unroll=(t <= 4))
    o_ref[...] = x1.astype(o_ref.dtype)


def _pick_lane_groups(n, wc, target=128, cap=512):
    """# of images folded into the lane axis so lanes >= 128 when possible."""
    if wc >= target:
        return 1
    best = 1
    for g in range(1, n + 1):
        if n % g != 0:
            continue
        if g * wc > cap:
            break
        best = g
        if g * wc >= target:
            break
    return best


def recurrent_block(x, w_hwio, conv_bias, bn_gamma, bn_beta, t=2):
    """x: (N,H,W,C) f32; w_hwio: (3,3,C,C) HWIO; conv_bias/bn_*: (C,)."""
    N, H, W, C = x.shape
    kh, kw, cin, cout = w_hwio.shape
    assert (kh, kw) == (3, 3) and cin == C and cout == C
    assert t >= 1
    f32 = jnp.float32

    WC = W * C
    G = _pick_lane_groups(N, WC)             # images folded into the lane axis
    NB = N // G
    GWC = G * WC

    # Lane-dense 2D activation: row = b*H + h, col = g*W*C + w*C + c, where
    # the batch index is n = b*G + g.  For the demo shape this is (16, 128).
    x2 = (x.astype(f32).reshape(NB, G, H, W, C)
            .transpose(0, 2, 1, 3, 4).reshape(NB * H, GWC))

    # Per-dy block-tridiagonal weights over w (dx taps on the block
    # off-diagonals), block-diagonal over the G lane-folded images:
    #   T_dy[w_in*C+ci, w_out*C+co] = w_hwio[dy, (w_in - w_out) + 1, ci, co]
    eye_g = jnp.eye(G, dtype=f32)
    w3 = jnp.stack([
        jnp.kron(eye_g,
                 sum(jnp.kron(jnp.eye(W, k=-dx, dtype=f32),
                              w_hwio[dyi, dx + 1].astype(f32))
                     for dx in (-1, 0, 1)))
        for dyi in range(3)])                                   # (3, GWC, GWC)
    w_hi = w3.astype(jnp.bfloat16)
    w_lo = (w3 - w_hi.astype(f32)).astype(jnp.bfloat16)

    # Per-channel all-reduce selector: P[i, j] = (channel(i) == channel(j)).
    p_mat = jnp.kron(jnp.ones((G * W, G * W), f32), jnp.eye(C, dtype=f32))

    bias_cols = jnp.tile(conv_bias.astype(f32)[None, :], (1, G * W))  # (1,GWC)
    gamma_cols = jnp.tile(bn_gamma.astype(f32)[None, :], (1, G * W))
    beta_cols = jnp.tile(bn_beta.astype(f32)[None, :], (1, G * W))

    kernel = functools.partial(_recurrent_block_kernel, t=t, h=H,
                               inv_count=1.0 / float(N * H * W))
    out2 = pl.pallas_call(
        kernel,
        out_shape=jax.ShapeDtypeStruct((NB * H, GWC), f32),
        in_specs=[pl.BlockSpec(memory_space=pltpu.MemorySpace.VMEM)] * 7,
        out_specs=pl.BlockSpec(memory_space=pltpu.MemorySpace.VMEM),
        compiler_params=pltpu.CompilerParams(
            vmem_limit_bytes=32 * 1024 * 1024),
    )(x2, w_hi, w_lo, p_mat, bias_cols, gamma_cols, beta_cols)

    return (out2.reshape(NB, H, G, W, C)
                .transpose(0, 2, 1, 3, 4).reshape(N, H, W, C))


def recurrent_block_ref(x, w_hwio, conv_bias, bn_gamma, bn_beta, t=2):
    """Pure-JAX reference matching the PyTorch module (training-mode BN)."""
    def conv_bn_relu(v):
        y = jax.lax.conv_general_dilated(
            v, w_hwio, window_strides=(1, 1), padding="SAME",
            dimension_numbers=("NHWC", "HWIO", "NHWC"),
            precision=jax.lax.Precision.HIGHEST)
        y = y + conv_bias
        mean = jnp.mean(y, axis=(0, 1, 2), keepdims=True)
        var = jnp.mean((y - mean) ** 2, axis=(0, 1, 2), keepdims=True)
        y = (y - mean) / jnp.sqrt(var + EPS) * bn_gamma + bn_beta
        return jnp.maximum(y, 0.0)

    x1 = None
    for i in range(t):
        if i == 0:
            x1 = conv_bn_relu(x)
        x1 = conv_bn_relu(x + x1)
    return x1


if __name__ == "__main__":
    key = jax.random.PRNGKey(0)
    kx, kw, kb = jax.random.split(key, 3)

    N, H, W, C = 2, 16, 16, 4   # NHWC  (== PyTorch NCHW input of shape [2,4,16,16])
    t = 2

    x = jax.random.normal(kx, (N, H, W, C), dtype=jnp.float32)
    w = jax.random.normal(kw, (3, 3, C, C), dtype=jnp.float32) * 0.2   # HWIO
    b = jax.random.normal(kb, (C,), dtype=jnp.float32) * 0.1
    gamma = jnp.ones((C,), jnp.float32)    # BatchNorm2d default weight
    beta = jnp.zeros((C,), jnp.float32)    # BatchNorm2d default bias

    out = recurrent_block(x, w, b, gamma, beta, t=t)
    out = jax.block_until_ready(out)

    ref = recurrent_block_ref(x, w, b, gamma, beta, t=t)
    assert out.shape == (N, H, W, C)
    max_err = float(jnp.max(jnp.abs(out - ref)))
    assert jnp.allclose(out, ref, rtol=1e-3, atol=1e-3), f"max_err={max_err}"
    print("KERNEL_OK")
</pallas_src>

<mosaic_0001>
module attributes {stable_mosaic.version = 11 : i64} {
  func.func @_recurrent_block_kernel(%arg0: memref<16x128xf32, #tpu.memory_space<vmem>>, %arg1: memref<3x128x128xbf16, #tpu.memory_space<vmem>>, %arg2: memref<3x128x128xbf16, #tpu.memory_space<vmem>>, %arg3: memref<128x128xf32, #tpu.memory_space<vmem>>, %arg4: memref<1x128xf32, #tpu.memory_space<vmem>>, %arg5: memref<1x128xf32, #tpu.memory_space<vmem>>, %arg6: memref<1x128xf32, #tpu.memory_space<vmem>>, %arg7: memref<16x128xf32, #tpu.memory_space<vmem>>) attributes {dimension_semantics = [], scalar_prefetch = 0 : i64, scratch_operands = 0 : i64, tpu.core_type = #tpu.core_type<tc>} {
    %c0 = arith.constant 0 : index
    %c0_0 = arith.constant 0 : index
    %0 = vector.load %arg0[%c0, %c0_0] : memref<16x128xf32, #tpu.memory_space<vmem>>, vector<16x128xf32>
    %c0_1 = arith.constant 0 : index
    %c0_2 = arith.constant 0 : index
    %1 = vector.load %arg3[%c0_1, %c0_2] : memref<128x128xf32, #tpu.memory_space<vmem>>, vector<128x128xf32>
    %c0_3 = arith.constant 0 : index
    %c0_4 = arith.constant 0 : index
    %2 = vector.load %arg4[%c0_3, %c0_4] : memref<1x128xf32, #tpu.memory_space<vmem>>, vector<1x128xf32>
    %c0_5 = arith.constant 0 : index
    %c0_6 = arith.constant 0 : index
    %3 = vector.load %arg5[%c0_5, %c0_6] : memref<1x128xf32, #tpu.memory_space<vmem>>, vector<1x128xf32>
    %c0_7 = arith.constant 0 : index
    %c0_8 = arith.constant 0 : index
    %4 = vector.load %arg6[%c0_7, %c0_8] : memref<1x128xf32, #tpu.memory_space<vmem>>, vector<1x128xf32>
    %5 = tpu.iota {dimensions = array<i32: 0>} : vector<16x128xi32>
    %c16_i32 = arith.constant 16 : i32
    %c0_i32 = arith.constant 0 : i32
    %6 = arith.cmpi eq, %c16_i32, %c0_i32 : i32
    %c1_i32 = arith.constant 1 : i32
    %7 = arith.select %6, %c1_i32, %c16_i32 : i32
    %8 = vector.broadcast %7 : i32 to vector<16x128xi32>
    %9 = arith.remsi %5, %8 : vector<16x128xi32>
    %c0_i32_9 = arith.constant 0 : i32
    %10 = vector.broadcast %c0_i32_9 : i32 to vector<16x128xi32>
    %11 = arith.cmpi ne, %9, %10 : vector<16x128xi32>
    %c0_i32_10 = arith.constant 0 : i32
    %12 = vector.broadcast %c0_i32_10 : i32 to vector<16x128xi32>
    %13 = arith.cmpi slt, %9, %12 : vector<16x128xi32>
    %c0_i32_11 = arith.constant 0 : i32
    %14 = arith.cmpi slt, %7, %c0_i32_11 : i32
    %15 = vector.broadcast %14 : i1 to vector<16x128xi1>
    %16 = vector.broadcast %15 : vector<16x128xi1> to vector<16x128xi1>
    %17 = arith.xori %13, %16 : vector<16x128xi1>
    %18 = arith.andi %17, %11 : vector<16x128xi1>
    %19 = vector.broadcast %7 : i32 to vector<16x128xi32>
    %20 = arith.addi %9, %19 : vector<16x128xi32>
    %21 = arith.select %18, %20, %9 : vector<16x128xi1>, vector<16x128xi32>
    %c1_i32_12 = arith.constant 1 : i32
    %22 = vector.broadcast %c1_i32_12 : i32 to vector<16x128xi32>
    %23 = arith.cmpi sge, %21, %22 : vector<16x128xi32>
    %24 = arith.extui %23 : vector<16x128xi1> to vector<16x128xi32>
    %25 = arith.sitofp %24 : vector<16x128xi32> to vector<16x128xf32>
    %c14_i32 = arith.constant 14 : i32
    %26 = vector.broadcast %c14_i32 : i32 to vector<16x128xi32>
    %27 = arith.cmpi sle, %21, %26 : vector<16x128xi32>
    %28 = arith.extui %27 : vector<16x128xi1> to vector<16x128xi32>
    %29 = arith.sitofp %28 : vector<16x128xi32> to vector<16x128xf32>
    %c1_i32_13 = arith.constant 1 : i32
    %30 = tpu.dynamic_rotate %0 by %c1_i32_13 dim 0 : vector<16x128xf32>, i32 -> vector<16x128xf32>
    %31 = arith.mulf %30, %25 : vector<16x128xf32>
    %c15_i32 = arith.constant 15 : i32
    %32 = tpu.dynamic_rotate %0 by %c15_i32 dim 0 : vector<16x128xf32>, i32 -> vector<16x128xf32>
    %33 = arith.mulf %32, %29 : vector<16x128xf32>
    %34 = arith.truncf %31 : vector<16x128xf32> to vector<16x128xbf16>
    %35 = arith.extf %34 : vector<16x128xbf16> to vector<16x128xf32>
    %36 = arith.subf %31, %35 : vector<16x128xf32>
    %37 = arith.truncf %36 : vector<16x128xf32> to vector<16x128xbf16>
    %c0_14 = arith.constant 0 : index
    %c0_15 = arith.constant 0 : index
    %c0_16 = arith.constant 0 : index
    %38 = vector.load %arg1[%c0_14, %c0_15, %c0_16] : memref<3x128x128xbf16, #tpu.memory_space<vmem>>, vector<1x128x128xbf16>
    %39 = vector.shape_cast %38 : vector<1x128x128xbf16> to vector<128x128xbf16>
    %c0_17 = arith.constant 0 : index
    %c0_18 = arith.constant 0 : index
    %c0_19 = arith.constant 0 : index
    %40 = vector.load %arg2[%c0_17, %c0_18, %c0_19] : memref<3x128x128xbf16, #tpu.memory_space<vmem>>, vector<1x128x128xbf16>
    %41 = vector.shape_cast %40 : vector<1x128x128xbf16> to vector<128x128xbf16>
    %cst = arith.constant dense<0.000000e+00> : vector<16x128xf32>
    %42 = tpu.matmul %34, %39, %cst {dimension_numbers = #tpu.dot_dimension_numbers<[1], [0], [0], [1], [0, 0, 1, 1], [], []>} : vector<16x128xbf16>, vector<128x128xbf16>, vector<16x128xf32> -> vector<16x128xf32>
    %cst_20 = arith.constant dense<0.000000e+00> : vector<16x128xf32>
    %43 = tpu.matmul %34, %41, %cst_20 {dimension_numbers = #tpu.dot_dimension_numbers<[1], [0], [0], [1], [0, 0, 1, 1], [], []>} : vector<16x128xbf16>, vector<128x128xbf16>, vector<16x128xf32> -> vector<16x128xf32>
    %44 = arith.addf %42, %43 : vector<16x128xf32>
    %cst_21 = arith.constant dense<0.000000e+00> : vector<16x128xf32>
    %45 = tpu.matmul %37, %39, %cst_21 {dimension_numbers = #tpu.dot_dimension_numbers<[1], [0], [0], [1], [0, 0, 1, 1], [], []>} : vector<16x128xbf16>, vector<128x128xbf16>, vector<16x128xf32> -> vector<16x128xf32>
    %46 = arith.addf %44, %45 : vector<16x128xf32>
    %47 = arith.truncf %0 : vector<16x128xf32> to vector<16x128xbf16>
    %48 = arith.extf %47 : vector<16x128xbf16> to vector<16x128xf32>
    %49 = arith.subf %0, %48 : vector<16x128xf32>
    %50 = arith.truncf %49 : vector<16x128xf32> to vector<16x128xbf16>
    %c1 = arith.constant 1 : index
    %c0_22 = arith.constant 0 : index
    %c0_23 = arith.constant 0 : index
    %51 = vector.load %arg1[%c1, %c0_22, %c0_23] : memref<3x128x128xbf16, #tpu.memory_space<vmem>>, vector<1x128x128xbf16>
    %52 = vector.shape_cast %51 : vector<1x128x128xbf16> to vector<128x128xbf16>
    %c1_24 = arith.constant 1 : index
    %c0_25 = arith.constant 0 : index
    %c0_26 = arith.constant 0 : index
    %53 = vector.load %arg2[%c1_24, %c0_25, %c0_26] : memref<3x128x128xbf16, #tpu.memory_space<vmem>>, vector<1x128x128xbf16>
    %54 = vector.shape_cast %53 : vector<1x128x128xbf16> to vector<128x128xbf16>
    %cst_27 = arith.constant dense<0.000000e+00> : vector<16x128xf32>
    %55 = tpu.matmul %47, %52, %cst_27 {dimension_numbers = #tpu.dot_dimension_numbers<[1], [0], [0], [1], [0, 0, 1, 1], [], []>} : vector<16x128xbf16>, vector<128x128xbf16>, vector<16x128xf32> -> vector<16x128xf32>
    %cst_28 = arith.constant dense<0.000000e+00> : vector<16x128xf32>
    %56 = tpu.matmul %47, %54, %cst_28 {dimension_numbers = #tpu.dot_dimension_numbers<[1], [0], [0], [1], [0, 0, 1, 1], [], []>} : vector<16x128xbf16>, vector<128x128xbf16>, vector<16x128xf32> -> vector<16x128xf32>
    %57 = arith.addf %55, %56 : vector<16x128xf32>
    %cst_29 = arith.constant dense<0.000000e+00> : vector<16x128xf32>
    %58 = tpu.matmul %50, %52, %cst_29 {dimension_numbers = #tpu.dot_dimension_numbers<[1], [0], [0], [1], [0, 0, 1, 1], [], []>} : vector<16x128xbf16>, vector<128x128xbf16>, vector<16x128xf32> -> vector<16x128xf32>
    %59 = arith.addf %57, %58 : vector<16x128xf32>
    %60 = arith.addf %46, %59 : vector<16x128xf32>
    %61 = arith.truncf %33 : vector<16x128xf32> to vector<16x128xbf16>
    %62 = arith.extf %61 : vector<16x128xbf16> to vector<16x128xf32>
    %63 = arith.subf %33, %62 : vector<16x128xf32>
    %64 = arith.truncf %63 : vector<16x128xf32> to vector<16x128xbf16>
    %c2 = arith.constant 2 : index
    %c0_30 = arith.constant 0 : index
    %c0_31 = arith.constant 0 : index
    %65 = vector.load %arg1[%c2, %c0_30, %c0_31] : memref<3x128x128xbf16, #tpu.memory_space<vmem>>, vector<1x128x128xbf16>
    %66 = vector.shape_cast %65 : vector<1x128x128xbf16> to vector<128x128xbf16>
    %c2_32 = arith.constant 2 : index
    %c0_33 = arith.constant 0 : index
    %c0_34 = arith.constant 0 : index
    %67 = vector.load %arg2[%c2_32, %c0_33, %c0_34] : memref<3x128x128xbf16, #tpu.memory_space<vmem>>, vector<1x128x128xbf16>
    %68 = vector.shape_cast %67 : vector<1x128x128xbf16> to vector<128x128xbf16>
    %cst_35 = arith.constant dense<0.000000e+00> : vector<16x128xf32>
    %69 = tpu.matmul %61, %66, %cst_35 {dimension_numbers = #tpu.dot_dimension_numbers<[1], [0], [0], [1], [0, 0, 1, 1], [], []>} : vector<16x128xbf16>, vector<128x128xbf16>, vector<16x128xf32> -> vector<16x128xf32>
    %cst_36 = arith.constant dense<0.000000e+00> : vector<16x128xf32>
    %70 = tpu.matmul %61, %68, %cst_36 {dimension_numbers = #tpu.dot_dimension_numbers<[1], [0], [0], [1], [0, 0, 1, 1], [], []>} : vector<16x128xbf16>, vector<128x128xbf16>, vector<16x128xf32> -> vector<16x128xf32>
    %71 = arith.addf %69, %70 : vector<16x128xf32>
    %cst_37 = arith.constant dense<0.000000e+00> : vector<16x128xf32>
    %72 = tpu.matmul %64, %66, %cst_37 {dimension_numbers = #tpu.dot_dimension_numbers<[1], [0], [0], [1], [0, 0, 1, 1], [], []>} : vector<16x128xbf16>, vector<128x128xbf16>, vector<16x128xf32> -> vector<16x128xf32>
    %73 = arith.addf %71, %72 : vector<16x128xf32>
    %74 = arith.addf %60, %73 : vector<16x128xf32>
    %75 = vector.broadcast %2 : vector<1x128xf32> to vector<16x128xf32>
    %76 = arith.addf %74, %75 : vector<16x128xf32>
    %cst_38 = arith.constant dense<0.000000e+00> : vector<128xf32>
    %77 = vector.multi_reduction <add>, %76, %cst_38 [0] : vector<16x128xf32> to vector<128xf32>
    %78 = vector.shape_cast %77 : vector<128xf32> to vector<1x128xf32>
    %79 = vector.shape_cast %78 : vector<1x128xf32> to vector<1x128xf32>
    %80 = vector.broadcast %79 : vector<1x128xf32> to vector<8x128xf32>
    %cst_39 = arith.constant dense<0.000000e+00> : vector<8x128xf32>
    %81 = tpu.matmul %80, %1, %cst_39 {dimension_numbers = #tpu.dot_dimension_numbers<[1], [0], [0], [1], [0, 0, 1, 1], [], []>, precision = #tpu.contract_precision<fp32>} : vector<8x128xf32>, vector<128x128xf32>, vector<8x128xf32> -> vector<8x128xf32>
    %82 = vector.extract_strided_slice %81 {offsets = [0, 0], sizes = [1, 128], strides = [1, 1]} : vector<8x128xf32> to vector<1x128xf32>
    %cst_40 = arith.constant 0.001953125 : f32
    %83 = vector.broadcast %cst_40 : f32 to vector<1x128xf32>
    %84 = arith.mulf %82, %83 : vector<1x128xf32>
    %85 = vector.broadcast %84 : vector<1x128xf32> to vector<16x128xf32>
    %86 = arith.subf %76, %85 : vector<16x128xf32>
    %87 = arith.mulf %86, %86 : vector<16x128xf32>
    %cst_41 = arith.constant dense<0.000000e+00> : vector<128xf32>
    %88 = vector.multi_reduction <add>, %87, %cst_41 [0] : vector<16x128xf32> to vector<128xf32>
    %89 = vector.shape_cast %88 : vector<128xf32> to vector<1x128xf32>
    %90 = vector.shape_cast %89 : vector<1x128xf32> to vector<1x128xf32>
    %91 = vector.broadcast %90 : vector<1x128xf32> to vector<8x128xf32>
    %cst_42 = arith.constant dense<0.000000e+00> : vector<8x128xf32>
    %92 = tpu.matmul %91, %1, %cst_42 {dimension_numbers = #tpu.dot_dimension_numbers<[1], [0], [0], [1], [0, 0, 1, 1], [], []>, precision = #tpu.contract_precision<fp32>} : vector<8x128xf32>, vector<128x128xf32>, vector<8x128xf32> -> vector<8x128xf32>
    %93 = vector.extract_strided_slice %92 {offsets = [0, 0], sizes = [1, 128], strides = [1, 1]} : vector<8x128xf32> to vector<1x128xf32>
    %cst_43 = arith.constant 0.001953125 : f32
    %94 = vector.broadcast %cst_43 : f32 to vector<1x128xf32>
    %95 = arith.mulf %93, %94 : vector<1x128xf32>
    %cst_44 = arith.constant 9.99999974E-6 : f32
    %96 = vector.broadcast %cst_44 : f32 to vector<1x128xf32>
    %97 = arith.addf %95, %96 : vector<1x128xf32>
    %98 = math.rsqrt %97 : vector<1x128xf32>
    %99 = arith.mulf %3, %98 : vector<1x128xf32>
    %100 = vector.broadcast %99 : vector<1x128xf32> to vector<16x128xf32>
    %101 = arith.mulf %86, %100 : vector<16x128xf32>
    %102 = vector.broadcast %4 : vector<1x128xf32> to vector<16x128xf32>
    %103 = arith.addf %101, %102 : vector<16x128xf32>
    %cst_45 = arith.constant 0.000000e+00 : f32
    %104 = vector.broadcast %cst_45 : f32 to vector<16x128xf32>
    %105 = arith.maximumf %103, %104 : vector<16x128xf32>
    %c0_i32_46 = arith.constant 0 : i32
    %106 = arith.addf %0, %105 : vector<16x128xf32>
    %c1_i32_47 = arith.constant 1 : i32
    %107 = tpu.dynamic_rotate %106 by %c1_i32_47 dim 0 : vector<16x128xf32>, i32 -> vector<16x128xf32>
    %108 = arith.mulf %107, %25 : vector<16x128xf32>
    %c15_i32_48 = arith.constant 15 : i32
    %109 = tpu.dynamic_rotate %106 by %c15_i32_48 dim 0 : vector<16x128xf32>, i32 -> vector<16x128xf32>
    %110 = arith.mulf %109, %29 : vector<16x128xf32>
    %111 = arith.truncf %108 : vector<16x128xf32> to vector<16x128xbf16>
    %112 = arith.extf %111 : vector<16x128xbf16> to vector<16x128xf32>
    %113 = arith.subf %108, %112 : vector<16x128xf32>
    %114 = arith.truncf %113 : vector<16x128xf32> to vector<16x128xbf16>
    %c0_49 = arith.constant 0 : index
    %c0_50 = arith.constant 0 : index
    %c0_51 = arith.constant 0 : index
    %115 = vector.load %arg1[%c0_49, %c0_50, %c0_51] : memref<3x128x128xbf16, #tpu.memory_space<vmem>>, vector<1x128x128xbf16>
    %116 = vector.shape_cast %115 : vector<1x128x128xbf16> to vector<128x128xbf16>
    %c0_52 = arith.constant 0 : index
    %c0_53 = arith.constant 0 : index
    %c0_54 = arith.constant 0 : index
    %117 = vector.load %arg2[%c0_52, %c0_53, %c0_54] : memref<3x128x128xbf16, #tpu.memory_space<vmem>>, vector<1x128x128xbf16>
    %118 = vector.shape_cast %117 : vector<1x128x128xbf16> to vector<128x128xbf16>
    %cst_55 = arith.constant dense<0.000000e+00> : vector<16x128xf32>
    %119 = tpu.matmul %111, %116, %cst_55 {dimension_numbers = #tpu.dot_dimension_numbers<[1], [0], [0], [1], [0, 0, 1, 1], [], []>} : vector<16x128xbf16>, vector<128x128xbf16>, vector<16x128xf32> -> vector<16x128xf32>
    %cst_56 = arith.constant dense<0.000000e+00> : vector<16x128xf32>
    %120 = tpu.matmul %111, %118, %cst_56 {dimension_numbers = #tpu.dot_dimension_numbers<[1], [0], [0], [1], [0, 0, 1, 1], [], []>} : vector<16x128xbf16>, vector<128x128xbf16>, vector<16x128xf32> -> vector<16x128xf32>
    %121 = arith.addf %119, %120 : vector<16x128xf32>
    %cst_57 = arith.constant dense<0.000000e+00> : vector<16x128xf32>
    %122 = tpu.matmul %114, %116, %cst_57 {dimension_numbers = #tpu.dot_dimension_numbers<[1], [0], [0], [1], [0, 0, 1, 1], [], []>} : vector<16x128xbf16>, vector<128x128xbf16>, vector<16x128xf32> -> vector<16x128xf32>
    %123 = arith.addf %121, %122 : vector<16x128xf32>
    %124 = arith.truncf %106 : vector<16x128xf32> to vector<16x128xbf16>
    %125 = arith.extf %124 : vector<16x128xbf16> to vector<16x128xf32>
    %126 = arith.subf %106, %125 : vector<16x128xf32>
    %127 = arith.truncf %126 : vector<16x128xf32> to vector<16x128xbf16>
    %c1_58 = arith.constant 1 : index
    %c0_59 = arith.constant 0 : index
    %c0_60 = arith.constant 0 : index
    %128 = vector.load %arg1[%c1_58, %c0_59, %c0_60] : memref<3x128x128xbf16, #tpu.memory_space<vmem>>, vector<1x128x128xbf16>
    %129 = vector.shape_cast %128 : vector<1x128x128xbf16> to vector<128x128xbf16>
    %c1_61 = arith.constant 1 : index
    %c0_62 = arith.constant 0 : index
    %c0_63 = arith.constant 0 : index
    %130 = vector.load %arg2[%c1_61, %c0_62, %c0_63] : memref<3x128x128xbf16, #tpu.memory_space<vmem>>, vector<1x128x128xbf16>
    %131 = vector.shape_cast %130 : vector<1x128x128xbf16> to vector<128x128xbf16>
    %cst_64 = arith.constant dense<0.000000e+00> : vector<16x128xf32>
    %132 = tpu.matmul %124, %129, %cst_64 {dimension_numbers = #tpu.dot_dimension_numbers<[1], [0], [0], [1], [0, 0, 1, 1], [], []>} : vector<16x128xbf16>, vector<128x128xbf16>, vector<16x128xf32> -> vector<16x128xf32>
    %cst_65 = arith.constant dense<0.000000e+00> : vector<16x128xf32>
    %133 = tpu.matmul %124, %131, %cst_65 {dimension_numbers = #tpu.dot_dimension_numbers<[1], [0], [0], [1], [0, 0, 1, 1], [], []>} : vector<16x128xbf16>, vector<128x128xbf16>, vector<16x128xf32> -> vector<16x128xf32>
    %134 = arith.addf %132, %133 : vector<16x128xf32>
    %cst_66 = arith.constant dense<0.000000e+00> : vector<16x128xf32>
    %135 = tpu.matmul %127, %129, %cst_66 {dimension_numbers = #tpu.dot_dimension_numbers<[1], [0], [0], [1], [0, 0, 1, 1], [], []>} : vector<16x128xbf16>, vector<128x128xbf16>, vector<16x128xf32> -> vector<16x128xf32>
    %136 = arith.addf %134, %135 : vector<16x128xf32>
    %137 = arith.addf %123, %136 : vector<16x128xf32>
    %138 = arith.truncf %110 : vector<16x128xf32> to vector<16x128xbf16>
    %139 = arith.extf %138 : vector<16x128xbf16> to vector<16x128xf32>
    %140 = arith.subf %110, %139 : vector<16x128xf32>
    %141 = arith.truncf %140 : vector<16x128xf32> to vector<16x128xbf16>
    %c2_67 = arith.constant 2 : index
    %c0_68 = arith.constant 0 : index
    %c0_69 = arith.constant 0 : index
    %142 = vector.load %arg1[%c2_67, %c0_68, %c0_69] : memref<3x128x128xbf16, #tpu.memory_space<vmem>>, vector<1x128x128xbf16>
    %143 = vector.shape_cast %142 : vector<1x128x128xbf16> to vector<128x128xbf16>
    %c2_70 = arith.constant 2 : index
    %c0_71 = arith.constant 0 : index
    %c0_72 = arith.constant 0 : index
    %144 = vector.load %arg2[%c2_70, %c0_71, %c0_72] : memref<3x128x128xbf16, #tpu.memory_space<vmem>>, vector<1x128x128xbf16>
    %145 = vector.shape_cast %144 : vector<1x128x128xbf16> to vector<128x128xbf16>
    %cst_73 = arith.constant dense<0.000000e+00> : vector<16x128xf32>
    %146 = tpu.matmul %138, %143, %cst_73 {dimension_numbers = #tpu.dot_dimension_numbers<[1], [0], [0], [1], [0, 0, 1, 1], [], []>} : vector<16x128xbf16>, vector<128x128xbf16>, vector<16x128xf32> -> vector<16x128xf32>
    %cst_74 = arith.constant dense<0.000000e+00> : vector<16x128xf32>
    %147 = tpu.matmul %138, %145, %cst_74 {dimension_numbers = #tpu.dot_dimension_numbers<[1], [0], [0], [1], [0, 0, 1, 1], [], []>} : vector<16x128xbf16>, vector<128x128xbf16>, vector<16x128xf32> -> vector<16x128xf32>
    %148 = arith.addf %146, %147 : vector<16x128xf32>
    %cst_75 = arith.constant dense<0.000000e+00> : vector<16x128xf32>
    %149 = tpu.matmul %141, %143, %cst_75 {dimension_numbers = #tpu.dot_dimension_numbers<[1], [0], [0], [1], [0, 0, 1, 1], [], []>} : vector<16x128xbf16>, vector<128x128xbf16>, vector<16x128xf32> -> vector<16x128xf32>
    %150 = arith.addf %148, %149 : vector<16x128xf32>
    %151 = arith.addf %137, %150 : vector<16x128xf32>
    %152 = vector.broadcast %2 : vector<1x128xf32> to vector<16x128xf32>
    %153 = arith.addf %151, %152 : vector<16x128xf32>
    %cst_76 = arith.constant dense<0.000000e+00> : vector<128xf32>
    %154 = vector.multi_reduction <add>, %153, %cst_76 [0] : vector<16x128xf32> to vector<128xf32>
    %155 = vector.shape_cast %154 : vector<128xf32> to vector<1x128xf32>
    %156 = vector.shape_cast %155 : vector<1x128xf32> to vector<1x128xf32>
    %157 = vector.broadcast %156 : vector<1x128xf32> to vector<8x128xf32>
    %cst_77 = arith.constant dense<0.000000e+00> : vector<8x128xf32>
    %158 = tpu.matmul %157, %1, %cst_77 {dimension_numbers = #tpu.dot_dimension_numbers<[1], [0], [0], [1], [0, 0, 1, 1], [], []>, precision = #tpu.contract_precision<fp32>} : vector<8x128xf32>, vector<128x128xf32>, vector<8x128xf32> -> vector<8x128xf32>
    %159 = vector.extract_strided_slice %158 {offsets = [0, 0], sizes = [1, 128], strides = [1, 1]} : vector<8x128xf32> to vector<1x128xf32>
    %cst_78 = arith.constant 0.001953125 : f32
    %160 = vector.broadcast %cst_78 : f32 to vector<1x128xf32>
    %161 = arith.mulf %159, %160 : vector<1x128xf32>
    %162 = vector.broadcast %161 : vector<1x128xf32> to vector<16x128xf32>
    %163 = arith.subf %153, %162 : vector<16x128xf32>
    %164 = arith.mulf %163, %163 : vector<16x128xf32>
    %cst_79 = arith.constant dense<0.000000e+00> : vector<128xf32>
    %165 = vector.multi_reduction <add>, %164, %cst_79 [0] : vector<16x128xf32> to vector<128xf32>
    %166 = vector.shape_cast %165 : vector<128xf32> to vector<1x128xf32>
    %167 = vector.shape_cast %166 : vector<1x128xf32> to vector<1x128xf32>
    %168 = vector.broadcast %167 : vector<1x128xf32> to vector<8x128xf32>
    %cst_80 = arith.constant dense<0.000000e+00> : vector<8x128xf32>
    %169 = tpu.matmul %168, %1, %cst_80 {dimension_numbers = #tpu.dot_dimension_numbers<[1], [0], [0], [1], [0, 0, 1, 1], [], []>, precision = #tpu.contract_precision<fp32>} : vector<8x128xf32>, vector<128x128xf32>, vector<8x128xf32> -> vector<8x128xf32>
    %170 = vector.extract_strided_slice %169 {offsets = [0, 0], sizes = [1, 128], strides = [1, 1]} : vector<8x128xf32> to vector<1x128xf32>
    %cst_81 = arith.constant 0.001953125 : f32
    %171 = vector.broadcast %cst_81 : f32 to vector<1x128xf32>
    %172 = arith.mulf %170, %171 : vector<1x128xf32>
    %cst_82 = arith.constant 9.99999974E-6 : f32
    %173 = vector.broadcast %cst_82 : f32 to vector<1x128xf32>
    %174 = arith.addf %172, %173 : vector<1x128xf32>
    %175 = math.rsqrt %174 : vector<1x128xf32>
    %176 = arith.mulf %3, %175 : vector<1x128xf32>
    %177 = vector.broadcast %176 : vector<1x128xf32> to vector<16x128xf32>
    %178 = arith.mulf %163, %177 : vector<16x128xf32>
    %179 = vector.broadcast %4 : vector<1x128xf32> to vector<16x128xf32>
    %180 = arith.addf %178, %179 : vector<16x128xf32>
    %cst_83 = arith.constant 0.000000e+00 : f32
    %181 = vector.broadcast %cst_83 : f32 to vector<16x128xf32>
    %182 = arith.maximumf %180, %181 : vector<16x128xf32>
    %c1_i32_84 = arith.constant 1 : i32
    %183 = arith.addf %0, %182 : vector<16x128xf32>
    %c1_i32_85 = arith.constant 1 : i32
    %184 = tpu.dynamic_rotate %183 by %c1_i32_85 dim 0 : vector<16x128xf32>, i32 -> vector<16x128xf32>
    %185 = arith.mulf %184, %25 : vector<16x128xf32>
    %c15_i32_86 = arith.constant 15 : i32
    %186 = tpu.dynamic_rotate %183 by %c15_i32_86 dim 0 : vector<16x128xf32>, i32 -> vector<16x128xf32>
    %187 = arith.mulf %186, %29 : vector<16x128xf32>
    %188 = arith.truncf %185 : vector<16x128xf32> to vector<16x128xbf16>
    %189 = arith.extf %188 : vector<16x128xbf16> to vector<16x128xf32>
    %190 = arith.subf %185, %189 : vector<16x128xf32>
    %191 = arith.truncf %190 : vector<16x128xf32> to vector<16x128xbf16>
    %c0_87 = arith.constant 0 : index
    %c0_88 = arith.constant 0 : index
    %c0_89 = arith.constant 0 : index
    %192 = vector.load %arg1[%c0_87, %c0_88, %c0_89] : memref<3x128x128xbf16, #tpu.memory_space<vmem>>, vector<1x128x128xbf16>
    %193 = vector.shape_cast %192 : vector<1x128x128xbf16> to vector<128x128xbf16>
    %c0_90 = arith.constant 0 : index
    %c0_91 = arith.constant 0 : index
    %c0_92 = arith.constant 0 : index
    %194 = vector.load %arg2[%c0_90, %c0_91, %c0_92] : memref<3x128x128xbf16, #tpu.memory_space<vmem>>, vector<1x128x128xbf16>
    %195 = vector.shape_cast %194 : vector<1x128x128xbf16> to vector<128x128xbf16>
    %cst_93 = arith.constant dense<0.000000e+00> : vector<16x128xf32>
    %196 = tpu.matmul %188, %193, %cst_93 {dimension_numbers = #tpu.dot_dimension_numbers<[1], [0], [0], [1], [0, 0, 1, 1], [], []>} : vector<16x128xbf16>, vector<128x128xbf16>, vector<16x128xf32> -> vector<16x128xf32>
    %cst_94 = arith.constant dense<0.000000e+00> : vector<16x128xf32>
    %197 = tpu.matmul %188, %195, %cst_94 {dimension_numbers = #tpu.dot_dimension_numbers<[1], [0], [0], [1], [0, 0, 1, 1], [], []>} : vector<16x128xbf16>, vector<128x128xbf16>, vector<16x128xf32> -> vector<16x128xf32>
    %198 = arith.addf %196, %197 : vector<16x128xf32>
    %cst_95 = arith.constant dense<0.000000e+00> : vector<16x128xf32>
    %199 = tpu.matmul %191, %193, %cst_95 {dimension_numbers = #tpu.dot_dimension_numbers<[1], [0], [0], [1], [0, 0, 1, 1], [], []>} : vector<16x128xbf16>, vector<128x128xbf16>, vector<16x128xf32> -> vector<16x128xf32>
    %200 = arith.addf %198, %199 : vector<16x128xf32>
    %201 = arith.truncf %183 : vector<16x128xf32> to vector<16x128xbf16>
    %202 = arith.extf %201 : vector<16x128xbf16> to vector<16x128xf32>
    %203 = arith.subf %183, %202 : vector<16x128xf32>
    %204 = arith.truncf %203 : vector<16x128xf32> to vector<16x128xbf16>
    %c1_96 = arith.constant 1 : index
    %c0_97 = arith.constant 0 : index
    %c0_98 = arith.constant 0 : index
    %205 = vector.load %arg1[%c1_96, %c0_97, %c0_98] : memref<3x128x128xbf16, #tpu.memory_space<vmem>>, vector<1x128x128xbf16>
    %206 = vector.shape_cast %205 : vector<1x128x128xbf16> to vector<128x128xbf16>
    %c1_99 = arith.constant 1 : index
    %c0_100 = arith.constant 0 : index
    %c0_101 = arith.constant 0 : index
    %207 = vector.load %arg2[%c1_99, %c0_100, %c0_101] : memref<3x128x128xbf16, #tpu.memory_space<vmem>>, vector<1x128x128xbf16>
    %208 = vector.shape_cast %207 : vector<1x128x128xbf16> to vector<128x128xbf16>
    %cst_102 = arith.constant dense<0.000000e+00> : vector<16x128xf32>
    %209 = tpu.matmul %201, %206, %cst_102 {dimension_numbers = #tpu.dot_dimension_numbers<[1], [0], [0], [1], [0, 0, 1, 1], [], []>} : vector<16x128xbf16>, vector<128x128xbf16>, vector<16x128xf32> -> vector<16x128xf32>
    %cst_103 = arith.constant dense<0.000000e+00> : vector<16x128xf32>
    %210 = tpu.matmul %201, %208, %cst_103 {dimension_numbers = #tpu.dot_dimension_numbers<[1], [0], [0], [1], [0, 0, 1, 1], [], []>} : vector<16x128xbf16>, vector<128x128xbf16>, vector<16x128xf32> -> vector<16x128xf32>
    %211 = arith.addf %209, %210 : vector<16x128xf32>
    %cst_104 = arith.constant dense<0.000000e+00> : vector<16x128xf32>
    %212 = tpu.matmul %204, %206, %cst_104 {dimension_numbers = #tpu.dot_dimension_numbers<[1], [0], [0], [1], [0, 0, 1, 1], [], []>} : vector<16x128xbf16>, vector<128x128xbf16>, vector<16x128xf32> -> vector<16x128xf32>
    %213 = arith.addf %211, %212 : vector<16x128xf32>
    %214 = arith.addf %200, %213 : vector<16x128xf32>
    %215 = arith.truncf %187 : vector<16x128xf32> to vector<16x128xbf16>
    %216 = arith.extf %215 : vector<16x128xbf16> to vector<16x128xf32>
    %217 = arith.subf %187, %216 : vector<16x128xf32>
    %218 = arith.truncf %217 : vector<16x128xf32> to vector<16x128xbf16>
    %c2_105 = arith.constant 2 : index
    %c0_106 = arith.constant 0 : index
    %c0_107 = arith.constant 0 : index
    %219 = vector.load %arg1[%c2_105, %c0_106, %c0_107] : memref<3x128x128xbf16, #tpu.memory_space<vmem>>, vector<1x128x128xbf16>
    %220 = vector.shape_cast %219 : vector<1x128x128xbf16> to vector<128x128xbf16>
    %c2_108 = arith.constant 2 : index
    %c0_109 = arith.constant 0 : index
    %c0_110 = arith.constant 0 : index
    %221 = vector.load %arg2[%c2_108, %c0_109, %c0_110] : memref<3x128x128xbf16, #tpu.memory_space<vmem>>, vector<1x128x128xbf16>
    %222 = vector.shape_cast %221 : vector<1x128x128xbf16> to vector<128x128xbf16>
    %cst_111 = arith.constant dense<0.000000e+00> : vector<16x128xf32>
    %223 = tpu.matmul %215, %220, %cst_111 {dimension_numbers = #tpu.dot_dimension_numbers<[1], [0], [0], [1], [0, 0, 1, 1], [], []>} : vector<16x128xbf16>, vector<128x128xbf16>, vector<16x128xf32> -> vector<16x128xf32>
    %cst_112 = arith.constant dense<0.000000e+00> : vector<16x128xf32>
    %224 = tpu.matmul %215, %222, %cst_112 {dimension_numbers = #tpu.dot_dimension_numbers<[1], [0], [0], [1], [0, 0, 1, 1], [], []>} : vector<16x128xbf16>, vector<128x128xbf16>, vector<16x128xf32> -> vector<16x128xf32>
    %225 = arith.addf %223, %224 : vector<16x128xf32>
    %cst_113 = arith.constant dense<0.000000e+00> : vector<16x128xf32>
    %226 = tpu.matmul %218, %220, %cst_113 {dimension_numbers = #tpu.dot_dimension_numbers<[1], [0], [0], [1], [0, 0, 1, 1], [], []>} : vector<16x128xbf16>, vector<128x128xbf16>, vector<16x128xf32> -> vector<16x128xf32>
    %227 = arith.addf %225, %226 : vector<16x128xf32>
    %228 = arith.addf %214, %227 : vector<16x128xf32>
    %229 = vector.broadcast %2 : vector<1x128xf32> to vector<16x128xf32>
    %230 = arith.addf %228, %229 : vector<16x128xf32>
    %cst_114 = arith.constant dense<0.000000e+00> : vector<128xf32>
    %231 = vector.multi_reduction <add>, %230, %cst_114 [0] : vector<16x128xf32> to vector<128xf32>
    %232 = vector.shape_cast %231 : vector<128xf32> to vector<1x128xf32>
    %233 = vector.shape_cast %232 : vector<1x128xf32> to vector<1x128xf32>
    %234 = vector.broadcast %233 : vector<1x128xf32> to vector<8x128xf32>
    %cst_115 = arith.constant dense<0.000000e+00> : vector<8x128xf32>
    %235 = tpu.matmul %234, %1, %cst_115 {dimension_numbers = #tpu.dot_dimension_numbers<[1], [0], [0], [1], [0, 0, 1, 1], [], []>, precision = #tpu.contract_precision<fp32>} : vector<8x128xf32>, vector<128x128xf32>, vector<8x128xf32> -> vector<8x128xf32>
    %236 = vector.extract_strided_slice %235 {offsets = [0, 0], sizes = [1, 128], strides = [1, 1]} : vector<8x128xf32> to vector<1x128xf32>
    %cst_116 = arith.constant 0.001953125 : f32
    %237 = vector.broadcast %cst_116 : f32 to vector<1x128xf32>
    %238 = arith.mulf %236, %237 : vector<1x128xf32>
    %239 = vector.broadcast %238 : vector<1x128xf32> to vector<16x128xf32>
    %240 = arith.subf %230, %239 : vector<16x128xf32>
    %241 = arith.mulf %240, %240 : vector<16x128xf32>
    %cst_117 = arith.constant dense<0.000000e+00> : vector<128xf32>
    %242 = vector.multi_reduction <add>, %241, %cst_117 [0] : vector<16x128xf32> to vector<128xf32>
    %243 = vector.shape_cast %242 : vector<128xf32> to vector<1x128xf32>
    %244 = vector.shape_cast %243 : vector<1x128xf32> to vector<1x128xf32>
    %245 = vector.broadcast %244 : vector<1x128xf32> to vector<8x128xf32>
    %cst_118 = arith.constant dense<0.000000e+00> : vector<8x128xf32>
    %246 = tpu.matmul %245, %1, %cst_118 {dimension_numbers = #tpu.dot_dimension_numbers<[1], [0], [0], [1], [0, 0, 1, 1], [], []>, precision = #tpu.contract_precision<fp32>} : vector<8x128xf32>, vector<128x128xf32>, vector<8x128xf32> -> vector<8x128xf32>
    %247 = vector.extract_strided_slice %246 {offsets = [0, 0], sizes = [1, 128], strides = [1, 1]} : vector<8x128xf32> to vector<1x128xf32>
    %cst_119 = arith.constant 0.001953125 : f32
    %248 = vector.broadcast %cst_119 : f32 to vector<1x128xf32>
    %249 = arith.mulf %247, %248 : vector<1x128xf32>
    %cst_120 = arith.constant 9.99999974E-6 : f32
    %250 = vector.broadcast %cst_120 : f32 to vector<1x128xf32>
    %251 = arith.addf %249, %250 : vector<1x128xf32>
    %252 = math.rsqrt %251 : vector<1x128xf32>
    %253 = arith.mulf %3, %252 : vector<1x128xf32>
    %254 = vector.broadcast %253 : vector<1x128xf32> to vector<16x128xf32>
    %255 = arith.mulf %240, %254 : vector<16x128xf32>
    %256 = vector.broadcast %4 : vector<1x128xf32> to vector<16x128xf32>
    %257 = arith.addf %255, %256 : vector<16x128xf32>
    %cst_121 = arith.constant 0.000000e+00 : f32
    %258 = vector.broadcast %cst_121 : f32 to vector<16x128xf32>
    %259 = arith.maximumf %257, %258 : vector<16x128xf32>
    %c0_122 = arith.constant 0 : index
    %c0_123 = arith.constant 0 : index
    %260 = vector.load %arg7[%c0_122, %c0_123] : memref<16x128xf32, #tpu.memory_space<vmem>>, vector<16x128xf32>
    tpu.vector_store %arg7[%c0_122, %c0_123], %259 {strides = array<i32>} : memref<16x128xf32, #tpu.memory_space<vmem>>, vector<16x128xf32>,
    return
  }
}

</mosaic_0001>

<bundles_post_ra>
// kernel: tpu_custom_call.1
= control target key start
LH: loop header
LB: loop body
LE: loop exit
PB: predicated region body
PF: predicated region fallthrough
CT: control target
= control target key end

     0   :  { %12 = vsyncpa [#allocation3], 0  ;;  %s11552_s0 = inlined_call_operand.hbm [shape: f32[16,128], index: 0, kind: input, shape index: {}]   ;;  %s11553_s1 = inlined_call_operand.hbm [shape: bf16[3,128,128], index: 1, kind: input, shape index: {}]   ;;  %s11554_s2 = inlined_call_operand.hbm [shape: bf16[3,128,128], index: 2, kind: input, shape index: {}]   ;;  %s11555_s3 = inlined_call_operand.hbm [shape: f32[128,128], index: 3, kind: input, shape index: {}]   ;;  %s11556_s4 = inlined_call_operand.vmem [shape: f32[1,128], index: 4, kind: input, shape index: {}]   ;;  %s11557_s5 = inlined_call_operand.vmem [shape: f32[1,128], index: 5, kind: input, shape index: {}]   ;;  %s11558_s6 = inlined_call_operand.vmem [shape: f32[1,128], index: 6, kind: input, shape index: {}]   ;;  %s11559_s7 = inlined_call_operand.hbm [shape: f32[16,128], index: 7, kind: output, shape index: {}]  }
   0x1   :  { %13 = vsyncpa [#allocation6], 0 }
   0x2   :  { %14 = vsyncpa [#allocation9], 0 }
   0x3   :  { %15 = vsyncpa [#allocation4], 0  ;;  %s9650_s24 = smov [#allocation5]   ;;  %s9532_s28 = scalar_lea.hbm %s11553_s1, 3072 }
   0x4   :  { %s33_s25 = sshll.u32 %s9650_s24, 4  ;;  %p9533_p0 = scmp.ne.s32.totalorder %s11553_s1, %s9532_s28  ;;  %s34_s25 = int_to_ptr.vmem [resolvable:$true] %s33_s25 }
   0x5   :  { %p9536_p1 = scmp.lt.u32.totalorder %s9532_s28, %s11553_s1 }
   0x7   :  { %p9538_p2 = pnand %p9536_p1, %p9533_p0 }
   0x9   :  { %9541 = shalt.err (!%p9538_p2)
}
   0xa   :  { %s9542_s10 = scalar_lea.vmem %s34_s25, 3072  ;;  %p9547_p4 = scmp.lt.s32.totalorder %s34_s25, %s34_s25 }
   0xb   :  { %p9543_p3 = scmp.ne.s32.totalorder %s34_s25, %s9542_s10  ;;  %p9548_p5 = scmp.lt.s32.totalorder %s9542_s10, %s9542_s10 }
   0xd   :  { %p9549_p6 = por %p9548_p5, %p9547_p4 }
   0xf   :  { %p9550_p7 = pnand %p9549_p6, %p9543_p3 }
  0x11   :  { %9553 = shalt.err (!%p9550_p7)
}
  0x12   :  { %s9651_s11 = smov 64   ;;  %s9652_s12 = smov 4  }
  0x13   :  { %39 = dma.hbm_to_vmem [thread:$0]  %s11553_s1, 3072, %s34_s25, [#allocation6], %s9651_s11, %s9651_s11, %s9652_s12  }
  0x14   :  { %s9653_s15 = smov [#allocation2]   ;;  %s9554_s19 = scalar_lea.hbm %s11552_s0, 256 }
  0x15   :  { %s21_s16 = sshll.u32 %s9653_s15, 4  ;;  %p9555_p8 = scmp.ne.s32.totalorder %s11552_s0, %s9554_s19  ;;  %s22_s16 = int_to_ptr.vmem [resolvable:$true] %s21_s16 }
  0x16   :  { %p9558_p9 = scmp.lt.u32.totalorder %s9554_s19, %s11552_s0 }
  0x18   :  { %p9560_p10 = pnand %p9558_p9, %p9555_p8 }
  0x1a   :  { %9563 = shalt.err (!%p9560_p10)
}
  0x1b   :  { %s9564_s24 = scalar_lea.vmem %s22_s16, 256  ;;  %p9569_p12 = scmp.lt.s32.totalorder %s22_s16, %s22_s16 }
  0x1c   :  { %p9565_p11 = scmp.ne.s32.totalorder %s22_s16, %s9564_s24  ;;  %p9570_p13 = scmp.lt.s32.totalorder %s9564_s24, %s9564_s24 }
  0x1e   :  { %p9571_p0 = por %p9570_p13, %p9569_p12 }
  0x20   :  { %p9572_p1 = pnand %p9571_p0, %p9565_p11 }
  0x22   :  { %9575 = shalt.err (!%p9572_p1)
}
  0x23   :  { %s9654_s1 = smov 128   ;;  %s9655_s25 = smov 8  }
  0x24   :  { %27 = dma.hbm_to_vmem [thread:$0]  %s11552_s0, 256, %s22_s16, [#allocation3], %s9654_s1, %s9654_s1, %s9655_s25  }
  0x25   :  { %s9656_s28 = smov [#allocation7]   ;;  %s9657_s30 = smov [#allocation8]  }
  0x26   :  { %s45_s29 = sshll.u32 %s9656_s28, 4  ;;  %s57_s8 = sshll.u32 %s9657_s30, 4  ;;  %s46_s29 = int_to_ptr.vmem [resolvable:$true] %s45_s29  ;;  %s9732_s8 = int_to_ptr.vmem [resolvable:$true] %s57_s8 }
  0x27   :  { %s9576_s13 = scalar_lea.hbm %s11554_s2, 3072 }
  0x28   :  { %p9577_p2 = scmp.ne.s32.totalorder %s11554_s2, %s9576_s13  ;;  %p9580_p3 = scmp.lt.u32.totalorder %s9576_s13, %s11554_s2 }
  0x2a   :  { %p9582_p4 = pnand %p9580_p3, %p9577_p2 }
  0x2c   :  { %9585 = shalt.err (!%p9582_p4)
}
  0x2d   :  { %s9586_s0 = scalar_lea.vmem %s46_s29, 3072  ;;  %p9591_p6 = scmp.lt.s32.totalorder %s46_s29, %s46_s29 }
  0x2e   :  { %p9587_p5 = scmp.ne.s32.totalorder %s46_s29, %s9586_s0  ;;  %p9592_p7 = scmp.lt.s32.totalorder %s9586_s0, %s9586_s0 }
  0x30   :  { %p9593_p8 = por %p9592_p7, %p9591_p6 }
  0x32   :  { %p9594_p9 = pnand %p9593_p8, %p9587_p5 }
  0x34   :  { %9597 = shalt.err (!%p9594_p9)
}
  0x35   :  { %51 = dma.hbm_to_vmem [thread:$0]  %s11554_s2, 3072, %s46_s29, [#allocation6], %s9651_s11, %s9651_s11, %s9652_s12  }
  0x36   :  { %s9598_s22 = scalar_lea.hbm %s11555_s3, 2048 }
  0x37   :  { %p9599_p10 = scmp.ne.s32.totalorder %s11555_s3, %s9598_s22  ;;  %p9602_p11 = scmp.lt.u32.totalorder %s9598_s22, %s11555_s3 }
  0x39   :  { %p9604_p12 = pnand %p9602_p11, %p9599_p10 }
  0x3b   :  { %9607 = shalt.err (!%p9604_p12)
}
  0x3c   :  { %s9608_s28 = scalar_lea.vmem %s9732_s8, 2048  ;;  %p9613_p0 = scmp.lt.s32.totalorder %s9732_s8, %s9732_s8 }
  0x3d   :  { %p9609_p13 = scmp.ne.s32.totalorder %s9732_s8, %s9608_s28  ;;  %p9614_p1 = scmp.lt.s32.totalorder %s9608_s28, %s9608_s28 }
  0x3f   :  { %p9615_p2 = por %p9614_p1, %p9613_p0 }
  0x41   :  { %p9616_p3 = pnand %p9615_p2, %p9609_p13 }
  0x43   :  { %9619 = shalt.err (!%p9616_p3)
}
  0x44   :  { %63 = dma.hbm_to_vmem [thread:$0]  %s11555_s3, 2048, %s9732_s8, [#allocation9], %s9654_s1, %s9654_s1, %s9655_s25  }
  0x45   :  { %9642 = dma.done.wait [#allocation3], 256  }
  0x46   :  { %9643 = vsyncadd [#allocation3], 4294967040 }
  0x47   :  { %9644 = dma.done.wait [#allocation6], 6144  }
  0x48   :  { %9645 = vsyncadd [#allocation6], 4294961152 }
  0x49   :  { %9646 = dma.done.wait [#allocation9], 2048  }
  0x4a   :  { %9647 = vsyncadd [#allocation9], 4294965248  ;;  %v11578_v0 = vmov 0.0   ;;  %vm9659_vm0 = vmmov 0   ;;  %v9409_v1 = vld [vmem:[#allocation7] sm:$0xff]   ;;  %v9411_v3 = vld [vmem:[#allocation7 + $0x8] sm:$0xff]   ;;  %v104_v7 = vlaneseq }
  0x4b   :  { %6673 = vmatprep.subr.bf16.mxu0 %v11578_v0  ;;  %6693 = vmatprep.subr.bf16.mxu1 %v11578_v0  ;;  %v9775_v2 = vld [vmem:[#allocation5] sm:$0xff]   ;;  %v9779_v4 = vld [vmem:[#allocation5 + $0x8] sm:$0xff]   ;;  %v9413_v5 = vld [vmem:[#allocation7 + $0x10] sm:$0xff]   ;;  %s9661_s17 = smov [#allocation10]  }
  0x4c   :  { %6689 = vmatprep.mubr.msk.bf16.mxu0 %vm9659_vm0, %v11578_v0  ;;  %6709 = vmatprep.mubr.msk.bf16.mxu1 %vm9659_vm0, %v11578_v0  ;;  %v9784_v6 = vld [vmem:[#allocation5 + $0x10] sm:$0xff]   ;;  %v9415_v8 = vld [vmem:[#allocation7 + $0x18] sm:$0xff]   ;;  %v9789_v10 = vshrl.u32 %v104_v7, 7  ;;  %v9417_v11 = vld [vmem:[#allocation7 + $0x20] sm:$0xff]   ;;  %s5752_s18 = sshll.u32 %s9661_s17, 4  ;;  %s5753_s18 = int_to_ptr.vmem [resolvable:$true] %s5752_s18 }
  0x4d   :  { %6674 = vmatpush3.bf16.msra.mxu0 %v9409_v1  ;;  %6694 = vmatpush3.bf16.msra.mxu1 %v9775_v2  ;;  %v9416_v9 = vld [vmem:[#allocation5 + $0x18] sm:$0xff]   ;;  %v9418_v12 = vld [vmem:[#allocation5 + $0x20] sm:$0xff]   ;;  %v9795_v14 = vld [vmem:[#allocation2] sm:$0xff]  ;;  %s9620_s0 = scalar_lea.vmem %s5753_s18, 256  ;;  %p9625_p5 = scmp.lt.s32.totalorder %s5753_s18, %s5753_s18 }
  0x4e   :  { %6675 = vmatprep.subr.bf16.mxu0 %v11578_v0  ;;  %6695 = vmatprep.subr.bf16.mxu1 %v11578_v0  ;;  %11643 = vst [vmem:[#allocation15_spill] sm:$0xff] %v9789_v10  ;;  %v111_v13 = vand.u32 15, %v9789_v10  ;;  %v9797_v15 = vld [vmem:[#allocation2 + $0x8] sm:$0xff]  ;;  %v9419_v16 = vld [vmem:[#allocation7 + $0x28] sm:$0xff]   ;;  %v143_v17 = vrot.slane %v9795_v14, 7  ;;  %vm145_vm1 = vcmp.lt.s32.totalorder %v9789_v10, 1  ;;  %p9621_p4 = scmp.ne.s32.totalorder %s5753_s18, %s9620_s0  ;;  %p9626_p6 = scmp.lt.s32.totalorder %s9620_s0, %s9620_s0 }
  0x4f   :  { %v144_v18 = vrot.slane %v9797_v15, 7  ;;  %v9420_v19 = vld [vmem:[#allocation5 + $0x28] sm:$0xff]   ;;  %v9421_v20 = vld [vmem:[#allocation7 + $0x30] sm:$0xff]   ;;  %v9423_v25 = vld [vmem:[#allocation7 + $0x38] sm:$0xff]   ;;  %v416_v42 = vpack.c.bf16 %v9797_v15, %v9795_v14  ;;  %v106_v1 = vadd.s32 8, %v9789_v10  ;;  %v151_v7 = vrot.slane %v9797_v15, 1 }
  0x50   :  { %vm131_vm2 = vcmp.ge.s32.totalorder %v111_v13, 1  ;;  %v9422_v23 = vld [vmem:[#allocation5 + $0x30] sm:$0xff]   ;;  %v9424_v27 = vld [vmem:[#allocation5 + $0x38] sm:$0xff]   ;;  %v9425_v29 = vld [vmem:[#allocation7 + $0x40] sm:$0xff]   ;;  %vm152_vm4 = vcmp.lt.s32.totalorder %v9789_v10, 7  ;;  %p9627_p7 = por %p9626_p6, %p9625_p5 }
  0x51   :  { %6676 = vmatpush3.bf16.msra.mxu0 %v9411_v3  ;;  %6696 = vmatpush3.bf16.msra.mxu1 %v9779_v4  ;;  %v9805_v21 = vsel %vm131_vm2, 1.0, %v11578_v0  ;;  %v147_v22 = vsel %vm145_vm1, %v144_v18, %v143_v17  ;;  %v146_v26 = vsel %vm145_vm1, %v143_v17, %v144_v18  ;;  %v9426_v30 = vld [vmem:[#allocation7 + $0x48] sm:$0xff]   ;;  %v9427_v31 = vld [vmem:[#allocation7 + $0x50] sm:$0xff]   ;;  %v9428_v32 = vld [vmem:[#allocation7 + $0x58] sm:$0xff]   ;;  %v417_v50 = vunpack.c.l.bf16 %v416_v42 }
  0x52   :  { %6677 = vmatprep.subr.bf16.mxu0 %v11578_v0  ;;  %6697 = vmatprep.subr.bf16.mxu1 %v11578_v0  ;;  %11644 = vst [vmem:[#allocation16_spill] sm:$0xff] %v9805_v21  ;;  %v148_v24 = vmul.f32 %v9805_v21, %v147_v22  ;;  %v9429_v33 = vld [vmem:[#allocation7 + $0x60] sm:$0xff]   ;;  %v9430_v34 = vld [vmem:[#allocation7 + $0x68] sm:$0xff]   ;;  %v9431_v37 = vld [vmem:[#allocation7 + $0x70] sm:$0xff]   ;;  %v418_v51 = vunpack.c.h.bf16 %v416_v42  ;;  %p9628_p8 = pnand %p9627_p7, %p9621_p4 }
  0x53   :  { %v9432_v40 = vld [vmem:[#allocation7 + $0x78] sm:$0xff]   ;;  %v9433_v43 = vld [vmem:[#allocation5 + $0x40] sm:$0xff]   ;;  %v9434_v44 = vld [vmem:[#allocation5 + $0x48] sm:$0xff]   ;;  %v419_v53 = vsub.f32 %v9795_v14, %v417_v50 }
  0x54   :  { %v157_v28 = vpack.c.bf16 %v146_v26, %v148_v24  ;;  %v9435_v45 = vld [vmem:[#allocation5 + $0x50] sm:$0xff]   ;;  %v9436_v46 = vld [vmem:[#allocation5 + $0x58] sm:$0xff]   ;;  %v9437_v47 = vld [vmem:[#allocation5 + $0x60] sm:$0xff]   ;;  %v420_v54 = vsub.f32 %v9797_v15, %v418_v51 }
  0x55   :  { %6678 = vmatpush3.bf16.msra.mxu0 %v9413_v5  ;;  %6698 = vmatpush3.bf16.msra.mxu1 %v9784_v6  ;;  %v9438_v48 = vld [vmem:[#allocation5 + $0x68] sm:$0xff]   ;;  %v9439_v49 = vld [vmem:[#allocation5 + $0x70] sm:$0xff]   ;;  %v9440_v52 = vld [vmem:[#allocation5 + $0x78] sm:$0xff]  }
  0x56   :  { %6679 = vmatprep.subr.bf16.mxu0 %v11578_v0  ;;  %6699 = vmatprep.subr.bf16.mxu1 %v11578_v0  ;;  %v158_v35 = vunpack.c.l.bf16 %v157_v28  ;;  %v159_v36 = vunpack.c.h.bf16 %v157_v28  ;;  %v421_v55 = vpack.c.bf16 %v420_v54, %v419_v53  ;;  %v9441_v56 = vld [vmem:[#allocation7 + $0x80] sm:$0xff]   ;;  %v9443_v58 = vld [vmem:[#allocation7 + $0x88] sm:$0xff]   ;;  %v9445_v60 = vld [vmem:[#allocation7 + $0x90] sm:$0xff]  }
  0x57   :  { %v9864_v57 = vld [vmem:[#allocation5 + $0x80] sm:$0xff]   ;;  %v9444_v59 = vld [vmem:[#allocation5 + $0x88] sm:$0xff]   ;;  %v9446_v61 = vld [vmem:[#allocation5 + $0x90] sm:$0xff]  }
  0x58   :  { %v160_v38 = vsub.f32 %v148_v24, %v158_v35  ;;  %v161_v39 = vsub.f32 %v146_v26, %v159_v36  ;;  %v9447_v62 = vld [vmem:[#allocation7 + $0x98] sm:$0xff]   ;;  %v9450_v3 = vld [vmem:[#allocation5 + $0xa0] sm:$0xff]   ;;  %v9451_v5 = vld [vmem:[#allocation7 + $0xa8] sm:$0xff]  }
  0x59   :  { %6680 = vmatpush3.bf16.msra.mxu0 %v9415_v8  ;;  %6700 = vmatpush3.bf16.msra.mxu1 %v9416_v9  ;;  %v9448_v63 = vld [vmem:[#allocation5 + $0x98] sm:$0xff]   ;;  %v9452_v8 = vld [vmem:[#allocation5 + $0xa8] sm:$0xff]   ;;  %v9454_v13 = vld [vmem:[#allocation5 + $0xb0] sm:$0xff]  }
  0x5a   :  { %6681 = vmatprep.subr.bf16.mxu0 %v11578_v0  ;;  %6701 = vmatprep.subr.bf16.mxu1 %v11578_v0  ;;  %v162_v41 = vpack.c.bf16 %v161_v39, %v160_v38  ;;  %v9455_v15 = vld [vmem:[#allocation7 + $0xb8] sm:$0xff]   ;;  %v9915_v26 = vld [vmem:[#allocation8 + $0x8] sm:$0xff]  ;;  %v9963_v51 = vld [vmem:[#allocation8 + $0x30] sm:$0xff] }
  0x5b   :  { %v9456_v17 = vld [vmem:[#allocation5 + $0xb8] sm:$0xff]   ;;  %v976_v53 = vand.u32 4294901760, %v9963_v51 }
  0x5c   :  { %v9928_v35 = vld [vmem:[#allocation8 + $0x18] sm:$0xff] }
  0x5d   :  { %6682 = vmatpush3.bf16.msra.mxu0 %v9417_v11  ;;  %6702 = vmatpush3.bf16.msra.mxu1 %v9418_v12 }
  0x5e   :  { %6683 = vmatprep.subr.bf16.mxu0 %v11578_v0  ;;  %6703 = vmatprep.subr.bf16.mxu1 %v11578_v0 }
  0x61   :  { %6684 = vmatpush3.bf16.msra.mxu0 %v9419_v16  ;;  %6704 = vmatpush3.bf16.msra.mxu1 %v9420_v19 }
  0x62   :  { %6685 = vmatprep.subr.bf16.mxu0 %v11578_v0  ;;  %6705 = vmatprep.subr.bf16.mxu1 %v11578_v0 }
  0x65   :  { %6686 = vmatpush3.bf16.msra.mxu0 %v9421_v20  ;;  %6706 = vmatpush3.bf16.msra.mxu1 %v9422_v23 }
  0x66   :  { %6687 = vmatprep.subr.bf16.mxu0 %v11578_v0  ;;  %6707 = vmatprep.subr.bf16.mxu1 %v11578_v0 }
  0x69   :  { %6688 = vmatpush3.bf16.msra.mxu0 %v9423_v25  ;;  %6708 = vmatpush3.bf16.msra.mxu1 %v9424_v27  ;;  %v9913_v25 = vld [vmem:[#allocation8] sm:$0xff] }
  0x6a   :  { %6713 = vmatprep.subr.bf16.mxu0 %v11578_v0  ;;  %6733 = vmatprep.subr.bf16.mxu1 %v11578_v0 }
  0x6c   :  { %6690 = vmatmul.mubr.bf16.vlgmr.msra.gmra.mrb[0].mxu0 %v157_v28  ;;  %6710 = vmatmul.mubr.bf16.vlgmr.msra.gmra.mrb[0].mxu1 %v157_v28  ;;  %v961_v28 = vand.u32 4294901760, %v9915_v26 }
  0x6d   :  { %6714 = vmatpush3.bf16.msra.mxu0 %v9775_v2  ;;  %6734 = vmatpush3.bf16.msra.mxu1 %v9425_v29  ;;  %v9449_v2 = vld [vmem:[#allocation7 + $0xa0] sm:$0xff]  }
  0x6e   :  { %6715 = vmatprep.subr.bf16.mxu0 %v11578_v0  ;;  %6735 = vmatprep.subr.bf16.mxu1 %v11578_v0 }
  0x6f   :  { %6729 = vmatprep.mubr.msk.bf16.mxu0 %vm9659_vm0, %v11578_v0  ;;  %6749 = vmatprep.mubr.msk.bf16.mxu1 %vm9659_vm0, %v11578_v0 }
  0x71   :  { %6716 = vmatpush3.bf16.msra.mxu0 %v9779_v4  ;;  %6736 = vmatpush3.bf16.msra.mxu1 %v9426_v30  ;;  %v118_v4 = vand.u32 15, %v106_v1 }
  0x72   :  { %6717 = vmatprep.subr.bf16.mxu0 %v11578_v0  ;;  %6737 = vmatprep.subr.bf16.mxu1 %v11578_v0 }
  0x73   :  { %vm138_vm3 = vcmp.le.s32.totalorder %v118_v4, 14  ;;  %v10013_v4 = vld [vmem:[#allocation8 + $0x68] sm:$0xff] }
  0x74   :  { %v9887_v11 = vsel %vm138_vm3, 1.0, %v11578_v0 }
  0x75   :  { %6718 = vmatpush3.bf16.msra.mxu0 %v9784_v6  ;;  %6738 = vmatpush3.bf16.msra.mxu1 %v9427_v31  ;;  %v150_v6 = vrot.slane %v9795_v14, 1  ;;  %11645 = vst [vmem:[#allocation17_spill] sm:$0xff] %v9887_v11 }
  0x76   :  { %6719 = vmatprep.subr.bf16.mxu0 %v11578_v0  ;;  %6739 = vmatprep.subr.bf16.mxu1 %v11578_v0 }
  0x77   :  { %v153_v16 = vsel %vm152_vm4, %v150_v6, %v151_v7 }
  0x79   :  { %6720 = vmatpush3.bf16.msra.mxu0 %v9416_v9  ;;  %6740 = vmatpush3.bf16.msra.mxu1 %v9428_v32  ;;  %v9453_v9 = vld [vmem:[#allocation7 + $0xb0] sm:$0xff]  }
  0x7a   :  { %6721 = vmatprep.subr.bf16.mxu0 %v11578_v0  ;;  %6741 = vmatprep.subr.bf16.mxu1 %v11578_v0 }
  0x7d   :  { %6722 = vmatpush3.bf16.msra.mxu0 %v9418_v12  ;;  %6742 = vmatpush3.bf16.msra.mxu1 %v9429_v33  ;;  %v154_v12 = vsel %vm152_vm4, %v151_v7, %v150_v6  ;;  %v11576_v33 = vmov 0.0|0.0   ;;  %v997_v6 = vand.u32 4294901760, %v10013_v4  ;;  %v10020_v7 = vld [vmem:[#allocation8 + $0x70] sm:$0xff] }
  0x7e   :  { %6723 = vmatprep.subr.bf16.mxu0 %v11578_v0  ;;  %6743 = vmatprep.subr.bf16.mxu1 %v11578_v0  ;;  %v156_v14 = vmul.f32 %v9887_v11, %v154_v12  ;;  %v1000_v12 = vand.u32 4294901760, %v10020_v7 }
  0x80   :  { %v679_v18 = vpack.c.bf16 %v156_v14, %v153_v16 }
  0x81   :  { %6724 = vmatpush3.bf16.msra.mxu0 %v9420_v19  ;;  %6744 = vmatpush3.bf16.msra.mxu1 %v9430_v34  ;;  %v9926_v34 = vld [vmem:[#allocation8 + $0x10] sm:$0xff] }
  0x82   :  { %6725 = vmatprep.subr.bf16.mxu0 %v11578_v0  ;;  %6745 = vmatprep.subr.bf16.mxu1 %v11578_v0  ;;  %v680_v19 = vunpack.c.l.bf16 %v679_v18  ;;  %v681_v20 = vunpack.c.h.bf16 %v679_v18  ;;  %v964_v39 = vand.u32 4294901760, %v9926_v34 }
  0x84   :  { %v682_v22 = vsub.f32 %v153_v16, %v680_v19 }
  0x85   :  { %6726 = vmatpush3.bf16.msra.mxu0 %v9422_v23  ;;  %6746 = vmatpush3.bf16.msra.mxu1 %v9431_v37  ;;  %v683_v23 = vsub.f32 %v156_v14, %v681_v20  ;;  %v10061_v20 = vsub.f32 %v9926_v34, %v964_v39 }
  0x86   :  { %6727 = vmatprep.subr.bf16.mxu0 %v11578_v0  ;;  %6747 = vmatprep.subr.bf16.mxu1 %v11578_v0 }
  0x87   :  { %v684_v24 = vpack.c.bf16 %v683_v23, %v682_v22 }
  0x89   :  { %6728 = vmatpush3.bf16.msra.mxu0 %v9424_v27  ;;  %6748 = vmatpush3.bf16.msra.mxu1 %v9432_v40  ;;  %v958_v27 = vand.u32 4294901760, %v9913_v25  ;;  %v967_v40 = vand.u32 4294901760, %v9928_v35 }
  0x8a   :  { %6753 = vmatprep.subr.bf16.mxu0 %v11578_v0  ;;  %6773 = vmatprep.subr.bf16.mxu1 %v11578_v0 }
  0x8b   :  { %v9923_v30 = vpack.c.bf16 %v961_v28, %v958_v27  ;;  %v10036_v14 = vsub.f32 %v9913_v25, %v958_v27  ;;  %v10066_v22 = vsub.f32 %v9928_v35, %v967_v40  ;;  %v11573_v25 = vand.u32 4294901760, %v10061_v20 }
  0x8c   :  { %6730 = vmatmul.mubr.bf16.vlgmr.msra.gmra.mrb[4].mxu0 %v162_v41  ;;  %6750 = vmatmul.mubr.bf16.vlgmr.msra.gmra.mrb[4].mxu1 %v416_v42 }
  0x8d   :  { %6754 = vmatpush3.bf16.msra.mxu0 %v9433_v43  ;;  %6774 = vmatpush3.bf16.msra.mxu1 %v9433_v43 }
  0x8e   :  { %6755 = vmatprep.subr.bf16.mxu0 %v11578_v0  ;;  %6775 = vmatprep.subr.bf16.mxu1 %v11578_v0 }
  0x8f   :  { %6769 = vmatprep.mubr.msk.bf16.mxu0 %vm9659_vm0, %v11578_v0  ;;  %6789 = vmatprep.mubr.msk.bf16.mxu1 %vm9659_vm0, %v11578_v0 }
  0x91   :  { %6756 = vmatpush3.bf16.msra.mxu0 %v9434_v44  ;;  %6776 = vmatpush3.bf16.msra.mxu1 %v9434_v44 }
  0x92   :  { %6757 = vmatprep.subr.bf16.mxu0 %v11578_v0  ;;  %6777 = vmatprep.subr.bf16.mxu1 %v11578_v0 }
  0x95   :  { %6758 = vmatpush3.bf16.msra.mxu0 %v9435_v45  ;;  %6778 = vmatpush3.bf16.msra.mxu1 %v9435_v45  ;;  %v9945_v45 = vpack.c.bf16 %v967_v40, %v964_v39 }
  0x96   :  { %6759 = vmatprep.subr.bf16.mxu0 %v11578_v0  ;;  %6779 = vmatprep.subr.bf16.mxu1 %v11578_v0 }
  0x99   :  { %6760 = vmatpush3.bf16.msra.mxu0 %v9436_v46  ;;  %6780 = vmatpush3.bf16.msra.mxu1 %v9436_v46  ;;  %v9947_v46 = vld [vmem:[#allocation8 + $0x20] sm:$0xff] }
  0x9a   :  { %6761 = vmatprep.subr.bf16.mxu0 %v11578_v0  ;;  %6781 = vmatprep.subr.bf16.mxu1 %v11578_v0 }
  0x9d   :  { %6762 = vmatpush3.bf16.msra.mxu0 %v9437_v47  ;;  %6782 = vmatpush3.bf16.msra.mxu1 %v9437_v47  ;;  %v9949_v47 = vld [vmem:[#allocation8 + $0x28] sm:$0xff] }
  0x9e   :  { %6763 = vmatprep.subr.bf16.mxu0 %v11578_v0  ;;  %6783 = vmatprep.subr.bf16.mxu1 %v11578_v0 }
  0xa1   :  { %6764 = vmatpush3.bf16.msra.mxu0 %v9438_v48  ;;  %6784 = vmatpush3.bf16.msra.mxu1 %v9438_v48  ;;  %v970_v48 = vand.u32 4294901760, %v9947_v46 }
  0xa2   :  { %6765 = vmatprep.subr.bf16.mxu0 %v11578_v0  ;;  %6785 = vmatprep.subr.bf16.mxu1 %v11578_v0 }
  0xa5   :  { %6766 = vmatpush3.bf16.msra.mxu0 %v9439_v49  ;;  %6786 = vmatpush3.bf16.msra.mxu1 %v9439_v49  ;;  %v973_v49 = vand.u32 4294901760, %v9949_v47 }
  0xa6   :  { %6767 = vmatprep.subr.bf16.mxu0 %v11578_v0  ;;  %6787 = vmatprep.subr.bf16.mxu1 %v11578_v0 }
  0xa7   :  { %v9961_v50 = vpack.c.bf16 %v973_v49, %v970_v48  ;;  %v10091_v34 = vsub.f32 %v9949_v47, %v973_v49 }
  0xa9   :  { %6768 = vmatpush3.bf16.msra.mxu0 %v9440_v52  ;;  %6788 = vmatpush3.bf16.msra.mxu1 %v9440_v52  ;;  %v9965_v52 = vld [vmem:[#allocation8 + $0x38] sm:$0xff] }
  0xaa   :  { %6793 = vmatprep.subr.bf16.mxu0 %v11578_v0  ;;  %6813 = vmatprep.subr.bf16.mxu1 %v11578_v0  ;;  %v979_v54 = vand.u32 4294901760, %v9965_v52 }
  0xac   :  { %6770 = vmatmul.mubr.bf16.vlgmr.msra.gmra.mrb[8].mxu0 %v416_v42  ;;  %6790 = vmatmul.mubr.bf16.vlgmr.msra.gmra.mrb[8].mxu1 %v421_v55  ;;  %v9977_v55 = vpack.c.bf16 %v979_v54, %v976_v53 }
  0xad   :  { %6794 = vmatpush3.bf16.msra.mxu0 %v9441_v56  ;;  %6814 = vmatpush3.bf16.msra.mxu1 %v9864_v57  ;;  %v9979_v56 = vld [vmem:[#allocation8 + $0x40] sm:$0xff] }
  0xae   :  { %6795 = vmatprep.subr.bf16.mxu0 %v11578_v0  ;;  %6815 = vmatprep.subr.bf16.mxu1 %v11578_v0 }
  0xaf   :  { %6809 = vmatprep.mubr.msk.bf16.mxu0 %vm9659_vm0, %v11578_v0  ;;  %6829 = vmatprep.mubr.msk.bf16.mxu1 %vm9659_vm0, %v11578_v0 }
  0xb1   :  { %6796 = vmatpush3.bf16.msra.mxu0 %v9443_v58  ;;  %6816 = vmatpush3.bf16.msra.mxu1 %v9444_v59  ;;  %v982_v58 = vand.u32 4294901760, %v9979_v56 }
  0xb2   :  { %6797 = vmatprep.subr.bf16.mxu0 %v11578_v0  ;;  %6817 = vmatprep.subr.bf16.mxu1 %v11578_v0 }
  0xb5   :  { %6798 = vmatpush3.bf16.msra.mxu0 %v9445_v60  ;;  %6818 = vmatpush3.bf16.msra.mxu1 %v9446_v61 }
  0xb6   :  { %6799 = vmatprep.subr.bf16.mxu0 %v11578_v0  ;;  %6819 = vmatprep.subr.bf16.mxu1 %v11578_v0 }
  0xb9   :  { %6800 = vmatpush3.bf16.msra.mxu0 %v9447_v62  ;;  %6820 = vmatpush3.bf16.msra.mxu1 %v9448_v63  ;;  %v9997_v62 = vld [vmem:[#allocation8 + $0x58] sm:$0xff] }
  0xba   :  { %6801 = vmatprep.subr.bf16.mxu0 %v11578_v0  ;;  %6821 = vmatprep.subr.bf16.mxu1 %v11578_v0  ;;  %v991_v1 = vand.u32 4294901760, %v9997_v62 }
  0xbd   :  { %6802 = vmatpush3.bf16.msra.mxu0 %v9449_v2  ;;  %6822 = vmatpush3.bf16.msra.mxu1 %v9450_v3 }
  0xbe   :  { %6803 = vmatprep.subr.bf16.mxu0 %v11578_v0  ;;  %6823 = vmatprep.subr.bf16.mxu1 %v11578_v0 }
  0xc1   :  { %6804 = vmatpush3.bf16.msra.mxu0 %v9451_v5  ;;  %6824 = vmatpush3.bf16.msra.mxu1 %v9452_v8 }
  0xc2   :  { %6805 = vmatprep.subr.bf16.mxu0 %v11578_v0  ;;  %6825 = vmatprep.subr.bf16.mxu1 %v11578_v0 }
  0xc5   :  { %6806 = vmatpush3.bf16.msra.mxu0 %v9453_v9  ;;  %6826 = vmatpush3.bf16.msra.mxu1 %v9454_v13 }
  0xc6   :  { %6807 = vmatprep.subr.bf16.mxu0 %v11578_v0  ;;  %6827 = vmatprep.subr.bf16.mxu1 %v11578_v0 }
  0xc9   :  { %6808 = vmatpush3.bf16.msra.mxu0 %v9455_v15  ;;  %6828 = vmatpush3.bf16.msra.mxu1 %v9456_v17  ;;  %v10041_v15 = vsub.f32 %v9915_v26, %v961_v28  ;;  %v11572_v26 = vand.u32 4294901760, %v10066_v22 }
  0xca   :  { %6833 = vmatprep.subr.bf16.mxu0 %v11578_v0  ;;  %8473 = vmatprep.subr.bf16.mxu1 %v11576_v33 }
  0xcc   :  { %6810 = vmatmul.mubr.bf16.vlgmr.msra.gmra.mrb[12].mxu0 %v679_v18  ;;  %6830 = vmatmul.mubr.bf16.vlgmr.msra.gmra.mrb[12].mxu1 %v679_v18  ;;  %v11574_v18 = vand.u32 4294901760, %v10041_v15 }
  0xcd   :  { %6834 = vmatpush3.bf16.msra.mxu0 %v9864_v57  ;;  %6849 = vmatprep.mubr.msk.bf16.mxu0 %vm9659_vm0, %v11578_v0  ;;  %v9981_v57 = vld [vmem:[#allocation8 + $0x48] sm:$0xff] }
  0xce   :  { %6835 = vmatprep.subr.bf16.mxu0 %v11578_v0  ;;  %6885 = vmatprep.mubr.msk.f32.mxu1 %vm9659_vm0, %v11578_v0  ;;  %v1059_v23 = vsub.f32 %v10041_v15, %v11574_v18 }
  0xcf   :  { %8475 = vmatpush3.bf16.msra.mxu1 %v9923_v30 }
  0xd0   :  { %8476 = vmatprep.subr.bf16.mxu1 %v11576_v33  ;;  %v1060_v27 = vand.u32 4294901760, %v1059_v23 }
  0xd1   :  { %6836 = vmatpush3.bf16.msra.mxu0 %v9444_v59  ;;  %v985_v59 = vand.u32 4294901760, %v9981_v57 }
  0xd2   :  { %6837 = vmatprep.subr.bf16.mxu0 %v11578_v0 }
  0xd3   :  { %8478 = vmatpush3.bf16.msra.mxu1 %v9945_v45  ;;  %v9993_v60 = vpack.c.bf16 %v985_v59, %v982_v58 }
  0xd4   :  { %8479 = vmatprep.subr.bf16.mxu1 %v11576_v33 }
  0xd5   :  { %6838 = vmatpush3.bf16.msra.mxu0 %v9446_v61  ;;  %v9995_v61 = vld [vmem:[#allocation8 + $0x50] sm:$0xff] }
  0xd6   :  { %6839 = vmatprep.subr.bf16.mxu0 %v11578_v0 }
  0xd7   :  { %8481 = vmatpush3.bf16.msra.mxu1 %v9961_v50 }
  0xd8   :  { %8482 = vmatprep.subr.bf16.mxu1 %v11576_v33 }
  0xd9   :  { %6840 = vmatpush3.bf16.msra.mxu0 %v9448_v63  ;;  %v988_v63 = vand.u32 4294901760, %v9995_v61 }
  0xda   :  { %6841 = vmatprep.subr.bf16.mxu0 %v11578_v0 }
  0xdb   :  { %8484 = vmatpush3.bf16.msra.mxu1 %v9977_v55  ;;  %v10009_v2 = vpack.c.bf16 %v991_v1, %v988_v63 }
  0xdc   :  { %8485 = vmatprep.subr.bf16.mxu1 %v11576_v33 }
  0xdd   :  { %6842 = vmatpush3.bf16.msra.mxu0 %v9450_v3  ;;  %v10011_v3 = vld [vmem:[#allocation8 + $0x60] sm:$0xff] }
  0xde   :  { %6843 = vmatprep.subr.bf16.mxu0 %v11578_v0  ;;  %v994_v5 = vand.u32 4294901760, %v10011_v3 }
  0xdf   :  { %8487 = vmatpush3.bf16.msra.mxu1 %v9993_v60 }
  0xe0   :  { %8488 = vmatprep.subr.bf16.mxu1 %v11576_v33  ;;  %v10029_v9 = vpack.c.bf16 %v997_v6, %v994_v5 }
  0xe1   :  { %6844 = vmatpush3.bf16.msra.mxu0 %v9452_v8  ;;  %v10022_v8 = vld [vmem:[#allocation8 + $0x78] sm:$0xff] }
  0xe2   :  { %6845 = vmatprep.subr.bf16.mxu0 %v11578_v0 }
  0xe3   :  { %8490 = vmatpush3.bf16.msra.mxu1 %v10009_v2 }
  0xe4   :  { %8491 = vmatprep.subr.bf16.mxu1 %v11576_v33 }
  0xe5   :  { %6846 = vmatpush3.bf16.msra.mxu0 %v9454_v13  ;;  %v1003_v13 = vand.u32 4294901760, %v10022_v8 }
  0xe6   :  { %6847 = vmatprep.subr.bf16.mxu0 %v11578_v0 }
  0xe7   :  { %8493 = vmatpush3.bf16.msra.mxu1 %v10029_v9  ;;  %v10048_v16 = vpack.c.bf16 %v1003_v13, %v1000_v12 }
  0xe8   :  { %8494 = vmatprep.subr.bf16.mxu1 %v11576_v33 }
  0xe9   :  { %6848 = vmatpush3.bf16.msra.mxu0 %v9456_v17  ;;  %v11575_v17 = vand.u32 4294901760, %v10036_v14 }
  0xea   :  { %8617 = vmatprep.subr.bf16.mxu0 %v11576_v33 }
  0xeb   :  { %v1052_v19 = vsub.f32 %v10036_v14, %v11575_v17  ;;  %8496 = vmatpush3.bf16.msra.mxu1 %v10048_v16 }
  0xec   :  { %6850 = vmatmul.mubr.bf16.vlgmr.msra.gmra.mrb[16].mxu0 %v684_v24  ;;  %8497 = vmatprep.subr.bf16.mxu1 %v11576_v33 }
  0xed   :  { %7095 = vmatprep.mubr.msk.f32.mxu0 %vm9659_vm0, %v11578_v0  ;;  %8619 = vmatpush3.bf16.msra.mxu0 %v9923_v30  ;;  %v1053_v24 = vand.u32 4294901760, %v1052_v19 }
  0xee   :  { %8620 = vmatprep.subr.bf16.mxu0 %v11576_v33 }
  0xef   :  { %v10098_v39 = vpack.c.bf16 %v1060_v27, %v1053_v24 }
  0xf1   :  { %8622 = vmatpush3.bf16.msra.mxu0 %v9945_v45 }
  0xf2   :  { %8623 = vmatprep.subr.bf16.mxu0 %v11576_v33 }
  0xf5   :  { %8625 = vmatpush3.bf16.msra.mxu0 %v9961_v50 }
  0xf6   :  { %8626 = vmatprep.subr.bf16.mxu0 %v11576_v33 }
  0xf9   :  { %8628 = vmatpush3.bf16.msra.mxu0 %v9977_v55 }
  0xfa   :  { %8629 = vmatprep.subr.bf16.mxu0 %v11576_v33 }
  0xfd   :  { %8631 = vmatpush3.bf16.msra.mxu0 %v9993_v60 }
  0xfe   :  { %8632 = vmatprep.subr.bf16.mxu0 %v11576_v33 }
 0x101   :  { %8634 = vmatpush3.bf16.msra.mxu0 %v10009_v2 }
 0x102   :  { %8635 = vmatprep.subr.bf16.mxu0 %v11576_v33 }
 0x105   :  { %8637 = vmatpush3.bf16.msra.mxu0 %v10029_v9 }
 0x106   :  { %8638 = vmatprep.subr.bf16.mxu0 %v11576_v33 }
 0x109   :  { %8640 = vmatpush3.bf16.msra.mxu0 %v10048_v16 }
 0x10a   :  { %8641 = vmatprep.subr.bf16.mxu0 %v11576_v33  ;;  %v5816_v33 = vld [vmem:[%s11556_s4] ss:$0 sm:$0xff] }
 0x13f   :  { %v277_v29 = vpop.f32.mrb[0].mxu0  ;;  %v366_v31 = vpop.f32.mrb[0].mxu1 }
 0x140   :  { %v6691_v32 = vpop.f32.mrb[1].mxu0  ;;  %v9931_v36 = vadd.f32 %v366_v31, %v277_v29  ;;  %v6711_v37 = vpop.f32.mrb[1].mxu1  ;;  %v1066_v29 = vsub.f32 %v10061_v20, %v11573_v25  ;;  %v1073_v31 = vsub.f32 %v10066_v22, %v11572_v26 }
 0x141   :  { %v280_v38 = vpop.f32.mrb[2].mxu0  ;;  %v369_v41 = vpop.f32.mrb[2].mxu1  ;;  %v10086_v32 = vsub.f32 %v9947_v46, %v970_v48  ;;  %v11570_v48 = vand.u32 4294901760, %v10091_v34 }
 0x142   :  { %v6692_v42 = vpop.f32.mrb[3].mxu0  ;;  %v9939_v43 = vadd.f32 %v369_v41, %v280_v38  ;;  %v6712_v44 = vpop.f32.mrb[3].mxu1 }
 0x143   :  { %v1067_v42 = vand.u32 4294901760, %v1066_v29  ;;  %v1074_v44 = vand.u32 4294901760, %v1073_v31  ;;  %v11571_v46 = vand.u32 4294901760, %v10086_v32  ;;  %v1087_v27 = vsub.f32 %v10091_v34, %v11570_v48 }
 0x145   :  { %v10105_v23 = vpack.c.bf16 %v1074_v44, %v1067_v42  ;;  %v1080_v24 = vsub.f32 %v10086_v32, %v11571_v46  ;;  %v1088_v31 = vand.u32 4294901760, %v1087_v27 }
 0x147   :  { %v1081_v29 = vand.u32 4294901760, %v1080_v24 }
 0x15f   :  { %v407_v28 = vpop.f32.mrb[4].mxu0  ;;  %v10096_v38 = vpop.f32.mrb[4].mxu1 }
 0x160   :  { %v10094_v35 = vadd.f32 %v407_v28, %v9931_v36  ;;  %v6731_v37 = vpop.f32.mrb[5].mxu0  ;;  %v6751_v41 = vpop.f32.mrb[5].mxu1  ;;  %v10116_v28 = vsub.f32 %v9963_v51, %v976_v53  ;;  %v10133_v51 = vsub.f32 %v9979_v56, %v982_v58 }
 0x161   :  { %v410_v40 = vpop.f32.mrb[6].mxu0  ;;  %v541_v49 = vpop.f32.mrb[6].mxu1  ;;  %v10125_v41 = vpack.c.bf16 %v1088_v31, %v1081_v29 }
 0x162   :  { %v10103_v19 = vadd.f32 %v410_v40, %v9939_v43  ;;  %v6732_v47 = vpop.f32.mrb[7].mxu0  ;;  %v6752_v36 = vpop.f32.mrb[7].mxu1  ;;  %v10121_v43 = vsub.f32 %v9965_v52, %v979_v54  ;;  %v11569_v37 = vand.u32 4294901760, %v10116_v28  ;;  %v10138_v52 = vsub.f32 %v9981_v57, %v985_v59 }
 0x163   :  { %v11566_v44 = vand.u32 4294901760, %v10133_v51  ;;  %v10154_v57 = vsub.f32 %v9995_v61, %v988_v63  ;;  %v10159_v59 = vsub.f32 %v9997_v62, %v991_v1  ;;  %v10176_v62 = vsub.f32 %v10011_v3, %v994_v5 }
 0x164   :  { %v11567_v40 = vand.u32 4294901760, %v10121_v43  ;;  %v1094_v42 = vsub.f32 %v10116_v28, %v11569_v37  ;;  %v11565_v47 = vand.u32 4294901760, %v10138_v52  ;;  %v10181_v1 = vsub.f32 %v10013_v4, %v997_v6 }
 0x165   :  { %v1108_v56 = vsub.f32 %v10133_v51, %v11566_v44  ;;  %v11563_v31 = vand.u32 4294901760, %v10154_v57  ;;  %v10193_v3 = vsub.f32 %v10020_v7, %v1000_v12  ;;  %v10198_v4 = vsub.f32 %v10022_v8, %v1003_v13 }
 0x166   :  { %v1101_v53 = vsub.f32 %v10121_v43, %v11567_v40  ;;  %v1095_v54 = vand.u32 4294901760, %v1094_v42  ;;  %v1115_v58 = vsub.f32 %v10138_v52, %v11565_v47  ;;  %v11562_v42 = vand.u32 4294901760, %v10159_v59 }
 0x167   :  { %v1109_v27 = vand.u32 4294901760, %v1108_v56  ;;  %v1122_v61 = vsub.f32 %v10154_v57, %v11563_v31  ;;  %v11560_v56 = vand.u32 4294901760, %v10176_v62 }
 0x168   :  { %v1102_v36 = vand.u32 4294901760, %v1101_v53  ;;  %v1116_v29 = vand.u32 4294901760, %v1115_v58  ;;  %v1129_v63 = vsub.f32 %v10159_v59, %v11562_v42  ;;  %v11561_v58 = vand.u32 4294901760, %v10181_v1 }
 0x16a   :  { %v10161_v24 = vpack.c.bf16 %v1102_v36, %v1095_v54  ;;  %v10165_v53 = vpack.c.bf16 %v1116_v29, %v1109_v27  ;;  %v1123_v54 = vand.u32 4294901760, %v1122_v61  ;;  %v1130_v36 = vand.u32 4294901760, %v1129_v63 }
 0x16b   :  { %v1136_v29 = vsub.f32 %v10176_v62, %v11560_v56  ;;  %v1143_v5 = vsub.f32 %v10181_v1, %v11561_v58  ;;  %v11564_v61 = vand.u32 4294901760, %v10193_v3  ;;  %v11568_v63 = vand.u32 4294901760, %v10198_v4 }
 0x16c   :  { %v10185_v27 = vpack.c.bf16 %v1130_v36, %v1123_v54  ;;  %v10217_v58 = vpack.c.bf16 %v10041_v15, %v10036_v14 }
 0x16d   :  { %v1137_v6 = vand.u32 4294901760, %v1136_v29  ;;  %v1144_v54 = vand.u32 4294901760, %v1143_v5  ;;  %v1150_v7 = vsub.f32 %v10193_v3, %v11564_v61  ;;  %v1157_v12 = vsub.f32 %v10198_v4, %v11568_v63 }
 0x16f   :  { %v10211_v8 = vpack.c.bf16 %v1144_v54, %v1137_v6  ;;  %v1151_v13 = vand.u32 4294901760, %v1150_v7  ;;  %v1158_v36 = vand.u32 4294901760, %v1157_v12  ;;  %v10222_v54 = vpack.c.bf16 %v10066_v22, %v10061_v20 }
 0x171   :  { %v10213_v56 = vpack.c.bf16 %v1158_v36, %v1151_v13 }
 0x17f   :  { %v627_v29 = vpop.f32.mrb[8].mxu0  ;;  %v668_v31 = vpop.f32.mrb[8].mxu1 }
 0x180   :  { %v628_v5 = vadd.f32 %v627_v29, %v10096_v38  ;;  %v6771_v42 = vpop.f32.mrb[9].mxu0  ;;  %v6791_v47 = vpop.f32.mrb[9].mxu1  ;;  %v10228_v38 = vpack.c.bf16 %v10091_v34, %v10086_v32 }
 0x181   :  { %v630_v61 = vpop.f32.mrb[10].mxu0  ;;  %v671_v6 = vpop.f32.mrb[10].mxu1  ;;  %v10236_v47 = vpack.c.bf16 %v10138_v52, %v10133_v51 }
 0x182   :  { %v631_v44 = vadd.f32 %v630_v61, %v541_v49  ;;  %v675_v40 = vadd.f32 %v668_v31, %v628_v5  ;;  %v6772_v63 = vpop.f32.mrb[11].mxu0  ;;  %v6792_v7 = vpop.f32.mrb[11].mxu1  ;;  %v10232_v49 = vpack.c.bf16 %v10121_v43, %v10116_v28  ;;  %v10240_v31 = vpack.c.bf16 %v10159_v59, %v10154_v57 }
 0x184   :  { %v677_v12 = vadd.f32 %v675_v40, %v10094_v35  ;;  %v676_v13 = vadd.f32 %v671_v6, %v631_v44  ;;  %v10244_v35 = vpack.c.bf16 %v10181_v1, %v10176_v62 }
 0x186   :  { %v678_v36 = vadd.f32 %v676_v13, %v10103_v19  ;;  %v10248_v19 = vpack.c.bf16 %v10198_v4, %v10193_v3 }
 0x19f   :  { %v801_v40 = vpop.f32.mrb[12].mxu0  ;;  %v890_v44 = vpop.f32.mrb[12].mxu1 }
 0x1a0   :  { %v6811_v42 = vpop.f32.mrb[13].mxu0  ;;  %v891_v61 = vadd.f32 %v890_v44, %v801_v40  ;;  %v6831_v63 = vpop.f32.mrb[13].mxu1 }
 0x1a1   :  { %v804_v29 = vpop.f32.mrb[14].mxu0  ;;  %v893_v5 = vpop.f32.mrb[14].mxu1 }
 0x1a2   :  { %v6812_v6 = vpop.f32.mrb[15].mxu0  ;;  %v894_v7 = vadd.f32 %v893_v5, %v804_v29  ;;  %v6832_v13 = vpop.f32.mrb[15].mxu1 }
 0x1a3   :  { %v11651_v13 = vand.u32 4294901760, %v10066_v22  ;;  %v11655_v22 = vand.u32 4294901760, %v10121_v43  ;;  %v11659_v43 = vand.u32 4294901760, %v10159_v59  ;;  %v11663_v59 = vand.u32 4294901760, %v10198_v4  ;;  %v10417_v4 = vld [vmem:[#allocation7 + $0x18] sm:$0xff]  }
 0x1a4   :  { %11667 = vst [vmem:[#allocation21_spill] sm:$0xff] %v10417_v4 }
 0x1bf   :  { %v931_v37 = vpop.f32.mrb[16].mxu0 }
 0x1c0   :  { %v938_v48 = vadd.f32 %v931_v37, %v891_v61  ;;  %v6851_v46 = vpop.f32.mrb[17].mxu0 }
 0x1c1   :  { %v934_v26 = vpop.f32.mrb[18].mxu0 }
 0x1c2   :  { %v940_v25 = vadd.f32 %v938_v48, %v677_v12  ;;  %v939_v18 = vadd.f32 %v934_v26, %v894_v7  ;;  %v6852_v17 = vpop.f32.mrb[19].mxu0  ;;  %v11650_v7 = vand.u32 4294901760, %v10061_v20  ;;  %v11654_v20 = vand.u32 4294901760, %v10116_v28 }
 0x1c3   :  { %v11658_v28 = vand.u32 4294901760, %v10154_v57  ;;  %v11662_v57 = vand.u32 4294901760, %v10193_v3  ;;  %v10413_v3 = vld [vmem:[#allocation7 + $0x10] sm:$0xff]  }
 0x1c4   :  { %v941_v0 = vadd.f32 %v939_v18, %v678_v36  ;;  %v10253_v42 = vadd.f32 %v5816_v33, %v940_v25  ;;  %v11648_v25 = vand.u32 4294901760, %v10036_v14  ;;  %v11649_v36 = vand.u32 4294901760, %v10041_v15  ;;  %11666 = vst [vmem:[#allocation20_spill] sm:$0xff] %v10413_v3 }
 0x1c5   :  { %v11652_v14 = vand.u32 4294901760, %v10086_v32  ;;  %v11653_v15 = vand.u32 4294901760, %v10091_v34  ;;  %v11656_v32 = vand.u32 4294901760, %v10133_v51  ;;  %v11657_v34 = vand.u32 4294901760, %v10138_v52 }
 0x1c6   :  { %v10255_v40 = vadd.f32 %v5816_v33, %v941_v0  ;;  %v11646_v0 = vmov 0.0   ;;  %v11647_v33 = vmov 0.0|0.0   ;;  %v10320_v6 = vpack.c.bf16 %v11649_v36, %v11648_v25 }
 0x1c7   :  { %v11660_v51 = vand.u32 4294901760, %v10176_v62  ;;  %v11661_v52 = vand.u32 4294901760, %v10181_v1  ;;  %v10403_v62 = vld [vmem:[#allocation7] sm:$0xff]   ;;  %v10409_v1 = vld [vmem:[#allocation7 + $0x8] sm:$0xff]  }
 0x1c8   :  { %v950_v44 = vadd.f32 %v10255_v40, %v10253_v42  ;;  %11664 = vst [vmem:[#allocation18_spill] sm:$0xff] %v10403_v62  ;;  %11665 = vst [vmem:[#allocation19_spill] sm:$0xff] %v10409_v1 }
 0x1ca   :  { %v951_v63 = vrot.slane %v950_v44, 4 }
 0x1cc   :  { %v952_v29 = vadd.f32 %v951_v63, %v950_v44  ;;  %v10328_v44 = vpack.c.bf16 %v11651_v13, %v11650_v7  ;;  %v10338_v63 = vpack.c.bf16 %v11653_v15, %v11652_v14 }
 0x1ce   :  { %v953_v37 = vrot.slane %v952_v29, 2 }
 0x1d0   :  { %v954_v46 = vadd.f32 %v953_v37, %v952_v29  ;;  %v10346_v29 = vpack.c.bf16 %v11655_v22, %v11654_v20  ;;  %v10354_v37 = vpack.c.bf16 %v11657_v34, %v11656_v32 }
 0x1d2   :  { %v955_v61 = vrot.slane %v954_v46, 1 }
 0x1d4   :  { %v956_v48 = vadd.f32 %v955_v61, %v954_v46  ;;  %v10362_v46 = vpack.c.bf16 %v11659_v43, %v11658_v28  ;;  %v10370_v61 = vpack.c.bf16 %v11661_v52, %v11660_v51 }
 0x1d6   :  { %v10259_v26 = vand.u32 4294901760, %v956_v48 }
 0x1d8   :  { %v1039_v17 = vsub.f32 %v956_v48, %v10259_v26  ;;  %v10378_v48 = vpack.c.bf16 %v11663_v59, %v11662_v57 }
 0x1da   :  { %v1040_v12 = vand.u32 4294901760, %v1039_v17 }
 0x1dc   :  { %v1041_v5 = vsub.f32 %v1039_v17, %v1040_v12 }
 0x1de   :  { %v1042_v18 = vand.u32 4294901760, %v1041_v5  ;;  %v10433_v5 = vld [vmem:[#allocation7 + $0x38] sm:$0xff]  }
 0x1df   :  { %11671 = vst [vmem:[#allocation25_spill] sm:$0xff] %v10433_v5 }
 0x1e0   :  { %6886 = vmatmul.mubr.f32.vlgmr.msra.gmra.mrb[16].mxu1 %v1042_v18  ;;  %v10438_v18 = vsub.s32 0, %v9789_v10 }
 0x1e1   :  { %8499 = vmatpush3.bf16.msra.mxu1 %v10098_v39  ;;  %6920 = vmatprep.mubr.msk.f32.mxu1 %vm9659_vm0, %v11646_v0 }
 0x1e2   :  { %8500 = vmatprep.subr.bf16.mxu1 %v11647_v33  ;;  %11672 = vst [vmem:[#allocation26_spill] sm:$0xff] %v10438_v18 }
 0x1e5   :  { %8502 = vmatpush3.bf16.msra.mxu1 %v10105_v23 }
 0x1e6   :  { %8503 = vmatprep.subr.bf16.mxu1 %v11647_v33 }
 0x1e9   :  { %8505 = vmatpush3.bf16.msra.mxu1 %v10125_v41 }
 0x1ea   :  { %8506 = vmatprep.subr.bf16.mxu1 %v11647_v33 }
 0x1ed   :  { %8508 = vmatpush3.bf16.msra.mxu1 %v10161_v24 }
 0x1ee   :  { %8509 = vmatprep.subr.bf16.mxu1 %v11647_v33 }
 0x1f1   :  { %8511 = vmatpush3.bf16.msra.mxu1 %v10165_v53 }
 0x1f2   :  { %8512 = vmatprep.subr.bf16.mxu1 %v11647_v33 }
 0x1f5   :  { %8514 = vmatpush3.bf16.msra.mxu1 %v10185_v27 }
 0x1f6   :  { %8515 = vmatprep.subr.bf16.mxu1 %v11647_v33 }
 0x1f9   :  { %8517 = vmatpush3.bf16.msra.mxu1 %v10211_v8 }
 0x1fa   :  { %8518 = vmatprep.subr.bf16.mxu1 %v11647_v33 }
 0x1fd   :  { %8520 = vmatpush3.bf16.msra.mxu1 %v10213_v56 }
 0x1fe   :  { %8521 = vmatprep.subr.bf16.mxu1 %v11647_v33 }
 0x200   :  { %6921 = vmatmul.mubr.f32.vlgmr.msra.gmra.mrb[16].mxu1 %v10259_v26 }
 0x201   :  { %8523 = vmatpush3.bf16.msra.mxu1 %v10217_v58  ;;  %6955 = vmatprep.mubr.msk.f32.mxu1 %vm9659_vm0, %v11646_v0 }
 0x202   :  { %8524 = vmatprep.subr.bf16.mxu1 %v11647_v33 }
 0x205   :  { %8526 = vmatpush3.bf16.msra.mxu1 %v10222_v54 }
 0x206   :  { %8527 = vmatprep.subr.bf16.mxu1 %v11647_v33 }
 0x209   :  { %8529 = vmatpush3.bf16.msra.mxu1 %v10228_v38 }
 0x20a   :  { %8530 = vmatprep.subr.bf16.mxu1 %v11647_v33 }
 0x20d   :  { %8532 = vmatpush3.bf16.msra.mxu1 %v10232_v49 }
 0x20e   :  { %8533 = vmatprep.subr.bf16.mxu1 %v11647_v33 }
 0x211   :  { %8535 = vmatpush3.bf16.msra.mxu1 %v10236_v47 }
 0x212   :  { %8536 = vmatprep.subr.bf16.mxu1 %v11647_v33 }
 0x215   :  { %8538 = vmatpush3.bf16.msra.mxu1 %v10240_v31 }
 0x216   :  { %8539 = vmatprep.subr.bf16.mxu1 %v11647_v33 }
 0x219   :  { %8541 = vmatpush3.bf16.msra.mxu1 %v10244_v35 }
 0x21a   :  { %8542 = vmatprep.subr.bf16.mxu1 %v11647_v33 }
 0x21d   :  { %8544 = vmatpush3.bf16.msra.mxu1 %v10248_v19 }
 0x21e   :  { %8545 = vmatprep.subr.bf16.mxu1 %v11647_v33 }
 0x220   :  { %6956 = vmatmul.mubr.f32.vlgmr.msra.gmra.mrb[16].mxu1 %v1039_v17  ;;  %v10425_v17 = vld [vmem:[#allocation7 + $0x28] sm:$0xff]  }
 0x221   :  { %8547 = vmatpush3.bf16.msra.mxu1 %v9923_v30  ;;  %6990 = vmatprep.mubr.msk.f32.mxu1 %vm9659_vm0, %v11646_v0  ;;  %11669 = vst [vmem:[#allocation23_spill] sm:$0xff] %v10425_v17 }
 0x222   :  { %8548 = vmatprep.subr.bf16.mxu1 %v11647_v33 }
 0x225   :  { %8550 = vmatpush3.bf16.msra.mxu1 %v9945_v45 }
 0x226   :  { %8551 = vmatprep.subr.bf16.mxu1 %v11647_v33 }
 0x229   :  { %8553 = vmatpush3.bf16.msra.mxu1 %v9961_v50 }
 0x22a   :  { %8554 = vmatprep.subr.bf16.mxu1 %v11647_v33 }
 0x22d   :  { %8556 = vmatpush3.bf16.msra.mxu1 %v9977_v55 }
 0x22e   :  { %8557 = vmatprep.subr.bf16.mxu1 %v11647_v33 }
 0x231   :  { %8559 = vmatpush3.bf16.msra.mxu1 %v9993_v60 }
 0x232   :  { %8560 = vmatprep.subr.bf16.mxu1 %v11647_v33 }
 0x235   :  { %8562 = vmatpush3.bf16.msra.mxu1 %v10009_v2 }
 0x236   :  { %8563 = vmatprep.subr.bf16.mxu1 %v11647_v33 }
 0x239   :  { %8565 = vmatpush3.bf16.msra.mxu1 %v10029_v9 }
 0x23a   :  { %8566 = vmatprep.subr.bf16.mxu1 %v11647_v33 }
 0x23d   :  { %8568 = vmatpush3.bf16.msra.mxu1 %v10048_v16 }
 0x23e   :  { %8569 = vmatprep.subr.bf16.mxu1 %v11647_v33 }
 0x240   :  { %6991 = vmatmul.mubr.f32.vlgmr.msra.gmra.mrb[16].mxu1 %v1040_v12  ;;  %v10429_v12 = vld [vmem:[#allocation7 + $0x30] sm:$0xff]  }
 0x241   :  { %8571 = vmatpush3.bf16.msra.mxu1 %v10320_v6  ;;  %7025 = vmatprep.mubr.msk.f32.mxu1 %vm9659_vm0, %v11646_v0  ;;  %11670 = vst [vmem:[#allocation24_spill] sm:$0xff] %v10429_v12 }
 0x242   :  { %8572 = vmatprep.subr.bf16.mxu1 %v11647_v33 }
 0x245   :  { %8574 = vmatpush3.bf16.msra.mxu1 %v10328_v44 }
 0x246   :  { %8575 = vmatprep.subr.bf16.mxu1 %v11647_v33 }
 0x249   :  { %8577 = vmatpush3.bf16.msra.mxu1 %v10338_v63 }
 0x24a   :  { %8578 = vmatprep.subr.bf16.mxu1 %v11647_v33 }
 0x24d   :  { %8580 = vmatpush3.bf16.msra.mxu1 %v10346_v29 }
 0x24e   :  { %8581 = vmatprep.subr.bf16.mxu1 %v11647_v33 }
 0x251   :  { %8583 = vmatpush3.bf16.msra.mxu1 %v10354_v37 }
 0x252   :  { %8584 = vmatprep.subr.bf16.mxu1 %v11647_v33 }
 0x255   :  { %8586 = vmatpush3.bf16.msra.mxu1 %v10362_v46 }
 0x256   :  { %8587 = vmatprep.subr.bf16.mxu1 %v11647_v33 }
 0x259   :  { %8589 = vmatpush3.bf16.msra.mxu1 %v10370_v61 }
 0x25a   :  { %8590 = vmatprep.subr.bf16.mxu1 %v11647_v33 }
 0x25d   :  { %8592 = vmatpush3.bf16.msra.mxu1 %v10378_v48 }
 0x25e   :  { %8593 = vmatprep.subr.bf16.mxu1 %v11647_v33 }
 0x260   :  { %7026 = vmatmul.mubr.f32.vlgmr.msra.gmra.mrb[16].mxu1 %v10259_v26 }
 0x261   :  { %8595 = vmatpush3.bf16.msra.mxu1 %v9923_v30  ;;  %7060 = vmatprep.mubr.msk.f32.mxu1 %vm9659_vm0, %v11646_v0 }
 0x262   :  { %8596 = vmatprep.subr.bf16.mxu1 %v11647_v33 }
 0x265   :  { %8598 = vmatpush3.bf16.msra.mxu1 %v9945_v45 }
 0x266   :  { %8599 = vmatprep.subr.bf16.mxu1 %v11647_v33 }
 0x269   :  { %8601 = vmatpush3.bf16.msra.mxu1 %v9961_v50 }
 0x26a   :  { %8602 = vmatprep.subr.bf16.mxu1 %v11647_v33 }
 0x26d   :  { %8604 = vmatpush3.bf16.msra.mxu1 %v9977_v55 }
 0x26e   :  { %8605 = vmatprep.subr.bf16.mxu1 %v11647_v33 }
 0x271   :  { %8607 = vmatpush3.bf16.msra.mxu1 %v9993_v60 }
 0x272   :  { %8608 = vmatprep.subr.bf16.mxu1 %v11647_v33 }
 0x275   :  { %8610 = vmatpush3.bf16.msra.mxu1 %v10009_v2 }
 0x276   :  { %8611 = vmatprep.subr.bf16.mxu1 %v11647_v33 }
 0x279   :  { %8613 = vmatpush3.bf16.msra.mxu1 %v10029_v9 }
 0x27a   :  { %8614 = vmatprep.subr.bf16.mxu1 %v11647_v33 }
 0x27d   :  { %8616 = vmatpush3.bf16.msra.mxu1 %v10048_v16 }
 0x27e   :  { %7273 = vmatprep.subr.bf16.mxu1 %v11646_v0 }
 0x280   :  { %7061 = vmatmul.mubr.f32.vlgmr.msra.gmra.mrb[16].mxu1 %v10259_v26  ;;  %v10421_v26 = vld [vmem:[#allocation7 + $0x20] sm:$0xff]  }
 0x281   :  { %7274 = vmatpush3.bf16.msra.mxu1 %v10403_v62  ;;  %7289 = vmatprep.mubr.msk.bf16.mxu1 %vm9659_vm0, %v11646_v0  ;;  %11668 = vst [vmem:[#allocation22_spill] sm:$0xff] %v10421_v26 }
 0x282   :  { %7275 = vmatprep.subr.bf16.mxu1 %v11646_v0 }
 0x285   :  { %7276 = vmatpush3.bf16.msra.mxu1 %v10409_v1 }
 0x286   :  { %7277 = vmatprep.subr.bf16.mxu1 %v11646_v0 }
 0x289   :  { %7278 = vmatpush3.bf16.msra.mxu1 %v10413_v3 }
 0x28a   :  { %7279 = vmatprep.subr.bf16.mxu1 %v11646_v0 }
 0x28d   :  { %7280 = vmatpush3.bf16.msra.mxu1 %v10417_v4 }
 0x28e   :  { %7281 = vmatprep.subr.bf16.mxu1 %v11646_v0 }
 0x291   :  { %7282 = vmatpush3.bf16.msra.mxu1 %v10421_v26  ;;  %v10597_v26 = vld [vmem:[#allocation2] sm:$0xff] }
 0x292   :  { %7283 = vmatprep.subr.bf16.mxu1 %v11646_v0  ;;  %11680 = vst [vmem:[#allocation34_spill] sm:$0xff] %v10597_v26 }
 0x295   :  { %7284 = vmatpush3.bf16.msra.mxu1 %v10425_v17 }
 0x296   :  { %7285 = vmatprep.subr.bf16.mxu1 %v11646_v0 }
 0x299   :  { %7286 = vmatpush3.bf16.msra.mxu1 %v10429_v12 }
 0x29a   :  { %7287 = vmatprep.subr.bf16.mxu1 %v11646_v0 }
 0x29d   :  { %7288 = vmatpush3.bf16.msra.mxu1 %v10433_v5  ;;  %v10591_v5 = vld [vmem:[%s11558_s6] ss:$0 sm:$0xff] }
 0x29e   :  { %7313 = vmatprep.subr.bf16.mxu1 %v11646_v0  ;;  %11679 = vst [vmem:[#allocation33_spill] sm:$0xff] %v10591_v5 }
 0x353   :  { %v1594_v25 = vpop.f32.mrb[16].mxu1 }
 0x354   :  { %v1598_v36 = vmul.f32 0.001953125, %v1594_v25  ;;  %v7062_v7 = vpop.f32.mrb[17].mxu1 }
 0x355   :  { %v10547_v7 = vld [vmem:[#allocation5] sm:$0xff]  }
 0x356   :  { %v1602_v13 = vrot.slane %v1598_v36, %v10438_v18 }
 0x358   :  { %v10442_v14 = vsub.f32 %v10253_v42, %v1602_v13  ;;  %v10445_v15 = vsub.f32 %v10255_v40, %v1602_v13  ;;  %v10553_v13 = vld [vmem:[#allocation5 + $0x8] sm:$0xff]  }
 0x35a   :  { %v1605_v20 = vmul.f32 %v10442_v14, %v10442_v14  ;;  %v1606_v22 = vmul.f32 %v10445_v15, %v10445_v15 }
 0x35c   :  { %v1607_v32 = vadd.f32 %v1606_v22, %v1605_v20  ;;  %v10557_v20 = vld [vmem:[#allocation5 + $0x10] sm:$0xff]   ;;  %v10561_v22 = vld [vmem:[#allocation5 + $0x18] sm:$0xff]  }
 0x35d   :  { %11673 = vst [vmem:[#allocation27_spill] sm:$0xff] %v10561_v22 }
 0x35e   :  { %v1608_v34 = vrot.slane %v1607_v32, 4 }
 0x360   :  { %v1609_v28 = vadd.f32 %v1608_v34, %v1607_v32  ;;  %v10565_v32 = vld [vmem:[#allocation5 + $0x20] sm:$0xff]   ;;  %v10569_v34 = vld [vmem:[#allocation5 + $0x28] sm:$0xff]  }
 0x361   :  { %11674 = vst [vmem:[#allocation28_spill] sm:$0xff] %v10565_v32  ;;  %11675 = vst [vmem:[#allocation29_spill] sm:$0xff] %v10569_v34 }
 0x362   :  { %v1610_v43 = vrot.slane %v1609_v28, 2 }
 0x364   :  { %v1611_v51 = vadd.f32 %v1610_v43, %v1609_v28  ;;  %v10573_v28 = vld [vmem:[#allocation5 + $0x30] sm:$0xff]   ;;  %v10577_v43 = vld [vmem:[#allocation5 + $0x38] sm:$0xff]  }
 0x365   :  { %11676 = vst [vmem:[#allocation30_spill] sm:$0xff] %v10573_v28  ;;  %11677 = vst [vmem:[#allocation31_spill] sm:$0xff] %v10577_v43 }
 0x366   :  { %v1612_v52 = vrot.slane %v1611_v51, 1 }
 0x368   :  { %v1613_v57 = vadd.f32 %v1612_v52, %v1611_v51 }
 0x36a   :  { %v10451_v59 = vand.u32 4294901760, %v1613_v57 }
 0x36c   :  { %v1696_v42 = vsub.f32 %v1613_v57, %v10451_v59 }
 0x36e   :  { %v1697_v25 = vand.u32 4294901760, %v1696_v42 }
 0x370   :  { %v1698_v40 = vsub.f32 %v1696_v42, %v1697_v25 }
 0x372   :  { %v1699_v36 = vand.u32 4294901760, %v1698_v40 }
 0x374   :  { %7096 = vmatmul.mubr.f32.vlgmr.msra.gmra.mrb[20].mxu0 %v1699_v36 }
 0x375   :  { %8643 = vmatpush3.bf16.msra.mxu0 %v10098_v39  ;;  %7130 = vmatprep.mubr.msk.f32.mxu0 %vm9659_vm0, %v11646_v0 }
 0x376   :  { %8644 = vmatprep.subr.bf16.mxu0 %v11647_v33 }
 0x379   :  { %8646 = vmatpush3.bf16.msra.mxu0 %v10105_v23 }
 0x37a   :  { %8647 = vmatprep.subr.bf16.mxu0 %v11647_v33 }
 0x37d   :  { %8649 = vmatpush3.bf16.msra.mxu0 %v10125_v41 }
 0x37e   :  { %8650 = vmatprep.subr.bf16.mxu0 %v11647_v33 }
 0x381   :  { %8652 = vmatpush3.bf16.msra.mxu0 %v10161_v24 }
 0x382   :  { %8653 = vmatprep.subr.bf16.mxu0 %v11647_v33 }
 0x385   :  { %8655 = vmatpush3.bf16.msra.mxu0 %v10165_v53 }
 0x386   :  { %8656 = vmatprep.subr.bf16.mxu0 %v11647_v33 }
 0x389   :  { %8658 = vmatpush3.bf16.msra.mxu0 %v10185_v27 }
 0x38a   :  { %8659 = vmatprep.subr.bf16.mxu0 %v11647_v33 }
 0x38d   :  { %8661 = vmatpush3.bf16.msra.mxu0 %v10211_v8 }
 0x38e   :  { %8662 = vmatprep.subr.bf16.mxu0 %v11647_v33 }
 0x391   :  { %8664 = vmatpush3.bf16.msra.mxu0 %v10213_v56 }
 0x392   :  { %8665 = vmatprep.subr.bf16.mxu0 %v11647_v33 }
 0x394   :  { %7131 = vmatmul.mubr.f32.vlgmr.msra.gmra.mrb[20].mxu0 %v10451_v59 }
 0x395   :  { %8667 = vmatpush3.bf16.msra.mxu0 %v10217_v58  ;;  %7165 = vmatprep.mubr.msk.f32.mxu0 %vm9659_vm0, %v11646_v0 }
 0x396   :  { %8668 = vmatprep.subr.bf16.mxu0 %v11647_v33 }
 0x399   :  { %8670 = vmatpush3.bf16.msra.mxu0 %v10222_v54 }
 0x39a   :  { %8671 = vmatprep.subr.bf16.mxu0 %v11647_v33 }
 0x39d   :  { %8673 = vmatpush3.bf16.msra.mxu0 %v10228_v38 }
 0x39e   :  { %8674 = vmatprep.subr.bf16.mxu0 %v11647_v33 }
 0x3a1   :  { %8676 = vmatpush3.bf16.msra.mxu0 %v10232_v49 }
 0x3a2   :  { %8677 = vmatprep.subr.bf16.mxu0 %v11647_v33 }
 0x3a5   :  { %8679 = vmatpush3.bf16.msra.mxu0 %v10236_v47 }
 0x3a6   :  { %8680 = vmatprep.subr.bf16.mxu0 %v11647_v33 }
 0x3a9   :  { %8682 = vmatpush3.bf16.msra.mxu0 %v10240_v31 }
 0x3aa   :  { %8683 = vmatprep.subr.bf16.mxu0 %v11647_v33 }
 0x3ad   :  { %8685 = vmatpush3.bf16.msra.mxu0 %v10244_v35 }
 0x3ae   :  { %8686 = vmatprep.subr.bf16.mxu0 %v11647_v33 }
 0x3b1   :  { %8688 = vmatpush3.bf16.msra.mxu0 %v10248_v19 }
 0x3b2   :  { %8689 = vmatprep.subr.bf16.mxu0 %v11647_v33 }
 0x3b4   :  { %7166 = vmatmul.mubr.f32.vlgmr.msra.gmra.mrb[20].mxu0 %v1696_v42  ;;  %v10584_v42 = vld [vmem:[%s11557_s5] sm:$0x1] }
 0x3b5   :  { %8691 = vmatpush3.bf16.msra.mxu0 %v9923_v30  ;;  %7200 = vmatprep.mubr.msk.f32.mxu0 %vm9659_vm0, %v11646_v0  ;;  %11678 = vst [vmem:[#allocation32_spill] sm:$0xff] %v10584_v42 }
 0x3b6   :  { %8692 = vmatprep.subr.bf16.mxu0 %v11647_v33 }
 0x3b9   :  { %8694 = vmatpush3.bf16.msra.mxu0 %v9945_v45 }
 0x3ba   :  { %8695 = vmatprep.subr.bf16.mxu0 %v11647_v33 }
 0x3bd   :  { %8697 = vmatpush3.bf16.msra.mxu0 %v9961_v50 }
 0x3be   :  { %8698 = vmatprep.subr.bf16.mxu0 %v11647_v33 }
 0x3c1   :  { %8700 = vmatpush3.bf16.msra.mxu0 %v9977_v55 }
 0x3c2   :  { %8701 = vmatprep.subr.bf16.mxu0 %v11647_v33 }
 0x3c5   :  { %8703 = vmatpush3.bf16.msra.mxu0 %v9993_v60 }
 0x3c6   :  { %8704 = vmatprep.subr.bf16.mxu0 %v11647_v33 }
 0x3c9   :  { %8706 = vmatpush3.bf16.msra.mxu0 %v10009_v2 }
 0x3ca   :  { %8707 = vmatprep.subr.bf16.mxu0 %v11647_v33 }
 0x3cd   :  { %8709 = vmatpush3.bf16.msra.mxu0 %v10029_v9 }
 0x3ce   :  { %8710 = vmatprep.subr.bf16.mxu0 %v11647_v33 }
 0x3d1   :  { %8712 = vmatpush3.bf16.msra.mxu0 %v10048_v16 }
 0x3d2   :  { %8713 = vmatprep.subr.bf16.mxu0 %v11647_v33 }
 0x3d4   :  { %7201 = vmatmul.mubr.f32.vlgmr.msra.gmra.mrb[20].mxu0 %v1697_v25 }
 0x3d5   :  { %8715 = vmatpush3.bf16.msra.mxu0 %v10320_v6  ;;  %7235 = vmatprep.mubr.msk.f32.mxu0 %vm9659_vm0, %v11646_v0 }
 0x3d6   :  { %8716 = vmatprep.subr.bf16.mxu0 %v11647_v33 }
 0x3d9   :  { %8718 = vmatpush3.bf16.msra.mxu0 %v10328_v44 }
 0x3da   :  { %8719 = vmatprep.subr.bf16.mxu0 %v11647_v33 }
 0x3dd   :  { %8721 = vmatpush3.bf16.msra.mxu0 %v10338_v63 }
 0x3de   :  { %8722 = vmatprep.subr.bf16.mxu0 %v11647_v33 }
 0x3e1   :  { %8724 = vmatpush3.bf16.msra.mxu0 %v10346_v29 }
 0x3e2   :  { %8725 = vmatprep.subr.bf16.mxu0 %v11647_v33 }
 0x3e5   :  { %8727 = vmatpush3.bf16.msra.mxu0 %v10354_v37 }
 0x3e6   :  { %8728 = vmatprep.subr.bf16.mxu0 %v11647_v33 }
 0x3e9   :  { %8730 = vmatpush3.bf16.msra.mxu0 %v10362_v46 }
 0x3ea   :  { %8731 = vmatprep.subr.bf16.mxu0 %v11647_v33 }
 0x3ed   :  { %8733 = vmatpush3.bf16.msra.mxu0 %v10370_v61 }
 0x3ee   :  { %8734 = vmatprep.subr.bf16.mxu0 %v11647_v33 }
 0x3f1   :  { %8736 = vmatpush3.bf16.msra.mxu0 %v10378_v48 }
 0x3f2   :  { %8737 = vmatprep.subr.bf16.mxu0 %v11647_v33 }
 0x3f4   :  { %7236 = vmatmul.mubr.f32.vlgmr.msra.gmra.mrb[20].mxu0 %v10451_v59 }
 0x3f5   :  { %8739 = vmatpush3.bf16.msra.mxu0 %v9923_v30  ;;  %7270 = vmatprep.mubr.msk.f32.mxu0 %vm9659_vm0, %v11646_v0 }
 0x3f6   :  { %8740 = vmatprep.subr.bf16.mxu0 %v11647_v33 }
 0x3f9   :  { %8742 = vmatpush3.bf16.msra.mxu0 %v9945_v45 }
 0x3fa   :  { %8743 = vmatprep.subr.bf16.mxu0 %v11647_v33 }
 0x3fd   :  { %8745 = vmatpush3.bf16.msra.mxu0 %v9961_v50 }
 0x3fe   :  { %8746 = vmatprep.subr.bf16.mxu0 %v11647_v33 }
 0x401   :  { %8748 = vmatpush3.bf16.msra.mxu0 %v9977_v55 }
 0x402   :  { %8749 = vmatprep.subr.bf16.mxu0 %v11647_v33 }
 0x405   :  { %8751 = vmatpush3.bf16.msra.mxu0 %v9993_v60 }
 0x406   :  { %8752 = vmatprep.subr.bf16.mxu0 %v11647_v33 }
 0x409   :  { %8754 = vmatpush3.bf16.msra.mxu0 %v10009_v2 }
 0x40a   :  { %8755 = vmatprep.subr.bf16.mxu0 %v11647_v33 }
 0x40d   :  { %8757 = vmatpush3.bf16.msra.mxu0 %v10029_v9 }
 0x40e   :  { %8758 = vmatprep.subr.bf16.mxu0 %v11647_v33 }
 0x411   :  { %8760 = vmatpush3.bf16.msra.mxu0 %v10048_v16 }
 0x412   :  { %7293 = vmatprep.subr.bf16.mxu0 %v11646_v0 }
 0x414   :  { %7271 = vmatmul.mubr.f32.vlgmr.msra.gmra.mrb[20].mxu0 %v10451_v59 }
 0x415   :  { %7294 = vmatpush3.bf16.msra.mxu0 %v10547_v7  ;;  %7309 = vmatprep.mubr.msk.bf16.mxu0 %vm9659_vm0, %v11646_v0 }
 0x416   :  { %7295 = vmatprep.subr.bf16.mxu0 %v11646_v0 }
 0x419   :  { %7296 = vmatpush3.bf16.msra.mxu0 %v10553_v13 }
 0x41a   :  { %7297 = vmatprep.subr.bf16.mxu0 %v11646_v0 }
 0x41d   :  { %7298 = vmatpush3.bf16.msra.mxu0 %v10557_v20 }
 0x41e   :  { %7299 = vmatprep.subr.bf16.mxu0 %v11646_v0 }
 0x421   :  { %7300 = vmatpush3.bf16.msra.mxu0 %v10561_v22 }
 0x422   :  { %7301 = vmatprep.subr.bf16.mxu0 %v11646_v0 }
 0x425   :  { %7302 = vmatpush3.bf16.msra.mxu0 %v10565_v32 }
 0x426   :  { %7303 = vmatprep.subr.bf16.mxu0 %v11646_v0 }
 0x429   :  { %7304 = vmatpush3.bf16.msra.mxu0 %v10569_v34 }
 0x42a   :  { %7305 = vmatprep.subr.bf16.mxu0 %v11646_v0 }
 0x42d   :  { %7306 = vmatpush3.bf16.msra.mxu0 %v10573_v28 }
 0x42e   :  { %7307 = vmatprep.subr.bf16.mxu0 %v11646_v0 }
 0x431   :  { %7308 = vmatpush3.bf16.msra.mxu0 %v10577_v43 }
 0x432   :  { %7333 = vmatprep.subr.bf16.mxu0 %v11646_v0 }
 0x4e7   :  { %v2251_v51 = vpop.f32.mrb[20].mxu0 }
 0x4e8   :  { %v2255_v52 = vmul.f32 0.001953125, %v2251_v51  ;;  %v7272_v57 = vpop.f32.mrb[21].mxu0 }
 0x4ea   :  { %v2256_v59 = vadd.f32 1e-05, %v2255_v52 }
 0x4ec   :  { %9457 = vrsqrt.f32 %v2256_v59 }
 0x4f6   :  { %v9458_v25 = vpop.eup %9457 }
 0x4f7   :  { %v2258_v40 = vmul.f32 %v9458_v25, %v10584_v42 }
 0x4f9   :  { %v2263_v36 = vrot.slane %v2258_v40, %v10438_v18  ;;  %v10600_v40 = vld [vmem:[#allocation2 + $0x8] sm:$0xff] }
 0x4fa   :  { %11681 = vst [vmem:[#allocation35_spill] sm:$0xff] %v10600_v40 }
 0x4fb   :  { %v2265_v51 = vmul.f32 %v2263_v36, %v10442_v14  ;;  %v2266_v52 = vmul.f32 %v2263_v36, %v10445_v15 }
 0x4fd   :  { %v2273_v57 = vadd.f32 %v10591_v5, %v2265_v51  ;;  %v2274_v59 = vadd.f32 %v10591_v5, %v2266_v52 }
 0x4ff   :  { %v2275_v12 = vmax.f32 %v2273_v57, 0.0  ;;  %v2276_v17 = vmax.f32 %v2274_v59, 0.0 }
 0x501   :  { %v2277_v25 = vadd.f32 %v10597_v26, %v2275_v12  ;;  %v2278_v42 = vadd.f32 %v10600_v40, %v2276_v17 }
 0x503   :  { %v2279_v18 = vrot.slane %v2277_v25, 7  ;;  %v2280_v4 = vrot.slane %v2278_v42, 7  ;;  %v10603_v3 = vpack.c.bf16 %v2278_v42, %v2277_v25  ;;  %v2285_v14 = vrot.slane %v2277_v25, 1 }
 0x504   :  { %v2286_v15 = vrot.slane %v2278_v42, 1 }
 0x505   :  { %v2282_v36 = vsel %vm145_vm1, %v2280_v4, %v2279_v18  ;;  %v2423_v51 = vunpack.c.l.bf16 %v10603_v3  ;;  %v2424_v52 = vunpack.c.h.bf16 %v10603_v3  ;;  %v2281_v59 = vsel %vm145_vm1, %v2279_v18, %v2280_v4 }
 0x506   :  { %v2283_v57 = vmul.f32 %v9805_v21, %v2282_v36  ;;  %v2287_v12 = vsel %vm152_vm4, %v2285_v14, %v2286_v15  ;;  %v2288_v17 = vsel %vm152_vm4, %v2286_v15, %v2285_v14  ;;  %v10626_v14 = vld [vmem:[#allocation7 + $0x40] sm:$0xff]   ;;  %v10642_v15 = vld [vmem:[#allocation7 + $0x48] sm:$0xff]  }
 0x507   :  { %v10616_v40 = vsub.f32 %v2277_v25, %v2423_v51  ;;  %v10618_v26 = vsub.f32 %v2278_v42, %v2424_v52  ;;  %v2290_v5 = vmul.f32 %v9887_v11, %v2288_v17  ;;  %11682 = vst [vmem:[#allocation36_spill] sm:$0xff] %v10626_v14  ;;  %11683 = vst [vmem:[#allocation37_spill] sm:$0xff] %v10642_v15  ;;  %v10650_v52 = vld [vmem:[#allocation7 + $0x50] sm:$0xff]   ;;  %v10668_v17 = vld [vmem:[#allocation7 + $0x68] sm:$0xff]  }
 0x508   :  { %v2291_v1 = vpack.c.bf16 %v2281_v59, %v2283_v57  ;;  %11684 = vst [vmem:[#allocation38_spill] sm:$0xff] %v10650_v52  ;;  %11687 = vst [vmem:[#allocation41_spill] sm:$0xff] %v10668_v17  ;;  %v10674_v51 = vld [vmem:[#allocation7 + $0x70] sm:$0xff]  }
 0x509   :  { %v10623_v36 = vpack.c.bf16 %v2290_v5, %v2287_v12  ;;  %11688 = vst [vmem:[#allocation42_spill] sm:$0xff] %v10674_v51 }
 0x50a   :  { %7290 = vmatmul.mubr.bf16.vlgmr.msra.gmra.mrb[20].mxu1 %v2291_v1  ;;  %7310 = vmatmul.mubr.bf16.vlgmr.msra.gmra.mrb[24].mxu0 %v2291_v1 }
 0x50b   :  { %7314 = vmatpush3.bf16.msra.mxu1 %v10547_v7  ;;  %7334 = vmatpush3.bf16.msra.mxu0 %v10626_v14  ;;  %v2556_v4 = vunpack.c.l.bf16 %v10623_v36  ;;  %v2557_v18 = vunpack.c.h.bf16 %v10623_v36 }
 0x50c   :  { %7315 = vmatprep.subr.bf16.mxu1 %v11646_v0  ;;  %7335 = vmatprep.subr.bf16.mxu0 %v11646_v0 }
 0x50d   :  { %7329 = vmatprep.mubr.msk.bf16.mxu1 %vm9659_vm0, %v11646_v0  ;;  %7349 = vmatprep.mubr.msk.bf16.mxu0 %vm9659_vm0, %v11646_v0  ;;  %v10637_v42 = vsub.f32 %v2287_v12, %v2556_v4  ;;  %v10639_v25 = vsub.f32 %v2290_v5, %v2557_v18  ;;  %v10656_v5 = vld [vmem:[#allocation7 + $0x58] sm:$0xff]   ;;  %v10662_v12 = vld [vmem:[#allocation7 + $0x60] sm:$0xff]   ;;  %v2292_v4 = vunpack.c.l.bf16 %v2291_v1  ;;  %v2293_v18 = vunpack.c.h.bf16 %v2291_v1 }
 0x50e   :  { %11685 = vst [vmem:[#allocation39_spill] sm:$0xff] %v10656_v5  ;;  %11686 = vst [vmem:[#allocation40_spill] sm:$0xff] %v10662_v12  ;;  %v10686_v1 = vld [vmem:[#allocation5 + $0x40] sm:$0xff]  }
 0x50f   :  { %7316 = vmatpush3.bf16.msra.mxu1 %v10553_v13  ;;  %7336 = vmatpush3.bf16.msra.mxu0 %v10642_v15  ;;  %v2294_v62 = vsub.f32 %v2283_v57, %v2292_v4  ;;  %11690 = vst [vmem:[#allocation44_spill] sm:$0xff] %v10686_v1  ;;  %v10702_v57 = vld [vmem:[#allocation5 + $0x50] sm:$0xff]  }
 0x510   :  { %7317 = vmatprep.subr.bf16.mxu1 %v11646_v0  ;;  %7337 = vmatprep.subr.bf16.mxu0 %v11646_v0  ;;  %11692 = vst [vmem:[#allocation46_spill] sm:$0xff] %v10702_v57  ;;  %v10726_v4 = vld [vmem:[#allocation5 + $0x70] sm:$0xff]  }
 0x511   :  { %11696 = vst [vmem:[#allocation50_spill] sm:$0xff] %v10726_v4 }
 0x513   :  { %7318 = vmatpush3.bf16.msra.mxu1 %v10557_v20  ;;  %7338 = vmatpush3.bf16.msra.mxu0 %v10650_v52 }
 0x514   :  { %7319 = vmatprep.subr.bf16.mxu1 %v11646_v0  ;;  %7339 = vmatprep.subr.bf16.mxu0 %v11646_v0 }
 0x517   :  { %7320 = vmatpush3.bf16.msra.mxu1 %v10561_v22  ;;  %7340 = vmatpush3.bf16.msra.mxu0 %v10656_v5 }
 0x518   :  { %7321 = vmatprep.subr.bf16.mxu1 %v11646_v0  ;;  %7341 = vmatprep.subr.bf16.mxu0 %v11646_v0 }
 0x51b   :  { %7322 = vmatpush3.bf16.msra.mxu1 %v10565_v32  ;;  %7342 = vmatpush3.bf16.msra.mxu0 %v10662_v12  ;;  %v2295_v12 = vsub.f32 %v2281_v59, %v2293_v18  ;;  %v10708_v59 = vld [vmem:[#allocation5 + $0x58] sm:$0xff]  }
 0x51c   :  { %7323 = vmatprep.subr.bf16.mxu1 %v11646_v0  ;;  %7343 = vmatprep.subr.bf16.mxu0 %v11646_v0  ;;  %11693 = vst [vmem:[#allocation47_spill] sm:$0xff] %v10708_v59  ;;  %v10732_v18 = vld [vmem:[#allocation5 + $0x78] sm:$0xff]  }
 0x51d   :  { %v2296_v5 = vpack.c.bf16 %v2295_v12, %v2294_v62  ;;  %v10696_v62 = vld [vmem:[#allocation5 + $0x48] sm:$0xff]   ;;  %11697 = vst [vmem:[#allocation51_spill] sm:$0xff] %v10732_v18 }
 0x51e   :  { %11691 = vst [vmem:[#allocation45_spill] sm:$0xff] %v10696_v62  ;;  %v10720_v12 = vld [vmem:[#allocation5 + $0x68] sm:$0xff]  }
 0x51f   :  { %7324 = vmatpush3.bf16.msra.mxu1 %v10569_v34  ;;  %7344 = vmatpush3.bf16.msra.mxu0 %v10668_v17  ;;  %v10680_v17 = vld [vmem:[#allocation7 + $0x78] sm:$0xff]   ;;  %11695 = vst [vmem:[#allocation49_spill] sm:$0xff] %v10720_v12 }
 0x520   :  { %7325 = vmatprep.subr.bf16.mxu1 %v11646_v0  ;;  %7345 = vmatprep.subr.bf16.mxu0 %v11646_v0  ;;  %11689 = vst [vmem:[#allocation43_spill] sm:$0xff] %v10680_v17 }
 0x523   :  { %7326 = vmatpush3.bf16.msra.mxu1 %v10573_v28  ;;  %7346 = vmatpush3.bf16.msra.mxu0 %v10674_v51 }
 0x524   :  { %7327 = vmatprep.subr.bf16.mxu1 %v11646_v0  ;;  %7347 = vmatprep.subr.bf16.mxu0 %v11646_v0 }
 0x527   :  { %7328 = vmatpush3.bf16.msra.mxu1 %v10577_v43  ;;  %7348 = vmatpush3.bf16.msra.mxu0 %v10680_v17 }
 0x528   :  { %7353 = vmatprep.subr.bf16.mxu1 %v11646_v0  ;;  %7373 = vmatprep.subr.bf16.mxu0 %v11646_v0 }
 0x52a   :  { %7330 = vmatmul.mubr.bf16.vlgmr.msra.gmra.mrb[24].mxu1 %v2296_v5  ;;  %7350 = vmatmul.mubr.bf16.vlgmr.msra.gmra.mrb[28].mxu0 %v10603_v3  ;;  %v10714_v5 = vld [vmem:[#allocation5 + $0x60] sm:$0xff]  }
 0x52b   :  { %7354 = vmatpush3.bf16.msra.mxu1 %v10686_v1  ;;  %7374 = vmatpush3.bf16.msra.mxu0 %v10686_v1  ;;  %11694 = vst [vmem:[#allocation48_spill] sm:$0xff] %v10714_v5 }
 0x52c   :  { %7355 = vmatprep.subr.bf16.mxu1 %v11646_v0  ;;  %7375 = vmatprep.subr.bf16.mxu0 %v11646_v0 }
 0x52d   :  { %7369 = vmatprep.mubr.msk.bf16.mxu1 %vm9659_vm0, %v11646_v0  ;;  %7389 = vmatprep.mubr.msk.bf16.mxu0 %vm9659_vm0, %v11646_v0 }
 0x52f   :  { %7356 = vmatpush3.bf16.msra.mxu1 %v10696_v62  ;;  %7376 = vmatpush3.bf16.msra.mxu0 %v10696_v62  ;;  %v10805_v62 = vld [vmem:[#allocation5 + $0xb8] sm:$0xff]  }
 0x530   :  { %7357 = vmatprep.subr.bf16.mxu1 %v11646_v0  ;;  %7377 = vmatprep.subr.bf16.mxu0 %v11646_v0  ;;  %11714 = vst [vmem:[#allocation67_spill] sm:$0xff] %v10805_v62 }
 0x533   :  { %7358 = vmatpush3.bf16.msra.mxu1 %v10702_v57  ;;  %7378 = vmatpush3.bf16.msra.mxu0 %v10702_v57  ;;  %v10797_v57 = vld [vmem:[#allocation5 + $0xb0] sm:$0xff]  }
 0x534   :  { %7359 = vmatprep.subr.bf16.mxu1 %v11646_v0  ;;  %7379 = vmatprep.subr.bf16.mxu0 %v11646_v0  ;;  %11712 = vst [vmem:[#allocation65_spill] sm:$0xff] %v10797_v57 }
 0x537   :  { %7360 = vmatpush3.bf16.msra.mxu1 %v10708_v59  ;;  %7380 = vmatpush3.bf16.msra.mxu0 %v10708_v59  ;;  %v10789_v59 = vld [vmem:[#allocation5 + $0xa8] sm:$0xff]  }
 0x538   :  { %7361 = vmatprep.subr.bf16.mxu1 %v11646_v0  ;;  %7381 = vmatprep.subr.bf16.mxu0 %v11646_v0  ;;  %11710 = vst [vmem:[#allocation63_spill] sm:$0xff] %v10789_v59 }
 0x53b   :  { %7362 = vmatpush3.bf16.msra.mxu1 %v10714_v5  ;;  %7382 = vmatpush3.bf16.msra.mxu0 %v10714_v5  ;;  %v10745_v5 = vld [vmem:[#allocation5 + $0x80] sm:$0xff]  }
 0x53c   :  { %7363 = vmatprep.subr.bf16.mxu1 %v11646_v0  ;;  %7383 = vmatprep.subr.bf16.mxu0 %v11646_v0  ;;  %11700 = vst [vmem:[#allocation53_spill] sm:$0xff] %v10745_v5 }
 0x53f   :  { %7364 = vmatpush3.bf16.msra.mxu1 %v10720_v12  ;;  %7384 = vmatpush3.bf16.msra.mxu0 %v10720_v12  ;;  %v11698_v12 = vpack.c.bf16 %v10618_v26, %v10616_v40  ;;  %v10757_v26 = vld [vmem:[#allocation5 + $0x88] sm:$0xff]   ;;  %v10762_v40 = vld [vmem:[#allocation7 + $0x90] sm:$0xff]  }
 0x540   :  { %7365 = vmatprep.subr.bf16.mxu1 %v11646_v0  ;;  %7385 = vmatprep.subr.bf16.mxu0 %v11646_v0  ;;  %11702 = vst [vmem:[#allocation55_spill] sm:$0xff] %v10757_v26  ;;  %11703 = vst [vmem:[#allocation56_spill] sm:$0xff] %v10762_v40 }
 0x543   :  { %7366 = vmatpush3.bf16.msra.mxu1 %v10726_v4  ;;  %7386 = vmatpush3.bf16.msra.mxu0 %v10726_v4  ;;  %v10742_v4 = vld [vmem:[#allocation7 + $0x80] sm:$0xff]  }
 0x544   :  { %7367 = vmatprep.subr.bf16.mxu1 %v11646_v0  ;;  %7387 = vmatprep.subr.bf16.mxu0 %v11646_v0  ;;  %11699 = vst [vmem:[#allocation52_spill] sm:$0xff] %v10742_v4 }
 0x547   :  { %7368 = vmatpush3.bf16.msra.mxu1 %v10732_v18  ;;  %7388 = vmatpush3.bf16.msra.mxu0 %v10732_v18  ;;  %v10781_v18 = vld [vmem:[#allocation5 + $0xa0] sm:$0xff]  }
 0x548   :  { %7393 = vmatprep.subr.bf16.mxu1 %v11646_v0  ;;  %7413 = vmatprep.subr.bf16.mxu0 %v11646_v0  ;;  %11708 = vst [vmem:[#allocation61_spill] sm:$0xff] %v10781_v18 }
 0x54a   :  { %7370 = vmatmul.mubr.bf16.vlgmr.msra.gmra.mrb[28].mxu1 %v10603_v3  ;;  %7390 = vmatmul.mubr.bf16.vlgmr.msra.gmra.mrb[32].mxu0 %v11698_v12  ;;  %v10754_v3 = vld [vmem:[#allocation7 + $0x88] sm:$0xff]   ;;  %v10765_v12 = vld [vmem:[#allocation5 + $0x90] sm:$0xff]  }
 0x54b   :  { %7394 = vmatpush3.bf16.msra.mxu1 %v10742_v4  ;;  %7414 = vmatpush3.bf16.msra.mxu0 %v10745_v5  ;;  %11701 = vst [vmem:[#allocation54_spill] sm:$0xff] %v10754_v3  ;;  %11704 = vst [vmem:[#allocation57_spill] sm:$0xff] %v10765_v12  ;;  %v10773_v4 = vld [vmem:[#allocation5 + $0x98] sm:$0xff]  }
 0x54c   :  { %7395 = vmatprep.subr.bf16.mxu1 %v11646_v0  ;;  %7415 = vmatprep.subr.bf16.mxu0 %v11646_v0  ;;  %11706 = vst [vmem:[#allocation59_spill] sm:$0xff] %v10773_v4 }
 0x54d   :  { %7409 = vmatprep.mubr.msk.bf16.mxu1 %vm9659_vm0, %v11646_v0  ;;  %7429 = vmatprep.mubr.msk.bf16.mxu0 %vm9659_vm0, %v11646_v0 }
 0x54f   :  { %7396 = vmatpush3.bf16.msra.mxu1 %v10754_v3  ;;  %7416 = vmatpush3.bf16.msra.mxu0 %v10757_v26  ;;  %v10770_v3 = vld [vmem:[#allocation7 + $0x98] sm:$0xff]  }
 0x550   :  { %7397 = vmatprep.subr.bf16.mxu1 %v11646_v0  ;;  %7417 = vmatprep.subr.bf16.mxu0 %v11646_v0  ;;  %11705 = vst [vmem:[#allocation58_spill] sm:$0xff] %v10770_v3 }
 0x553   :  { %7398 = vmatpush3.bf16.msra.mxu1 %v10762_v40  ;;  %7418 = vmatpush3.bf16.msra.mxu0 %v10765_v12  ;;  %v10778_v40 = vld [vmem:[#allocation7 + $0xa0] sm:$0xff]  }
 0x554   :  { %7399 = vmatprep.subr.bf16.mxu1 %v11646_v0  ;;  %7419 = vmatprep.subr.bf16.mxu0 %v11646_v0  ;;  %11707 = vst [vmem:[#allocation60_spill] sm:$0xff] %v10778_v40 }
 0x557   :  { %7400 = vmatpush3.bf16.msra.mxu1 %v10770_v3  ;;  %7420 = vmatpush3.bf16.msra.mxu0 %v10773_v4  ;;  %v10786_v3 = vld [vmem:[#allocation7 + $0xa8] sm:$0xff]  }
 0x558   :  { %7401 = vmatprep.subr.bf16.mxu1 %v11646_v0  ;;  %7421 = vmatprep.subr.bf16.mxu0 %v11646_v0  ;;  %11709 = vst [vmem:[#allocation62_spill] sm:$0xff] %v10786_v3 }
 0x55b   :  { %7402 = vmatpush3.bf16.msra.mxu1 %v10778_v40  ;;  %7422 = vmatpush3.bf16.msra.mxu0 %v10781_v18  ;;  %v10794_v40 = vld [vmem:[#allocation7 + $0xb0] sm:$0xff]  }
 0x55c   :  { %7403 = vmatprep.subr.bf16.mxu1 %v11646_v0  ;;  %7423 = vmatprep.subr.bf16.mxu0 %v11646_v0  ;;  %11711 = vst [vmem:[#allocation64_spill] sm:$0xff] %v10794_v40 }
 0x55f   :  { %7404 = vmatpush3.bf16.msra.mxu1 %v10786_v3  ;;  %7424 = vmatpush3.bf16.msra.mxu0 %v10789_v59  ;;  %v10802_v3 = vld [vmem:[#allocation7 + $0xb8] sm:$0xff]  }
 0x560   :  { %7405 = vmatprep.subr.bf16.mxu1 %v11646_v0  ;;  %7425 = vmatprep.subr.bf16.mxu0 %v11646_v0  ;;  %11713 = vst [vmem:[#allocation66_spill] sm:$0xff] %v10802_v3 }
 0x563   :  { %7406 = vmatpush3.bf16.msra.mxu1 %v10794_v40  ;;  %7426 = vmatpush3.bf16.msra.mxu0 %v10797_v57 }
 0x564   :  { %7407 = vmatprep.subr.bf16.mxu1 %v11646_v0  ;;  %7427 = vmatprep.subr.bf16.mxu0 %v11646_v0 }
 0x567   :  { %7408 = vmatpush3.bf16.msra.mxu1 %v10802_v3  ;;  %7428 = vmatpush3.bf16.msra.mxu0 %v10805_v62 }
 0x568   :  { %7433 = vmatprep.subr.bf16.mxu1 %v11646_v0  ;;  %8761 = vmatprep.subr.bf16.mxu0 %v11647_v33 }
 0x56a   :  { %7410 = vmatmul.mubr.bf16.vlgmr.msra.gmra.mrb[32].mxu1 %v10623_v36  ;;  %7430 = vmatmul.mubr.bf16.vlgmr.msra.gmra.mrb[36].mxu0 %v10623_v36  ;;  %v11715_v36 = vpack.c.bf16 %v10639_v25, %v10637_v42 }
 0x56b   :  { %7434 = vmatpush3.bf16.msra.mxu1 %v10745_v5  ;;  %7449 = vmatprep.mubr.msk.bf16.mxu1 %vm9659_vm0, %v11646_v0 }
 0x56c   :  { %7435 = vmatprep.subr.bf16.mxu1 %v11646_v0  ;;  %8763 = vmatpush3.bf16.msra.mxu0 %v9923_v30 }
 0x56d   :  { %8764 = vmatprep.subr.bf16.mxu0 %v11647_v33  ;;  %7485 = vmatprep.mubr.msk.f32.mxu0 %vm9659_vm0, %v11646_v0 }
 0x56f   :  { %7436 = vmatpush3.bf16.msra.mxu1 %v10757_v26 }
 0x570   :  { %7437 = vmatprep.subr.bf16.mxu1 %v11646_v0  ;;  %8766 = vmatpush3.bf16.msra.mxu0 %v9945_v45 }
 0x571   :  { %8767 = vmatprep.subr.bf16.mxu0 %v11647_v33 }
 0x573   :  { %7438 = vmatpush3.bf16.msra.mxu1 %v10765_v12 }
 0x574   :  { %7439 = vmatprep.subr.bf16.mxu1 %v11646_v0  ;;  %8769 = vmatpush3.bf16.msra.mxu0 %v9961_v50 }
 0x575   :  { %8770 = vmatprep.subr.bf16.mxu0 %v11647_v33 }
 0x577   :  { %7440 = vmatpush3.bf16.msra.mxu1 %v10773_v4 }
 0x578   :  { %7441 = vmatprep.subr.bf16.mxu1 %v11646_v0  ;;  %8772 = vmatpush3.bf16.msra.mxu0 %v9977_v55 }
 0x579   :  { %8773 = vmatprep.subr.bf16.mxu0 %v11647_v33 }
 0x57b   :  { %7442 = vmatpush3.bf16.msra.mxu1 %v10781_v18 }
 0x57c   :  { %7443 = vmatprep.subr.bf16.mxu1 %v11646_v0  ;;  %8775 = vmatpush3.bf16.msra.mxu0 %v9993_v60 }
 0x57d   :  { %8776 = vmatprep.subr.bf16.mxu0 %v11647_v33 }
 0x57f   :  { %7444 = vmatpush3.bf16.msra.mxu1 %v10789_v59 }
 0x580   :  { %7445 = vmatprep.subr.bf16.mxu1 %v11646_v0  ;;  %8778 = vmatpush3.bf16.msra.mxu0 %v10009_v2 }
 0x581   :  { %8779 = vmatprep.subr.bf16.mxu0 %v11647_v33 }
 0x583   :  { %7446 = vmatpush3.bf16.msra.mxu1 %v10797_v57 }
 0x584   :  { %7447 = vmatprep.subr.bf16.mxu1 %v11646_v0  ;;  %8781 = vmatpush3.bf16.msra.mxu0 %v10029_v9 }
 0x585   :  { %8782 = vmatprep.subr.bf16.mxu0 %v11647_v33 }
 0x587   :  { %7448 = vmatpush3.bf16.msra.mxu1 %v10805_v62 }
 0x588   :  { %8784 = vmatpush3.bf16.msra.mxu0 %v10048_v16  ;;  %8905 = vmatprep.subr.bf16.mxu1 %v11647_v33 }
 0x589   :  { %8785 = vmatprep.subr.bf16.mxu0 %v11647_v33 }
 0x58a   :  { %7450 = vmatmul.mubr.bf16.vlgmr.msra.gmra.mrb[36].mxu1 %v11715_v36 }
 0x58b   :  { %8907 = vmatpush3.bf16.msra.mxu1 %v9923_v30  ;;  %7695 = vmatprep.mubr.msk.f32.mxu1 %vm9659_vm0, %v11646_v0 }
 0x58c   :  { %8908 = vmatprep.subr.bf16.mxu1 %v11647_v33 }
 0x58f   :  { %8910 = vmatpush3.bf16.msra.mxu1 %v9945_v45 }
 0x590   :  { %8911 = vmatprep.subr.bf16.mxu1 %v11647_v33 }
 0x593   :  { %8913 = vmatpush3.bf16.msra.mxu1 %v9961_v50 }
 0x594   :  { %8914 = vmatprep.subr.bf16.mxu1 %v11647_v33 }
 0x597   :  { %8916 = vmatpush3.bf16.msra.mxu1 %v9977_v55 }
 0x598   :  { %8917 = vmatprep.subr.bf16.mxu1 %v11647_v33 }
 0x59b   :  { %8919 = vmatpush3.bf16.msra.mxu1 %v9993_v60 }
 0x59c   :  { %8920 = vmatprep.subr.bf16.mxu1 %v11647_v33 }
 0x59f   :  { %8922 = vmatpush3.bf16.msra.mxu1 %v10009_v2 }
 0x5a0   :  { %8923 = vmatprep.subr.bf16.mxu1 %v11647_v33 }
 0x5a3   :  { %8925 = vmatpush3.bf16.msra.mxu1 %v10029_v9 }
 0x5a4   :  { %8926 = vmatprep.subr.bf16.mxu1 %v11647_v33 }
 0x5a7   :  { %8928 = vmatpush3.bf16.msra.mxu1 %v10048_v16 }
 0x5a8   :  { %8929 = vmatprep.subr.bf16.mxu1 %v11647_v33 }
 0x5dd   :  { %v2331_v42 = vpop.f32.mrb[20].mxu1  ;;  %v2372_v25 = vpop.f32.mrb[24].mxu0 }
 0x5de   :  { %v2373_v36 = vadd.f32 %v2372_v25, %v2331_v42  ;;  %v7291_v62 = vpop.f32.mrb[21].mxu1  ;;  %v7311_v3 = vpop.f32.mrb[25].mxu0 }
 0x5df   :  { %v2334_v57 = vpop.f32.mrb[22].mxu1  ;;  %v2375_v40 = vpop.f32.mrb[26].mxu0 }
 0x5e0   :  { %v2376_v59 = vadd.f32 %v2375_v40, %v2334_v57  ;;  %v7292_v18 = vpop.f32.mrb[23].mxu1  ;;  %v7312_v4 = vpop.f32.mrb[27].mxu0 }
 0x5fd   :  { %v2413_v12 = vpop.f32.mrb[24].mxu1  ;;  %v2462_v26 = vpop.f32.mrb[28].mxu0 }
 0x5fe   :  { %v2420_v5 = vadd.f32 %v2413_v12, %v2373_v36  ;;  %v7331_v1 = vpop.f32.mrb[25].mxu1  ;;  %v7351_v17 = vpop.f32.mrb[29].mxu0 }
 0x5ff   :  { %v2416_v51 = vpop.f32.mrb[26].mxu1  ;;  %v2465_v52 = vpop.f32.mrb[30].mxu0 }
 0x600   :  { %v2421_v15 = vadd.f32 %v2416_v51, %v2376_v59  ;;  %v7332_v14 = vpop.f32.mrb[27].mxu1  ;;  %v7352_v11 = vpop.f32.mrb[31].mxu0 }
 0x61d   :  { %v2503_v21 = vpop.f32.mrb[28].mxu1  ;;  %v2544_v10 = vpop.f32.mrb[32].mxu0 }
 0x61e   :  { %v2504_v42 = vadd.f32 %v2503_v21, %v2462_v26  ;;  %v7371_v62 = vpop.f32.mrb[29].mxu1  ;;  %v7391_v3 = vpop.f32.mrb[33].mxu0 }
 0x61f   :  { %v2506_v25 = vpop.f32.mrb[30].mxu1  ;;  %v2547_v43 = vpop.f32.mrb[34].mxu0 }
 0x620   :  { %v2551_v57 = vadd.f32 %v2544_v10, %v2504_v42  ;;  %v2507_v18 = vadd.f32 %v2506_v25, %v2465_v52  ;;  %v7372_v4 = vpop.f32.mrb[31].mxu1  ;;  %v7392_v40 = vpop.f32.mrb[35].mxu0 }
 0x622   :  { %v2553_v28 = vadd.f32 %v2551_v57, %v2420_v5  ;;  %v2552_v12 = vadd.f32 %v2547_v43, %v2507_v18  ;;  %v10872_v43 = vld [vmem:[%s11556_s4] ss:$0 sm:$0xff] }
 0x624   :  { %v2554_v1 = vadd.f32 %v2552_v12, %v2421_v15 }
 0x63d   :  { %v2595_v17 = vpop.f32.mrb[32].mxu1  ;;  %v2636_v36 = vpop.f32.mrb[36].mxu0 }
 0x63e   :  { %v2637_v34 = vadd.f32 %v2636_v36, %v2595_v17  ;;  %v7411_v51 = vpop.f32.mrb[33].mxu1  ;;  %v7431_v14 = vpop.f32.mrb[37].mxu0 }
 0x63f   :  { %v2598_v11 = vpop.f32.mrb[34].mxu1  ;;  %v2639_v59 = vpop.f32.mrb[38].mxu0  ;;  %v11716_v14 = vld [vmem:[#allocation18_spill] sm:$0xff] }
 0x640   :  { %v2640_v32 = vadd.f32 %v2639_v59, %v2598_v11  ;;  %v7412_v21 = vpop.f32.mrb[35].mxu1  ;;  %v7432_v26 = vpop.f32.mrb[39].mxu0  ;;  %v11717_v11 = vld [vmem:[#allocation19_spill] sm:$0xff]  ;;  %v11718_v59 = vld [vmem:[#allocation20_spill] sm:$0xff] }
 0x641   :  { %v11719_v21 = vld [vmem:[#allocation21_spill] sm:$0xff]  ;;  %v11720_v26 = vld [vmem:[#allocation22_spill] sm:$0xff] }
 0x65d   :  { %v2677_v62 = vpop.f32.mrb[36].mxu1 }
 0x65e   :  { %v2684_v3 = vadd.f32 %v2677_v62, %v2637_v34  ;;  %v7451_v22 = vpop.f32.mrb[37].mxu1  ;;  %v11721_v62 = vld [vmem:[#allocation23_spill] sm:$0xff] }
 0x65f   :  { %v2680_v10 = vpop.f32.mrb[38].mxu1 }
 0x660   :  { %v2686_v52 = vadd.f32 %v2684_v3, %v2553_v28  ;;  %v2685_v42 = vadd.f32 %v2680_v10, %v2640_v32  ;;  %v7452_v25 = vpop.f32.mrb[39].mxu1  ;;  %v11722_v3 = vld [vmem:[#allocation24_spill] sm:$0xff]  ;;  %v11723_v10 = vld [vmem:[#allocation25_spill] sm:$0xff] }
 0x662   :  { %v2687_v5 = vadd.f32 %v2685_v42, %v2554_v1  ;;  %v10875_v15 = vadd.f32 %v10872_v43, %v2686_v52 }
 0x664   :  { %v10878_v57 = vadd.f32 %v10872_v43, %v2687_v5  ;;  %v11724_v5 = vld [vmem:[#allocation26_spill] sm:$0xff] }
 0x666   :  { %v2690_v34 = vadd.f32 %v10878_v57, %v10875_v15 }
 0x668   :  { %v2691_v22 = vrot.slane %v2690_v34, 4 }
 0x66a   :  { %v2692_v18 = vadd.f32 %v2691_v22, %v2690_v34 }
 0x66c   :  { %v2693_v28 = vrot.slane %v2692_v18, 2 }
 0x66e   :  { %v2694_v32 = vadd.f32 %v2693_v28, %v2692_v18 }
 0x670   :  { %v2695_v4 = vrot.slane %v2694_v32, 1 }
 0x672   :  { %v2696_v40 = vadd.f32 %v2695_v4, %v2694_v32 }
 0x674   :  { %v10882_v12 = vand.u32 4294901760, %v2696_v40 }
 0x676   :  { %v2779_v1 = vsub.f32 %v2696_v40, %v10882_v12 }
 0x678   :  { %v2780_v17 = vand.u32 4294901760, %v2779_v1 }
 0x67a   :  { %v2781_v36 = vsub.f32 %v2779_v1, %v2780_v17 }
 0x67c   :  { %v2782_v51 = vand.u32 4294901760, %v2781_v36 }
 0x67e   :  { %7486 = vmatmul.mubr.f32.vlgmr.msra.gmra.mrb[22].mxu0 %v2782_v51 }
 0x67f   :  { %8787 = vmatpush3.bf16.msra.mxu0 %v10098_v39  ;;  %7520 = vmatprep.mubr.msk.f32.mxu0 %vm9659_vm0, %v11646_v0 }
 0x680   :  { %8788 = vmatprep.subr.bf16.mxu0 %v11647_v33 }
 0x683   :  { %8790 = vmatpush3.bf16.msra.mxu0 %v10105_v23 }
 0x684   :  { %8791 = vmatprep.subr.bf16.mxu0 %v11647_v33 }
 0x687   :  { %8793 = vmatpush3.bf16.msra.mxu0 %v10125_v41 }
 0x688   :  { %8794 = vmatprep.subr.bf16.mxu0 %v11647_v33 }
 0x68b   :  { %8796 = vmatpush3.bf16.msra.mxu0 %v10161_v24 }
 0x68c   :  { %8797 = vmatprep.subr.bf16.mxu0 %v11647_v33 }
 0x68f   :  { %8799 = vmatpush3.bf16.msra.mxu0 %v10165_v53 }
 0x690   :  { %8800 = vmatprep.subr.bf16.mxu0 %v11647_v33 }
 0x693   :  { %8802 = vmatpush3.bf16.msra.mxu0 %v10185_v27 }
 0x694   :  { %8803 = vmatprep.subr.bf16.mxu0 %v11647_v33 }
 0x697   :  { %8805 = vmatpush3.bf16.msra.mxu0 %v10211_v8 }
 0x698   :  { %8806 = vmatprep.subr.bf16.mxu0 %v11647_v33 }
 0x69b   :  { %8808 = vmatpush3.bf16.msra.mxu0 %v10213_v56 }
 0x69c   :  { %8809 = vmatprep.subr.bf16.mxu0 %v11647_v33 }
 0x69e   :  { %7521 = vmatmul.mubr.f32.vlgmr.msra.gmra.mrb[22].mxu0 %v10882_v12 }
 0x69f   :  { %8811 = vmatpush3.bf16.msra.mxu0 %v10217_v58  ;;  %7555 = vmatprep.mubr.msk.f32.mxu0 %vm9659_vm0, %v11646_v0 }
 0x6a0   :  { %8812 = vmatprep.subr.bf16.mxu0 %v11647_v33 }
 0x6a3   :  { %8814 = vmatpush3.bf16.msra.mxu0 %v10222_v54 }
 0x6a4   :  { %8815 = vmatprep.subr.bf16.mxu0 %v11647_v33 }
 0x6a7   :  { %8817 = vmatpush3.bf16.msra.mxu0 %v10228_v38 }
 0x6a8   :  { %8818 = vmatprep.subr.bf16.mxu0 %v11647_v33 }
 0x6ab   :  { %8820 = vmatpush3.bf16.msra.mxu0 %v10232_v49 }
 0x6ac   :  { %8821 = vmatprep.subr.bf16.mxu0 %v11647_v33 }
 0x6af   :  { %8823 = vmatpush3.bf16.msra.mxu0 %v10236_v47 }
 0x6b0   :  { %8824 = vmatprep.subr.bf16.mxu0 %v11647_v33 }
 0x6b3   :  { %8826 = vmatpush3.bf16.msra.mxu0 %v10240_v31 }
 0x6b4   :  { %8827 = vmatprep.subr.bf16.mxu0 %v11647_v33 }
 0x6b7   :  { %8829 = vmatpush3.bf16.msra.mxu0 %v10244_v35 }
 0x6b8   :  { %8830 = vmatprep.subr.bf16.mxu0 %v11647_v33 }
 0x6bb   :  { %8832 = vmatpush3.bf16.msra.mxu0 %v10248_v19 }
 0x6bc   :  { %8833 = vmatprep.subr.bf16.mxu0 %v11647_v33 }
 0x6be   :  { %7556 = vmatmul.mubr.f32.vlgmr.msra.gmra.mrb[22].mxu0 %v2779_v1 }
 0x6bf   :  { %8835 = vmatpush3.bf16.msra.mxu0 %v9923_v30  ;;  %7590 = vmatprep.mubr.msk.f32.mxu0 %vm9659_vm0, %v11646_v0 }
 0x6c0   :  { %8836 = vmatprep.subr.bf16.mxu0 %v11647_v33 }
 0x6c3   :  { %8838 = vmatpush3.bf16.msra.mxu0 %v9945_v45 }
 0x6c4   :  { %8839 = vmatprep.subr.bf16.mxu0 %v11647_v33 }
 0x6c7   :  { %8841 = vmatpush3.bf16.msra.mxu0 %v9961_v50 }
 0x6c8   :  { %8842 = vmatprep.subr.bf16.mxu0 %v11647_v33 }
 0x6cb   :  { %8844 = vmatpush3.bf16.msra.mxu0 %v9977_v55 }
 0x6cc   :  { %8845 = vmatprep.subr.bf16.mxu0 %v11647_v33 }
 0x6cf   :  { %8847 = vmatpush3.bf16.msra.mxu0 %v9993_v60 }
 0x6d0   :  { %8848 = vmatprep.subr.bf16.mxu0 %v11647_v33 }
 0x6d3   :  { %8850 = vmatpush3.bf16.msra.mxu0 %v10009_v2 }
 0x6d4   :  { %8851 = vmatprep.subr.bf16.mxu0 %v11647_v33 }
 0x6d7   :  { %8853 = vmatpush3.bf16.msra.mxu0 %v10029_v9 }
 0x6d8   :  { %8854 = vmatprep.subr.bf16.mxu0 %v11647_v33 }
 0x6db   :  { %8856 = vmatpush3.bf16.msra.mxu0 %v10048_v16 }
 0x6dc   :  { %8857 = vmatprep.subr.bf16.mxu0 %v11647_v33 }
 0x6de   :  { %7591 = vmatmul.mubr.f32.vlgmr.msra.gmra.mrb[22].mxu0 %v2780_v17 }
 0x6df   :  { %8859 = vmatpush3.bf16.msra.mxu0 %v10320_v6  ;;  %7625 = vmatprep.mubr.msk.f32.mxu0 %vm9659_vm0, %v11646_v0 }
 0x6e0   :  { %8860 = vmatprep.subr.bf16.mxu0 %v11647_v33 }
 0x6e3   :  { %8862 = vmatpush3.bf16.msra.mxu0 %v10328_v44 }
 0x6e4   :  { %8863 = vmatprep.subr.bf16.mxu0 %v11647_v33 }
 0x6e7   :  { %8865 = vmatpush3.bf16.msra.mxu0 %v10338_v63 }
 0x6e8   :  { %8866 = vmatprep.subr.bf16.mxu0 %v11647_v33 }
 0x6eb   :  { %8868 = vmatpush3.bf16.msra.mxu0 %v10346_v29 }
 0x6ec   :  { %8869 = vmatprep.subr.bf16.mxu0 %v11647_v33 }
 0x6ef   :  { %8871 = vmatpush3.bf16.msra.mxu0 %v10354_v37 }
 0x6f0   :  { %8872 = vmatprep.subr.bf16.mxu0 %v11647_v33 }
 0x6f3   :  { %8874 = vmatpush3.bf16.msra.mxu0 %v10362_v46 }
 0x6f4   :  { %8875 = vmatprep.subr.bf16.mxu0 %v11647_v33 }
 0x6f7   :  { %8877 = vmatpush3.bf16.msra.mxu0 %v10370_v61 }
 0x6f8   :  { %8878 = vmatprep.subr.bf16.mxu0 %v11647_v33 }
 0x6fb   :  { %8880 = vmatpush3.bf16.msra.mxu0 %v10378_v48 }
 0x6fc   :  { %8881 = vmatprep.subr.bf16.mxu0 %v11647_v33 }
 0x6fe   :  { %7626 = vmatmul.mubr.f32.vlgmr.msra.gmra.mrb[22].mxu0 %v10882_v12 }
 0x6ff   :  { %8883 = vmatpush3.bf16.msra.mxu0 %v9923_v30  ;;  %7660 = vmatprep.mubr.msk.f32.mxu0 %vm9659_vm0, %v11646_v0 }
 0x700   :  { %8884 = vmatprep.subr.bf16.mxu0 %v11647_v33 }
 0x703   :  { %8886 = vmatpush3.bf16.msra.mxu0 %v9945_v45 }
 0x704   :  { %8887 = vmatprep.subr.bf16.mxu0 %v11647_v33 }
 0x707   :  { %8889 = vmatpush3.bf16.msra.mxu0 %v9961_v50 }
 0x708   :  { %8890 = vmatprep.subr.bf16.mxu0 %v11647_v33 }
 0x70b   :  { %8892 = vmatpush3.bf16.msra.mxu0 %v9977_v55 }
 0x70c   :  { %8893 = vmatprep.subr.bf16.mxu0 %v11647_v33 }
 0x70f   :  { %8895 = vmatpush3.bf16.msra.mxu0 %v9993_v60 }
 0x710   :  { %8896 = vmatprep.subr.bf16.mxu0 %v11647_v33 }
 0x713   :  { %8898 = vmatpush3.bf16.msra.mxu0 %v10009_v2 }
 0x714   :  { %8899 = vmatprep.subr.bf16.mxu0 %v11647_v33 }
 0x717   :  { %8901 = vmatpush3.bf16.msra.mxu0 %v10029_v9 }
 0x718   :  { %8902 = vmatprep.subr.bf16.mxu0 %v11647_v33 }
 0x71b   :  { %8904 = vmatpush3.bf16.msra.mxu0 %v10048_v16 }
 0x71c   :  { %7873 = vmatprep.subr.bf16.mxu0 %v11646_v0 }
 0x71e   :  { %7661 = vmatmul.mubr.f32.vlgmr.msra.gmra.mrb[22].mxu0 %v10882_v12 }
 0x71f   :  { %7874 = vmatpush3.bf16.msra.mxu0 %v11716_v14  ;;  %7889 = vmatprep.mubr.msk.bf16.mxu0 %vm9659_vm0, %v11646_v0 }
 0x720   :  { %7875 = vmatprep.subr.bf16.mxu0 %v11646_v0 }
 0x723   :  { %7876 = vmatpush3.bf16.msra.mxu0 %v11717_v11 }
 0x724   :  { %7877 = vmatprep.subr.bf16.mxu0 %v11646_v0 }
 0x727   :  { %7878 = vmatpush3.bf16.msra.mxu0 %v11718_v59 }
 0x728   :  { %7879 = vmatprep.subr.bf16.mxu0 %v11646_v0 }
 0x72b   :  { %7880 = vmatpush3.bf16.msra.mxu0 %v11719_v21  ;;  %v11725_v21 = vld [vmem:[#allocation27_spill] sm:$0xff] }
 0x72c   :  { %7881 = vmatprep.subr.bf16.mxu0 %v11646_v0 }
 0x72f   :  { %7882 = vmatpush3.bf16.msra.mxu0 %v11720_v26  ;;  %v11726_v26 = vld [vmem:[#allocation28_spill] sm:$0xff] }
 0x730   :  { %7883 = vmatprep.subr.bf16.mxu0 %v11646_v0 }
 0x733   :  { %7884 = vmatpush3.bf16.msra.mxu0 %v11721_v62  ;;  %v11728_v62 = vld [vmem:[#allocation30_spill] sm:$0xff] }
 0x734   :  { %7885 = vmatprep.subr.bf16.mxu0 %v11646_v0 }
 0x737   :  { %7886 = vmatpush3.bf16.msra.mxu0 %v11722_v3 }
 0x738   :  { %7887 = vmatprep.subr.bf16.mxu0 %v11646_v0 }
 0x73b   :  { %7888 = vmatpush3.bf16.msra.mxu0 %v11723_v10 }
 0x73c   :  { %7913 = vmatprep.subr.bf16.mxu0 %v11646_v0 }
 0x7f1   :  { %v3334_v52 = vpop.f32.mrb[22].mxu0 }
 0x7f2   :  { %v3338_v42 = vmul.f32 0.001953125, %v3334_v52  ;;  %v7662_v25 = vpop.f32.mrb[23].mxu0 }
 0x7f3   :  { %v11730_v25 = vld [vmem:[#allocation32_spill] sm:$0xff] }
 0x7f4   :  { %v3342_v34 = vrot.slane %v3338_v42, %v11724_v5 }
 0x7f6   :  { %v10998_v22 = vsub.f32 %v10875_v15, %v3342_v34  ;;  %v11001_v18 = vsub.f32 %v10878_v57, %v3342_v34 }
 0x7f8   :  { %v3345_v28 = vmul.f32 %v10998_v22, %v10998_v22  ;;  %v3346_v32 = vmul.f32 %v11001_v18, %v11001_v18 }
 0x7fa   :  { %v3347_v4 = vadd.f32 %v3346_v32, %v3345_v28 }
 0x7fc   :  { %v3348_v40 = vrot.slane %v3347_v4, 4 }
 0x7fe   :  { %v3349_v12 = vadd.f32 %v3348_v40, %v3347_v4  ;;  %v11731_v40 = vld [vmem:[#allocation33_spill] sm:$0xff] }
 0x800   :  { %v3350_v1 = vrot.slane %v3349_v12, 2 }
 0x802   :  { %v3351_v17 = vadd.f32 %v3350_v1, %v3349_v12  ;;  %v11129_v1 = vld [vmem:[%s11558_s6] ss:$0 sm:$0xff] }
 0x804   :  { %v3352_v36 = vrot.slane %v3351_v17, 1 }
 0x806   :  { %v3353_v51 = vadd.f32 %v3352_v36, %v3351_v17 }
 0x808   :  { %v11007_v14 = vand.u32 4294901760, %v3353_v51 }
 0x80a   :  { %v3436_v15 = vsub.f32 %v3353_v51, %v11007_v14 }
 0x80c   :  { %v3437_v11 = vand.u32 4294901760, %v3436_v15 }
 0x80e   :  { %v3438_v57 = vsub.f32 %v3436_v15, %v3437_v11 }
 0x810   :  { %v3439_v59 = vand.u32 4294901760, %v3438_v57 }
 0x812   :  { %7696 = vmatmul.mubr.f32.vlgmr.msra.gmra.mrb[18].mxu1 %v3439_v59 }
 0x813   :  { %8931 = vmatpush3.bf16.msra.mxu1 %v10098_v39  ;;  %7730 = vmatprep.mubr.msk.f32.mxu1 %vm9659_vm0, %v11646_v0 }
 0x814   :  { %8932 = vmatprep.subr.bf16.mxu1 %v11647_v33 }
 0x817   :  { %8934 = vmatpush3.bf16.msra.mxu1 %v10105_v23 }
 0x818   :  { %8935 = vmatprep.subr.bf16.mxu1 %v11647_v33 }
 0x81b   :  { %8937 = vmatpush3.bf16.msra.mxu1 %v10125_v41 }
 0x81c   :  { %8938 = vmatprep.subr.bf16.mxu1 %v11647_v33 }
 0x81f   :  { %8940 = vmatpush3.bf16.msra.mxu1 %v10161_v24 }
 0x820   :  { %8941 = vmatprep.subr.bf16.mxu1 %v11647_v33 }
 0x823   :  { %8943 = vmatpush3.bf16.msra.mxu1 %v10165_v53 }
 0x824   :  { %8944 = vmatprep.subr.bf16.mxu1 %v11647_v33 }
 0x827   :  { %8946 = vmatpush3.bf16.msra.mxu1 %v10185_v27 }
 0x828   :  { %8947 = vmatprep.subr.bf16.mxu1 %v11647_v33 }
 0x82b   :  { %8949 = vmatpush3.bf16.msra.mxu1 %v10211_v8 }
 0x82c   :  { %8950 = vmatprep.subr.bf16.mxu1 %v11647_v33 }
 0x82f   :  { %8952 = vmatpush3.bf16.msra.mxu1 %v10213_v56 }
 0x830   :  { %8953 = vmatprep.subr.bf16.mxu1 %v11647_v33 }
 0x832   :  { %7731 = vmatmul.mubr.f32.vlgmr.msra.gmra.mrb[18].mxu1 %v11007_v14 }
 0x833   :  { %8955 = vmatpush3.bf16.msra.mxu1 %v10217_v58  ;;  %7765 = vmatprep.mubr.msk.f32.mxu1 %vm9659_vm0, %v11646_v0 }
 0x834   :  { %8956 = vmatprep.subr.bf16.mxu1 %v11647_v33 }
 0x837   :  { %8958 = vmatpush3.bf16.msra.mxu1 %v10222_v54 }
 0x838   :  { %8959 = vmatprep.subr.bf16.mxu1 %v11647_v33 }
 0x83b   :  { %8961 = vmatpush3.bf16.msra.mxu1 %v10228_v38 }
 0x83c   :  { %8962 = vmatprep.subr.bf16.mxu1 %v11647_v33 }
 0x83f   :  { %8964 = vmatpush3.bf16.msra.mxu1 %v10232_v49 }
 0x840   :  { %8965 = vmatprep.subr.bf16.mxu1 %v11647_v33 }
 0x843   :  { %8967 = vmatpush3.bf16.msra.mxu1 %v10236_v47 }
 0x844   :  { %8968 = vmatprep.subr.bf16.mxu1 %v11647_v33 }
 0x847   :  { %8970 = vmatpush3.bf16.msra.mxu1 %v10240_v31 }
 0x848   :  { %8971 = vmatprep.subr.bf16.mxu1 %v11647_v33 }
 0x84b   :  { %8973 = vmatpush3.bf16.msra.mxu1 %v10244_v35 }
 0x84c   :  { %8974 = vmatprep.subr.bf16.mxu1 %v11647_v33 }
 0x84f   :  { %8976 = vmatpush3.bf16.msra.mxu1 %v10248_v19 }
 0x850   :  { %8977 = vmatprep.subr.bf16.mxu1 %v11647_v33 }
 0x852   :  { %7766 = vmatmul.mubr.f32.vlgmr.msra.gmra.mrb[18].mxu1 %v3436_v15 }
 0x853   :  { %8979 = vmatpush3.bf16.msra.mxu1 %v9923_v30  ;;  %7800 = vmatprep.mubr.msk.f32.mxu1 %vm9659_vm0, %v11646_v0 }
 0x854   :  { %8980 = vmatprep.subr.bf16.mxu1 %v11647_v33 }
 0x857   :  { %8982 = vmatpush3.bf16.msra.mxu1 %v9945_v45 }
 0x858   :  { %8983 = vmatprep.subr.bf16.mxu1 %v11647_v33 }
 0x85b   :  { %8985 = vmatpush3.bf16.msra.mxu1 %v9961_v50 }
 0x85c   :  { %8986 = vmatprep.subr.bf16.mxu1 %v11647_v33 }
 0x85f   :  { %8988 = vmatpush3.bf16.msra.mxu1 %v9977_v55 }
 0x860   :  { %8989 = vmatprep.subr.bf16.mxu1 %v11647_v33 }
 0x863   :  { %8991 = vmatpush3.bf16.msra.mxu1 %v9993_v60 }
 0x864   :  { %8992 = vmatprep.subr.bf16.mxu1 %v11647_v33 }
 0x867   :  { %8994 = vmatpush3.bf16.msra.mxu1 %v10009_v2 }
 0x868   :  { %8995 = vmatprep.subr.bf16.mxu1 %v11647_v33 }
 0x86b   :  { %8997 = vmatpush3.bf16.msra.mxu1 %v10029_v9 }
 0x86c   :  { %8998 = vmatprep.subr.bf16.mxu1 %v11647_v33 }
 0x86f   :  { %9000 = vmatpush3.bf16.msra.mxu1 %v10048_v16 }
 0x870   :  { %9001 = vmatprep.subr.bf16.mxu1 %v11647_v33 }
 0x872   :  { %7801 = vmatmul.mubr.f32.vlgmr.msra.gmra.mrb[18].mxu1 %v3437_v11  ;;  %v11733_v11 = vld [vmem:[#allocation35_spill] sm:$0xff] }
 0x873   :  { %9003 = vmatpush3.bf16.msra.mxu1 %v10320_v6  ;;  %7835 = vmatprep.mubr.msk.f32.mxu1 %vm9659_vm0, %v11646_v0 }
 0x874   :  { %9004 = vmatprep.subr.bf16.mxu1 %v11647_v33 }
 0x877   :  { %9006 = vmatpush3.bf16.msra.mxu1 %v10328_v44 }
 0x878   :  { %9007 = vmatprep.subr.bf16.mxu1 %v11647_v33 }
 0x87b   :  { %9009 = vmatpush3.bf16.msra.mxu1 %v10338_v63 }
 0x87c   :  { %9010 = vmatprep.subr.bf16.mxu1 %v11647_v33 }
 0x87f   :  { %9012 = vmatpush3.bf16.msra.mxu1 %v10346_v29 }
 0x880   :  { %9013 = vmatprep.subr.bf16.mxu1 %v11647_v33 }
 0x883   :  { %9015 = vmatpush3.bf16.msra.mxu1 %v10354_v37 }
 0x884   :  { %9016 = vmatprep.subr.bf16.mxu1 %v11647_v33 }
 0x887   :  { %9018 = vmatpush3.bf16.msra.mxu1 %v10362_v46 }
 0x888   :  { %9019 = vmatprep.subr.bf16.mxu1 %v11647_v33 }
 0x88b   :  { %9021 = vmatpush3.bf16.msra.mxu1 %v10370_v61 }
 0x88c   :  { %9022 = vmatprep.subr.bf16.mxu1 %v11647_v33 }
 0x88f   :  { %9024 = vmatpush3.bf16.msra.mxu1 %v10378_v48 }
 0x890   :  { %9025 = vmatprep.subr.bf16.mxu1 %v11647_v33 }
 0x892   :  { %7836 = vmatmul.mubr.f32.vlgmr.msra.gmra.mrb[18].mxu1 %v11007_v14 }
 0x893   :  { %9027 = vmatpush3.bf16.msra.mxu1 %v9923_v30  ;;  %7870 = vmatprep.mubr.msk.f32.mxu1 %vm9659_vm0, %v11646_v0 }
 0x894   :  { %9028 = vmatprep.subr.bf16.mxu1 %v11647_v33 }
 0x897   :  { %9030 = vmatpush3.bf16.msra.mxu1 %v9945_v45 }
 0x898   :  { %9031 = vmatprep.subr.bf16.mxu1 %v11647_v33 }
 0x89b   :  { %9033 = vmatpush3.bf16.msra.mxu1 %v9961_v50 }
 0x89c   :  { %9034 = vmatprep.subr.bf16.mxu1 %v11647_v33 }
 0x89f   :  { %9036 = vmatpush3.bf16.msra.mxu1 %v9977_v55 }
 0x8a0   :  { %9037 = vmatprep.subr.bf16.mxu1 %v11647_v33 }
 0x8a3   :  { %9039 = vmatpush3.bf16.msra.mxu1 %v9993_v60 }
 0x8a4   :  { %9040 = vmatprep.subr.bf16.mxu1 %v11647_v33 }
 0x8a7   :  { %9042 = vmatpush3.bf16.msra.mxu1 %v10009_v2 }
 0x8a8   :  { %9043 = vmatprep.subr.bf16.mxu1 %v11647_v33 }
 0x8ab   :  { %9045 = vmatpush3.bf16.msra.mxu1 %v10029_v9 }
 0x8ac   :  { %9046 = vmatprep.subr.bf16.mxu1 %v11647_v33 }
 0x8af   :  { %9048 = vmatpush3.bf16.msra.mxu1 %v10048_v16 }
 0x8b0   :  { %7893 = vmatprep.subr.bf16.mxu1 %v11646_v0 }
 0x8b2   :  { %7871 = vmatmul.mubr.f32.vlgmr.msra.gmra.mrb[18].mxu1 %v11007_v14  ;;  %v11732_v14 = vld [vmem:[#allocation34_spill] sm:$0xff] }
 0x8b3   :  { %7894 = vmatpush3.bf16.msra.mxu1 %v10547_v7  ;;  %7909 = vmatprep.mubr.msk.bf16.mxu1 %vm9659_vm0, %v11646_v0  ;;  %v11727_v7 = vld [vmem:[#allocation29_spill] sm:$0xff] }
 0x8b4   :  { %7895 = vmatprep.subr.bf16.mxu1 %v11646_v0 }
 0x8b7   :  { %7896 = vmatpush3.bf16.msra.mxu1 %v10553_v13  ;;  %v11729_v13 = vld [vmem:[#allocation31_spill] sm:$0xff] }
 0x8b8   :  { %7897 = vmatprep.subr.bf16.mxu1 %v11646_v0 }
 0x8bb   :  { %7898 = vmatpush3.bf16.msra.mxu1 %v10557_v20 }
 0x8bc   :  { %7899 = vmatprep.subr.bf16.mxu1 %v11646_v0 }
 0x8bf   :  { %7900 = vmatpush3.bf16.msra.mxu1 %v11725_v21 }
 0x8c0   :  { %7901 = vmatprep.subr.bf16.mxu1 %v11646_v0 }
 0x8c3   :  { %7902 = vmatpush3.bf16.msra.mxu1 %v11726_v26 }
 0x8c4   :  { %7903 = vmatprep.subr.bf16.mxu1 %v11646_v0 }
 0x8c7   :  { %7904 = vmatpush3.bf16.msra.mxu1 %v11727_v7  ;;  %v11739_v7 = vld [vmem:[#allocation38_spill] sm:$0xff] }
 0x8c8   :  { %7905 = vmatprep.subr.bf16.mxu1 %v11646_v0 }
 0x8cb   :  { %7906 = vmatpush3.bf16.msra.mxu1 %v11728_v62 }
 0x8cc   :  { %7907 = vmatprep.subr.bf16.mxu1 %v11646_v0 }
 0x8cf   :  { %7908 = vmatpush3.bf16.msra.mxu1 %v11729_v13 }
 0x8d0   :  { %7933 = vmatprep.subr.bf16.mxu1 %v11646_v0 }
 0x985   :  { %v3991_v20 = vpop.f32.mrb[18].mxu1 }
 0x986   :  { %v3995_v3 = vmul.f32 0.001953125, %v3991_v20  ;;  %v7872_v10 = vpop.f32.mrb[19].mxu1 }
 0x988   :  { %v3996_v52 = vadd.f32 1e-05, %v3995_v3  ;;  %v11735_v3 = vld [vmem:[#allocation16_spill] sm:$0xff] }
 0x98a   :  { %9459 = vrsqrt.f32 %v3996_v52 }
 0x994   :  { %v9460_v42 = vpop.eup %9459 }
 0x995   :  { %v3998_v34 = vmul.f32 %v9460_v42, %v11730_v25 }
 0x997   :  { %v4003_v28 = vrot.slane %v3998_v34, %v11724_v5 }
 0x999   :  { %v4005_v32 = vmul.f32 %v4003_v28, %v10998_v22  ;;  %v4006_v4 = vmul.f32 %v4003_v28, %v11001_v18 }
 0x99b   :  { %v4007_v12 = vadd.f32 %v11731_v40, %v4005_v32  ;;  %v4008_v17 = vadd.f32 %v11129_v1, %v4006_v4  ;;  %v11736_v32 = vld [vmem:[#allocation17_spill] sm:$0xff] }
 0x99d   :  { %v4009_v36 = vmax.f32 %v4007_v12, 0.0  ;;  %v4010_v51 = vmax.f32 %v4008_v17, 0.0 }
 0x99f   :  { %v4011_v15 = vadd.f32 %v11732_v14, %v4009_v36  ;;  %v4012_v57 = vadd.f32 %v11733_v11, %v4010_v51  ;;  %v9515_v36 = vld [vmem:[#allocation5] sm:$0xff]   ;;  %v11737_v51 = vld [vmem:[#allocation36_spill] sm:$0xff] }
 0x9a1   :  { %v4013_v59 = vrot.slane %v4011_v15, 7  ;;  %v4014_v21 = vrot.slane %v4012_v57, 7  ;;  %v11134_v22 = vpack.c.bf16 %v4012_v57, %v4011_v15  ;;  %v4019_v18 = vrot.slane %v4011_v15, 1 }
 0x9a2   :  { %v4020_v26 = vrot.slane %v4012_v57, 1 }
 0x9a3   :  { %v4016_v62 = vsel %vm145_vm1, %v4014_v21, %v4013_v59  ;;  %v4157_v13 = vunpack.c.l.bf16 %v11134_v22  ;;  %v4158_v20 = vunpack.c.h.bf16 %v11134_v22  ;;  %v4015_v25 = vsel %vm145_vm1, %v4013_v59, %v4014_v21  ;;  %v9516_v59 = vld [vmem:[#allocation5 + $0x8] sm:$0xff]   ;;  %v11738_v21 = vld [vmem:[#allocation37_spill] sm:$0xff] }
 0x9a4   :  { %v4017_v10 = vmul.f32 %v11735_v3, %v4016_v62  ;;  %v4021_v52 = vsel %vm152_vm4, %v4019_v18, %v4020_v26  ;;  %v4022_v42 = vsel %vm152_vm4, %v4020_v26, %v4019_v18  ;;  %v9517_v26 = vld [vmem:[#allocation5 + $0x10] sm:$0xff]   ;;  %v9518_v62 = vld [vmem:[#allocation5 + $0x18] sm:$0xff]  }
 0x9a5   :  { %v11147_v34 = vsub.f32 %v4011_v15, %v4157_v13  ;;  %v11149_v28 = vsub.f32 %v4012_v57, %v4158_v20  ;;  %v4024_v4 = vmul.f32 %v11736_v32, %v4022_v42  ;;  %v11740_v13 = vld [vmem:[#allocation39_spill] sm:$0xff]  ;;  %v9519_v20 = vld [vmem:[#allocation5 + $0x20] sm:$0xff]   ;;  %v11741_v3 = vld [vmem:[#allocation40_spill] sm:$0xff] }
 0x9a6   :  { %v4025_v40 = vpack.c.bf16 %v4015_v25, %v4017_v10  ;;  %v11742_v42 = vld [vmem:[#allocation41_spill] sm:$0xff] }
 0x9a7   :  { %v4161_v12 = vpack.c.bf16 %v11149_v28, %v11147_v34  ;;  %v11154_v17 = vpack.c.bf16 %v4024_v4, %v4021_v52  ;;  %v11757_v34 = vld [vmem:[#allocation56_spill] sm:$0xff]  ;;  %v11758_v28 = vld [vmem:[#allocation57_spill] sm:$0xff] }
 0x9a8   :  { %7890 = vmatmul.mubr.bf16.vlgmr.msra.gmra.mrb[40].mxu0 %v4025_v40  ;;  %7910 = vmatmul.mubr.bf16.vlgmr.msra.gmra.mrb[40].mxu1 %v4025_v40  ;;  %v4026_v32 = vunpack.c.l.bf16 %v4025_v40 }
 0x9a9   :  { %7914 = vmatpush3.bf16.msra.mxu0 %v9515_v36  ;;  %7934 = vmatpush3.bf16.msra.mxu1 %v11737_v51  ;;  %v4290_v14 = vunpack.c.l.bf16 %v11154_v17  ;;  %v4291_v15 = vunpack.c.h.bf16 %v11154_v17  ;;  %v9521_v36 = vld [vmem:[#allocation5 + $0x30] sm:$0xff]   ;;  %v11743_v51 = vld [vmem:[#allocation42_spill] sm:$0xff] }
 0x9aa   :  { %7915 = vmatprep.subr.bf16.mxu0 %v11646_v0  ;;  %7935 = vmatprep.subr.bf16.mxu1 %v11646_v0 }
 0x9ab   :  { %7929 = vmatprep.mubr.msk.bf16.mxu0 %vm9659_vm0, %v11646_v0  ;;  %7949 = vmatprep.mubr.msk.bf16.mxu1 %vm9659_vm0, %v11646_v0  ;;  %v11165_v11 = vsub.f32 %v4021_v52, %v4290_v14  ;;  %v11167_v57 = vsub.f32 %v4024_v4, %v4291_v15  ;;  %v9520_v52 = vld [vmem:[#allocation5 + $0x28] sm:$0xff]   ;;  %v4027_v4 = vunpack.c.h.bf16 %v4025_v40  ;;  %v4028_v14 = vsub.f32 %v4017_v10, %v4026_v32  ;;  %v11745_v40 = vld [vmem:[#allocation44_spill] sm:$0xff]  ;;  %v11746_v10 = vld [vmem:[#allocation45_spill] sm:$0xff] }
 0x9ac   :  { %v11755_v32 = vld [vmem:[#allocation54_spill] sm:$0xff] }
 0x9ad   :  { %7916 = vmatpush3.bf16.msra.mxu0 %v9516_v59  ;;  %7936 = vmatpush3.bf16.msra.mxu1 %v11738_v21  ;;  %v4294_v18 = vpack.c.bf16 %v11167_v57, %v11165_v11  ;;  %v4029_v15 = vsub.f32 %v4015_v25, %v4027_v4  ;;  %v9522_v59 = vld [vmem:[#allocation5 + $0x38] sm:$0xff]   ;;  %v11744_v21 = vld [vmem:[#allocation43_spill] sm:$0xff]  ;;  %v11747_v25 = vld [vmem:[#allocation46_spill] sm:$0xff] }
 0x9ae   :  { %7917 = vmatprep.subr.bf16.mxu0 %v11646_v0  ;;  %7937 = vmatprep.subr.bf16.mxu1 %v11646_v0  ;;  %v11760_v4 = vld [vmem:[#allocation59_spill] sm:$0xff] }
 0x9b1   :  { %7918 = vmatpush3.bf16.msra.mxu0 %v9517_v26  ;;  %7938 = vmatpush3.bf16.msra.mxu1 %v11739_v7  ;;  %v4030_v26 = vpack.c.bf16 %v4029_v15, %v4028_v14  ;;  %v11748_v7 = vld [vmem:[#allocation47_spill] sm:$0xff]  ;;  %v11763_v14 = vld [vmem:[#allocation62_spill] sm:$0xff] }
 0x9b2   :  { %7919 = vmatprep.subr.bf16.mxu0 %v11646_v0  ;;  %7939 = vmatprep.subr.bf16.mxu1 %v11646_v0  ;;  %v11764_v15 = vld [vmem:[#allocation63_spill] sm:$0xff] }
 0x9b5   :  { %7920 = vmatpush3.bf16.msra.mxu0 %v9518_v62  ;;  %7940 = vmatpush3.bf16.msra.mxu1 %v11740_v13  ;;  %v11749_v62 = vld [vmem:[#allocation48_spill] sm:$0xff]  ;;  %v11750_v13 = vld [vmem:[#allocation49_spill] sm:$0xff] }
 0x9b6   :  { %7921 = vmatprep.subr.bf16.mxu0 %v11646_v0  ;;  %7941 = vmatprep.subr.bf16.mxu1 %v11646_v0 }
 0x9b9   :  { %7922 = vmatpush3.bf16.msra.mxu0 %v9519_v20  ;;  %7942 = vmatpush3.bf16.msra.mxu1 %v11741_v3  ;;  %v11751_v20 = vld [vmem:[#allocation50_spill] sm:$0xff]  ;;  %v11752_v3 = vld [vmem:[#allocation51_spill] sm:$0xff] }
 0x9ba   :  { %7923 = vmatprep.subr.bf16.mxu0 %v11646_v0  ;;  %7943 = vmatprep.subr.bf16.mxu1 %v11646_v0 }
 0x9bd   :  { %7924 = vmatpush3.bf16.msra.mxu0 %v9520_v52  ;;  %7944 = vmatpush3.bf16.msra.mxu1 %v11742_v42  ;;  %v11753_v52 = vld [vmem:[#allocation52_spill] sm:$0xff]  ;;  %v11754_v42 = vld [vmem:[#allocation53_spill] sm:$0xff] }
 0x9be   :  { %7925 = vmatprep.subr.bf16.mxu0 %v11646_v0  ;;  %7945 = vmatprep.subr.bf16.mxu1 %v11646_v0 }
 0x9c1   :  { %7926 = vmatpush3.bf16.msra.mxu0 %v9521_v36  ;;  %7946 = vmatpush3.bf16.msra.mxu1 %v11743_v51  ;;  %v11761_v36 = vld [vmem:[#allocation60_spill] sm:$0xff]  ;;  %v11762_v51 = vld [vmem:[#allocation61_spill] sm:$0xff] }
 0x9c2   :  { %7927 = vmatprep.subr.bf16.mxu0 %v11646_v0  ;;  %7947 = vmatprep.subr.bf16.mxu1 %v11646_v0 }
 0x9c5   :  { %7928 = vmatpush3.bf16.msra.mxu0 %v9522_v59  ;;  %7948 = vmatpush3.bf16.msra.mxu1 %v11744_v21  ;;  %v11765_v59 = vld [vmem:[#allocation64_spill] sm:$0xff]  ;;  %v11766_v21 = vld [vmem:[#allocation65_spill] sm:$0xff] }
 0x9c6   :  { %7953 = vmatprep.subr.bf16.mxu0 %v11646_v0  ;;  %7973 = vmatprep.subr.bf16.mxu1 %v11646_v0 }
 0x9c8   :  { %7930 = vmatmul.mubr.bf16.vlgmr.msra.gmra.mrb[44].mxu0 %v4030_v26  ;;  %7950 = vmatmul.mubr.bf16.vlgmr.msra.gmra.mrb[44].mxu1 %v11134_v22  ;;  %v11767_v26 = vld [vmem:[#allocation66_spill] sm:$0xff] }
 0x9c9   :  { %7954 = vmatpush3.bf16.msra.mxu0 %v11745_v40  ;;  %7974 = vmatpush3.bf16.msra.mxu1 %v11745_v40  ;;  %v11768_v40 = vld [vmem:[#allocation67_spill] sm:$0xff] }
 0x9ca   :  { %7955 = vmatprep.subr.bf16.mxu0 %v11646_v0  ;;  %7975 = vmatprep.subr.bf16.mxu1 %v11646_v0 }
 0x9cb   :  { %7969 = vmatprep.mubr.msk.bf16.mxu0 %vm9659_vm0, %v11646_v0  ;;  %7989 = vmatprep.mubr.msk.bf16.mxu1 %vm9659_vm0, %v11646_v0 }
 0x9cd   :  { %7956 = vmatpush3.bf16.msra.mxu0 %v11746_v10  ;;  %7976 = vmatpush3.bf16.msra.mxu1 %v11746_v10  ;;  %v9523_v10 = vld [vmem:[#allocation5 + $0x80] sm:$0xff]  }
 0x9ce   :  { %7957 = vmatprep.subr.bf16.mxu0 %v11646_v0  ;;  %7977 = vmatprep.subr.bf16.mxu1 %v11646_v0 }
 0x9d1   :  { %7958 = vmatpush3.bf16.msra.mxu0 %v11747_v25  ;;  %7978 = vmatpush3.bf16.msra.mxu1 %v11747_v25  ;;  %v9524_v25 = vld [vmem:[#allocation5 + $0x88] sm:$0xff]  }
 0x9d2   :  { %7959 = vmatprep.subr.bf16.mxu0 %v11646_v0  ;;  %7979 = vmatprep.subr.bf16.mxu1 %v11646_v0 }
 0x9d5   :  { %7960 = vmatpush3.bf16.msra.mxu0 %v11748_v7  ;;  %7980 = vmatpush3.bf16.msra.mxu1 %v11748_v7  ;;  %v9526_v7 = vld [vmem:[#allocation5 + $0x98] sm:$0xff]  }
 0x9d6   :  { %7961 = vmatprep.subr.bf16.mxu0 %v11646_v0  ;;  %7981 = vmatprep.subr.bf16.mxu1 %v11646_v0 }
 0x9d9   :  { %7962 = vmatpush3.bf16.msra.mxu0 %v11749_v62  ;;  %7982 = vmatpush3.bf16.msra.mxu1 %v11749_v62  ;;  %v9527_v62 = vld [vmem:[#allocation5 + $0xa0] sm:$0xff]  }
 0x9da   :  { %7963 = vmatprep.subr.bf16.mxu0 %v11646_v0  ;;  %7983 = vmatprep.subr.bf16.mxu1 %v11646_v0 }
 0x9dd   :  { %7964 = vmatpush3.bf16.msra.mxu0 %v11750_v13  ;;  %7984 = vmatpush3.bf16.msra.mxu1 %v11750_v13  ;;  %v9528_v13 = vld [vmem:[#allocation5 + $0xa8] sm:$0xff]  }
 0x9de   :  { %7965 = vmatprep.subr.bf16.mxu0 %v11646_v0  ;;  %7985 = vmatprep.subr.bf16.mxu1 %v11646_v0 }
 0x9e1   :  { %7966 = vmatpush3.bf16.msra.mxu0 %v11751_v20  ;;  %7986 = vmatpush3.bf16.msra.mxu1 %v11751_v20  ;;  %v9529_v20 = vld [vmem:[#allocation5 + $0xb0] sm:$0xff]  }
 0x9e2   :  { %7967 = vmatprep.subr.bf16.mxu0 %v11646_v0  ;;  %7987 = vmatprep.subr.bf16.mxu1 %v11646_v0 }
 0x9e5   :  { %7968 = vmatpush3.bf16.msra.mxu0 %v11752_v3  ;;  %7988 = vmatpush3.bf16.msra.mxu1 %v11752_v3  ;;  %v9530_v3 = vld [vmem:[#allocation5 + $0xb8] sm:$0xff]  }
 0x9e6   :  { %7993 = vmatprep.subr.bf16.mxu0 %v11646_v0  ;;  %8013 = vmatprep.subr.bf16.mxu1 %v11646_v0 }
 0x9e8   :  { %7970 = vmatmul.mubr.bf16.vlgmr.msra.gmra.mrb[48].mxu0 %v11134_v22  ;;  %7990 = vmatmul.mubr.bf16.vlgmr.msra.gmra.mrb[48].mxu1 %v4161_v12  ;;  %v11756_v22 = vld [vmem:[#allocation55_spill] sm:$0xff]  ;;  %v11759_v12 = vld [vmem:[#allocation58_spill] sm:$0xff] }
 0x9e9   :  { %7994 = vmatpush3.bf16.msra.mxu0 %v11753_v52  ;;  %8014 = vmatpush3.bf16.msra.mxu1 %v11754_v42 }
 0x9ea   :  { %7995 = vmatprep.subr.bf16.mxu0 %v11646_v0  ;;  %8015 = vmatprep.subr.bf16.mxu1 %v11646_v0 }
 0x9eb   :  { %8009 = vmatprep.mubr.msk.bf16.mxu0 %vm9659_vm0, %v11646_v0  ;;  %8029 = vmatprep.mubr.msk.bf16.mxu1 %vm9659_vm0, %v11646_v0 }
 0x9ed   :  { %7996 = vmatpush3.bf16.msra.mxu0 %v11755_v32  ;;  %8016 = vmatpush3.bf16.msra.mxu1 %v11756_v22 }
 0x9ee   :  { %7997 = vmatprep.subr.bf16.mxu0 %v11646_v0  ;;  %8017 = vmatprep.subr.bf16.mxu1 %v11646_v0 }
 0x9f1   :  { %7998 = vmatpush3.bf16.msra.mxu0 %v11757_v34  ;;  %8018 = vmatpush3.bf16.msra.mxu1 %v11758_v28 }
 0x9f2   :  { %7999 = vmatprep.subr.bf16.mxu0 %v11646_v0  ;;  %8019 = vmatprep.subr.bf16.mxu1 %v11646_v0 }
 0x9f5   :  { %8000 = vmatpush3.bf16.msra.mxu0 %v11759_v12  ;;  %8020 = vmatpush3.bf16.msra.mxu1 %v11760_v4 }
 0x9f6   :  { %8001 = vmatprep.subr.bf16.mxu0 %v11646_v0  ;;  %8021 = vmatprep.subr.bf16.mxu1 %v11646_v0 }
 0x9f9   :  { %8002 = vmatpush3.bf16.msra.mxu0 %v11761_v36  ;;  %8022 = vmatpush3.bf16.msra.mxu1 %v11762_v51 }
 0x9fa   :  { %8003 = vmatprep.subr.bf16.mxu0 %v11646_v0  ;;  %8023 = vmatprep.subr.bf16.mxu1 %v11646_v0 }
 0x9fd   :  { %8004 = vmatpush3.bf16.msra.mxu0 %v11763_v14  ;;  %8024 = vmatpush3.bf16.msra.mxu1 %v11764_v15 }
 0x9fe   :  { %8005 = vmatprep.subr.bf16.mxu0 %v11646_v0  ;;  %8025 = vmatprep.subr.bf16.mxu1 %v11646_v0 }
 0xa01   :  { %8006 = vmatpush3.bf16.msra.mxu0 %v11765_v59  ;;  %8026 = vmatpush3.bf16.msra.mxu1 %v11766_v21 }
 0xa02   :  { %8007 = vmatprep.subr.bf16.mxu0 %v11646_v0  ;;  %8027 = vmatprep.subr.bf16.mxu1 %v11646_v0 }
 0xa05   :  { %8008 = vmatpush3.bf16.msra.mxu0 %v11767_v26  ;;  %8028 = vmatpush3.bf16.msra.mxu1 %v11768_v40 }
 0xa06   :  { %8033 = vmatprep.subr.bf16.mxu0 %v11646_v0  ;;  %9049 = vmatprep.subr.bf16.mxu1 %v11647_v33 }
 0xa08   :  { %8010 = vmatmul.mubr.bf16.vlgmr.msra.gmra.mrb[52].mxu0 %v11154_v17  ;;  %8030 = vmatmul.mubr.bf16.vlgmr.msra.gmra.mrb[52].mxu1 %v11154_v17  ;;  %v9525_v17 = vld [vmem:[#allocation5 + $0x90] sm:$0xff]  }
 0xa09   :  { %8034 = vmatpush3.bf16.msra.mxu0 %v9523_v10  ;;  %8049 = vmatprep.mubr.msk.bf16.mxu0 %vm9659_vm0, %v11646_v0 }
 0xa0a   :  { %8035 = vmatprep.subr.bf16.mxu0 %v11646_v0  ;;  %9051 = vmatpush3.bf16.msra.mxu1 %v9923_v30 }
 0xa0b   :  { %9052 = vmatprep.subr.bf16.mxu1 %v11647_v33  ;;  %8085 = vmatprep.mubr.msk.f32.mxu1 %vm9659_vm0, %v11646_v0 }
 0xa0d   :  { %8036 = vmatpush3.bf16.msra.mxu0 %v9524_v25 }
 0xa0e   :  { %8037 = vmatprep.subr.bf16.mxu0 %v11646_v0  ;;  %9054 = vmatpush3.bf16.msra.mxu1 %v9945_v45 }
 0xa0f   :  { %9055 = vmatprep.subr.bf16.mxu1 %v11647_v33 }
 0xa11   :  { %8038 = vmatpush3.bf16.msra.mxu0 %v9525_v17 }
 0xa12   :  { %8039 = vmatprep.subr.bf16.mxu0 %v11646_v0  ;;  %9057 = vmatpush3.bf16.msra.mxu1 %v9961_v50 }
 0xa13   :  { %9058 = vmatprep.subr.bf16.mxu1 %v11647_v33 }
 0xa15   :  { %8040 = vmatpush3.bf16.msra.mxu0 %v9526_v7 }
 0xa16   :  { %8041 = vmatprep.subr.bf16.mxu0 %v11646_v0  ;;  %9060 = vmatpush3.bf16.msra.mxu1 %v9977_v55 }
 0xa17   :  { %9061 = vmatprep.subr.bf16.mxu1 %v11647_v33 }
 0xa19   :  { %8042 = vmatpush3.bf16.msra.mxu0 %v9527_v62 }
 0xa1a   :  { %8043 = vmatprep.subr.bf16.mxu0 %v11646_v0  ;;  %9063 = vmatpush3.bf16.msra.mxu1 %v9993_v60 }
 0xa1b   :  { %9064 = vmatprep.subr.bf16.mxu1 %v11647_v33 }
 0xa1d   :  { %8044 = vmatpush3.bf16.msra.mxu0 %v9528_v13 }
 0xa1e   :  { %8045 = vmatprep.subr.bf16.mxu0 %v11646_v0  ;;  %9066 = vmatpush3.bf16.msra.mxu1 %v10009_v2 }
 0xa1f   :  { %9067 = vmatprep.subr.bf16.mxu1 %v11647_v33 }
 0xa21   :  { %8046 = vmatpush3.bf16.msra.mxu0 %v9529_v20 }
 0xa22   :  { %8047 = vmatprep.subr.bf16.mxu0 %v11646_v0  ;;  %9069 = vmatpush3.bf16.msra.mxu1 %v10029_v9 }
 0xa23   :  { %9070 = vmatprep.subr.bf16.mxu1 %v11647_v33 }
 0xa25   :  { %8048 = vmatpush3.bf16.msra.mxu0 %v9530_v3 }
 0xa26   :  { %9072 = vmatpush3.bf16.msra.mxu1 %v10048_v16  ;;  %9193 = vmatprep.subr.bf16.mxu0 %v11647_v33 }
 0xa27   :  { %9073 = vmatprep.subr.bf16.mxu1 %v11647_v33 }
 0xa28   :  { %8050 = vmatmul.mubr.bf16.vlgmr.msra.gmra.mrb[56].mxu0 %v4294_v18 }
 0xa29   :  { %9195 = vmatpush3.bf16.msra.mxu0 %v9923_v30  ;;  %8295 = vmatprep.mubr.msk.f32.mxu0 %vm9659_vm0, %v11646_v0 }
 0xa2a   :  { %9196 = vmatprep.subr.bf16.mxu0 %v11647_v33 }
 0xa2d   :  { %9198 = vmatpush3.bf16.msra.mxu0 %v9945_v45 }
 0xa2e   :  { %9199 = vmatprep.subr.bf16.mxu0 %v11647_v33 }
 0xa31   :  { %9201 = vmatpush3.bf16.msra.mxu0 %v9961_v50 }
 0xa32   :  { %9202 = vmatprep.subr.bf16.mxu0 %v11647_v33 }
 0xa35   :  { %9204 = vmatpush3.bf16.msra.mxu0 %v9977_v55 }
 0xa36   :  { %9205 = vmatprep.subr.bf16.mxu0 %v11647_v33 }
 0xa39   :  { %9207 = vmatpush3.bf16.msra.mxu0 %v9993_v60 }
 0xa3a   :  { %9208 = vmatprep.subr.bf16.mxu0 %v11647_v33 }
 0xa3d   :  { %9210 = vmatpush3.bf16.msra.mxu0 %v10009_v2 }
 0xa3e   :  { %9211 = vmatprep.subr.bf16.mxu0 %v11647_v33 }
 0xa41   :  { %9213 = vmatpush3.bf16.msra.mxu0 %v10029_v9 }
 0xa42   :  { %9214 = vmatprep.subr.bf16.mxu0 %v11647_v33 }
 0xa45   :  { %9216 = vmatpush3.bf16.msra.mxu0 %v10048_v16 }
 0xa46   :  { %9217 = vmatprep.subr.bf16.mxu0 %v11647_v33 }
 0xa7b   :  { %v4065_v11 = vpop.f32.mrb[40].mxu0  ;;  %v4106_v57 = vpop.f32.mrb[40].mxu1 }
 0xa7c   :  { %v4107_v18 = vadd.f32 %v4106_v57, %v4065_v11  ;;  %v7891_v52 = vpop.f32.mrb[41].mxu0  ;;  %v7911_v42 = vpop.f32.mrb[41].mxu1 }
 0xa7d   :  { %v4068_v32 = vpop.f32.mrb[42].mxu0  ;;  %v4109_v22 = vpop.f32.mrb[42].mxu1 }
 0xa7e   :  { %v4110_v34 = vadd.f32 %v4109_v22, %v4068_v32  ;;  %v7892_v28 = vpop.f32.mrb[43].mxu0  ;;  %v7912_v12 = vpop.f32.mrb[43].mxu1 }
 0xa9b   :  { %v4147_v4 = vpop.f32.mrb[44].mxu0  ;;  %v4196_v36 = vpop.f32.mrb[44].mxu1 }
 0xa9c   :  { %v4154_v51 = vadd.f32 %v4147_v4, %v4107_v18  ;;  %v7931_v14 = vpop.f32.mrb[45].mxu0  ;;  %v7951_v15 = vpop.f32.mrb[45].mxu1 }
 0xa9d   :  { %v4150_v59 = vpop.f32.mrb[46].mxu0  ;;  %v4199_v21 = vpop.f32.mrb[46].mxu1 }
 0xa9e   :  { %v4155_v26 = vadd.f32 %v4150_v59, %v4110_v34  ;;  %v7932_v40 = vpop.f32.mrb[47].mxu0  ;;  %v7952_v10 = vpop.f32.mrb[47].mxu1 }
 0xabb   :  { %v4237_v25 = vpop.f32.mrb[48].mxu0  ;;  %v4278_v17 = vpop.f32.mrb[48].mxu1 }
 0xabc   :  { %v4238_v7 = vadd.f32 %v4237_v25, %v4196_v36  ;;  %v7971_v62 = vpop.f32.mrb[49].mxu0  ;;  %v7991_v13 = vpop.f32.mrb[49].mxu1 }
 0xabd   :  { %v4240_v20 = vpop.f32.mrb[50].mxu0  ;;  %v4281_v3 = vpop.f32.mrb[50].mxu1 }
 0xabe   :  { %v4285_v11 = vadd.f32 %v4278_v17, %v4238_v7  ;;  %v4241_v57 = vadd.f32 %v4240_v20, %v4199_v21  ;;  %v7972_v52 = vpop.f32.mrb[51].mxu0  ;;  %v7992_v42 = vpop.f32.mrb[51].mxu1 }
 0xac0   :  { %v4287_v32 = vadd.f32 %v4285_v11, %v4154_v51  ;;  %v4286_v18 = vadd.f32 %v4281_v3, %v4241_v57 }
 0xac2   :  { %v4288_v22 = vadd.f32 %v4286_v18, %v4155_v26 }
 0xadb   :  { %v4329_v28 = vpop.f32.mrb[52].mxu0  ;;  %v4370_v12 = vpop.f32.mrb[52].mxu1 }
 0xadc   :  { %v4371_v4 = vadd.f32 %v4370_v12, %v4329_v28  ;;  %v8011_v34 = vpop.f32.mrb[53].mxu0  ;;  %v8031_v14 = vpop.f32.mrb[53].mxu1 }
 0xadd   :  { %v4332_v15 = vpop.f32.mrb[54].mxu0  ;;  %v4373_v59 = vpop.f32.mrb[54].mxu1 }
 0xade   :  { %v4374_v40 = vadd.f32 %v4373_v59, %v4332_v15  ;;  %v8012_v36 = vpop.f32.mrb[55].mxu0  ;;  %v8032_v10 = vpop.f32.mrb[55].mxu1 }
 0xafb   :  { %v4411_v25 = vpop.f32.mrb[56].mxu0 }
 0xafc   :  { %v4418_v62 = vadd.f32 %v4411_v25, %v4371_v4  ;;  %v8051_v13 = vpop.f32.mrb[57].mxu0 }
 0xafd   :  { %v4414_v17 = vpop.f32.mrb[58].mxu0 }
 0xafe   :  { %v4420_v21 = vadd.f32 %v4418_v62, %v4287_v32  ;;  %v4419_v7 = vadd.f32 %v4414_v17, %v4374_v40  ;;  %v8052_v20 = vpop.f32.mrb[59].mxu0 }
 0xb00   :  { %v4421_v51 = vadd.f32 %v4419_v7, %v4288_v22  ;;  %v11321_v26 = vadd.f32 %v10872_v43, %v4420_v21 }
 0xb02   :  { %v11324_v3 = vadd.f32 %v10872_v43, %v4421_v51 }
 0xb04   :  { %v4424_v11 = vadd.f32 %v11324_v3, %v11321_v26 }
 0xb06   :  { %v4425_v57 = vrot.slane %v4424_v11, 4 }
 0xb08   :  { %v4426_v52 = vadd.f32 %v4425_v57, %v4424_v11 }
 0xb0a   :  { %v4427_v42 = vrot.slane %v4426_v52, 2 }
 0xb0c   :  { %v4428_v18 = vadd.f32 %v4427_v42, %v4426_v52 }
 0xb0e   :  { %v4429_v28 = vrot.slane %v4428_v18, 1 }
 0xb10   :  { %v4430_v12 = vadd.f32 %v4429_v28, %v4428_v18 }
 0xb12   :  { %v11328_v4 = vand.u32 4294901760, %v4430_v12 }
 0xb14   :  { %v4513_v32 = vsub.f32 %v4430_v12, %v11328_v4 }
 0xb16   :  { %v4514_v22 = vand.u32 4294901760, %v4513_v32 }
 0xb18   :  { %v4515_v34 = vsub.f32 %v4513_v32, %v4514_v22 }
 0xb1a   :  { %v4516_v14 = vand.u32 4294901760, %v4515_v34 }
 0xb1c   :  { %8086 = vmatmul.mubr.f32.vlgmr.msra.gmra.mrb[56].mxu1 %v4516_v14 }
 0xb1d   :  { %9075 = vmatpush3.bf16.msra.mxu1 %v10098_v39  ;;  %8120 = vmatprep.mubr.msk.f32.mxu1 %vm9659_vm0, %v11646_v0 }
 0xb1e   :  { %9076 = vmatprep.subr.bf16.mxu1 %v11647_v33 }
 0xb21   :  { %9078 = vmatpush3.bf16.msra.mxu1 %v10105_v23 }
 0xb22   :  { %9079 = vmatprep.subr.bf16.mxu1 %v11647_v33 }
 0xb25   :  { %9081 = vmatpush3.bf16.msra.mxu1 %v10125_v41 }
 0xb26   :  { %9082 = vmatprep.subr.bf16.mxu1 %v11647_v33 }
 0xb29   :  { %9084 = vmatpush3.bf16.msra.mxu1 %v10161_v24 }
 0xb2a   :  { %9085 = vmatprep.subr.bf16.mxu1 %v11647_v33 }
 0xb2d   :  { %9087 = vmatpush3.bf16.msra.mxu1 %v10165_v53 }
 0xb2e   :  { %9088 = vmatprep.subr.bf16.mxu1 %v11647_v33 }
 0xb31   :  { %9090 = vmatpush3.bf16.msra.mxu1 %v10185_v27 }
 0xb32   :  { %9091 = vmatprep.subr.bf16.mxu1 %v11647_v33 }
 0xb35   :  { %9093 = vmatpush3.bf16.msra.mxu1 %v10211_v8 }
 0xb36   :  { %9094 = vmatprep.subr.bf16.mxu1 %v11647_v33 }
 0xb39   :  { %9096 = vmatpush3.bf16.msra.mxu1 %v10213_v56 }
 0xb3a   :  { %9097 = vmatprep.subr.bf16.mxu1 %v11647_v33 }
 0xb3c   :  { %8121 = vmatmul.mubr.f32.vlgmr.msra.gmra.mrb[56].mxu1 %v11328_v4 }
 0xb3d   :  { %9099 = vmatpush3.bf16.msra.mxu1 %v10217_v58  ;;  %8155 = vmatprep.mubr.msk.f32.mxu1 %vm9659_vm0, %v11646_v0 }
 0xb3e   :  { %9100 = vmatprep.subr.bf16.mxu1 %v11647_v33 }
 0xb41   :  { %9102 = vmatpush3.bf16.msra.mxu1 %v10222_v54 }
 0xb42   :  { %9103 = vmatprep.subr.bf16.mxu1 %v11647_v33 }
 0xb45   :  { %9105 = vmatpush3.bf16.msra.mxu1 %v10228_v38 }
 0xb46   :  { %9106 = vmatprep.subr.bf16.mxu1 %v11647_v33 }
 0xb49   :  { %9108 = vmatpush3.bf16.msra.mxu1 %v10232_v49 }
 0xb4a   :  { %9109 = vmatprep.subr.bf16.mxu1 %v11647_v33 }
 0xb4d   :  { %9111 = vmatpush3.bf16.msra.mxu1 %v10236_v47 }
 0xb4e   :  { %9112 = vmatprep.subr.bf16.mxu1 %v11647_v33 }
 0xb51   :  { %9114 = vmatpush3.bf16.msra.mxu1 %v10240_v31 }
 0xb52   :  { %9115 = vmatprep.subr.bf16.mxu1 %v11647_v33 }
 0xb55   :  { %9117 = vmatpush3.bf16.msra.mxu1 %v10244_v35 }
 0xb56   :  { %9118 = vmatprep.subr.bf16.mxu1 %v11647_v33 }
 0xb59   :  { %9120 = vmatpush3.bf16.msra.mxu1 %v10248_v19 }
 0xb5a   :  { %9121 = vmatprep.subr.bf16.mxu1 %v11647_v33 }
 0xb5c   :  { %8156 = vmatmul.mubr.f32.vlgmr.msra.gmra.mrb[56].mxu1 %v4513_v32 }
 0xb5d   :  { %9123 = vmatpush3.bf16.msra.mxu1 %v9923_v30  ;;  %8190 = vmatprep.mubr.msk.f32.mxu1 %vm9659_vm0, %v11646_v0 }
 0xb5e   :  { %9124 = vmatprep.subr.bf16.mxu1 %v11647_v33 }
 0xb61   :  { %9126 = vmatpush3.bf16.msra.mxu1 %v9945_v45 }
 0xb62   :  { %9127 = vmatprep.subr.bf16.mxu1 %v11647_v33 }
 0xb65   :  { %9129 = vmatpush3.bf16.msra.mxu1 %v9961_v50 }
 0xb66   :  { %9130 = vmatprep.subr.bf16.mxu1 %v11647_v33 }
 0xb69   :  { %9132 = vmatpush3.bf16.msra.mxu1 %v9977_v55 }
 0xb6a   :  { %9133 = vmatprep.subr.bf16.mxu1 %v11647_v33 }
 0xb6d   :  { %9135 = vmatpush3.bf16.msra.mxu1 %v9993_v60 }
 0xb6e   :  { %9136 = vmatprep.subr.bf16.mxu1 %v11647_v33 }
 0xb71   :  { %9138 = vmatpush3.bf16.msra.mxu1 %v10009_v2 }
 0xb72   :  { %9139 = vmatprep.subr.bf16.mxu1 %v11647_v33 }
 0xb75   :  { %9141 = vmatpush3.bf16.msra.mxu1 %v10029_v9 }
 0xb76   :  { %9142 = vmatprep.subr.bf16.mxu1 %v11647_v33 }
 0xb79   :  { %9144 = vmatpush3.bf16.msra.mxu1 %v10048_v16 }
 0xb7a   :  { %9145 = vmatprep.subr.bf16.mxu1 %v11647_v33 }
 0xb7c   :  { %8191 = vmatmul.mubr.f32.vlgmr.msra.gmra.mrb[56].mxu1 %v4514_v22 }
 0xb7d   :  { %9147 = vmatpush3.bf16.msra.mxu1 %v10320_v6  ;;  %8225 = vmatprep.mubr.msk.f32.mxu1 %vm9659_vm0, %v11646_v0 }
 0xb7e   :  { %9148 = vmatprep.subr.bf16.mxu1 %v11647_v33 }
 0xb81   :  { %9150 = vmatpush3.bf16.msra.mxu1 %v10328_v44 }
 0xb82   :  { %9151 = vmatprep.subr.bf16.mxu1 %v11647_v33 }
 0xb85   :  { %9153 = vmatpush3.bf16.msra.mxu1 %v10338_v63 }
 0xb86   :  { %9154 = vmatprep.subr.bf16.mxu1 %v11647_v33 }
 0xb89   :  { %9156 = vmatpush3.bf16.msra.mxu1 %v10346_v29 }
 0xb8a   :  { %9157 = vmatprep.subr.bf16.mxu1 %v11647_v33 }
 0xb8d   :  { %9159 = vmatpush3.bf16.msra.mxu1 %v10354_v37 }
 0xb8e   :  { %9160 = vmatprep.subr.bf16.mxu1 %v11647_v33 }
 0xb91   :  { %9162 = vmatpush3.bf16.msra.mxu1 %v10362_v46 }
 0xb92   :  { %9163 = vmatprep.subr.bf16.mxu1 %v11647_v33 }
 0xb95   :  { %9165 = vmatpush3.bf16.msra.mxu1 %v10370_v61 }
 0xb96   :  { %9166 = vmatprep.subr.bf16.mxu1 %v11647_v33 }
 0xb99   :  { %9168 = vmatpush3.bf16.msra.mxu1 %v10378_v48 }
 0xb9a   :  { %9169 = vmatprep.subr.bf16.mxu1 %v11647_v33 }
 0xb9c   :  { %8226 = vmatmul.mubr.f32.vlgmr.msra.gmra.mrb[56].mxu1 %v11328_v4 }
 0xb9d   :  { %9171 = vmatpush3.bf16.msra.mxu1 %v9923_v30  ;;  %8260 = vmatprep.mubr.msk.f32.mxu1 %vm9659_vm0, %v11646_v0 }
 0xb9e   :  { %9172 = vmatprep.subr.bf16.mxu1 %v11647_v33 }
 0xba1   :  { %9174 = vmatpush3.bf16.msra.mxu1 %v9945_v45 }
 0xba2   :  { %9175 = vmatprep.subr.bf16.mxu1 %v11647_v33 }
 0xba5   :  { %9177 = vmatpush3.bf16.msra.mxu1 %v9961_v50 }
 0xba6   :  { %9178 = vmatprep.subr.bf16.mxu1 %v11647_v33 }
 0xba9   :  { %9180 = vmatpush3.bf16.msra.mxu1 %v9977_v55 }
 0xbaa   :  { %9181 = vmatprep.subr.bf16.mxu1 %v11647_v33 }
 0xbad   :  { %9183 = vmatpush3.bf16.msra.mxu1 %v9993_v60 }
 0xbae   :  { %9184 = vmatprep.subr.bf16.mxu1 %v11647_v33 }
 0xbb1   :  { %9186 = vmatpush3.bf16.msra.mxu1 %v10009_v2 }
 0xbb2   :  { %9187 = vmatprep.subr.bf16.mxu1 %v11647_v33 }
 0xbb5   :  { %9189 = vmatpush3.bf16.msra.mxu1 %v10029_v9 }
 0xbb6   :  { %9190 = vmatprep.subr.bf16.mxu1 %v11647_v33 }
 0xbb9   :  { %9192 = vmatpush3.bf16.msra.mxu1 %v10048_v16 }
 0xbbc   :  { %8261 = vmatmul.mubr.f32.vlgmr.msra.gmra.mrb[56].mxu1 %v11328_v4 }
 0xc8f   :  { %v5068_v43 = vpop.f32.mrb[56].mxu1 }
 0xc90   :  { %v5072_v15 = vmul.f32 0.001953125, %v5068_v43  ;;  %v8262_v59 = vpop.f32.mrb[57].mxu1 }
 0xc92   :  { %v5076_v40 = vrot.slane %v5072_v15, %v11724_v5 }
 0xc94   :  { %v11425_v36 = vsub.f32 %v11321_v26, %v5076_v40  ;;  %v11428_v10 = vsub.f32 %v11324_v3, %v5076_v40 }
 0xc96   :  { %v5079_v25 = vmul.f32 %v11425_v36, %v11425_v36  ;;  %v5080_v62 = vmul.f32 %v11428_v10, %v11428_v10 }
 0xc98   :  { %v5081_v13 = vadd.f32 %v5080_v62, %v5079_v25 }
 0xc9a   :  { %v5082_v17 = vrot.slane %v5081_v13, 4 }
 0xc9c   :  { %v5083_v21 = vadd.f32 %v5082_v17, %v5081_v13 }
 0xc9e   :  { %v5084_v7 = vrot.slane %v5083_v21, 2 }
 0xca0   :  { %v5085_v20 = vadd.f32 %v5084_v7, %v5083_v21 }
 0xca2   :  { %v5086_v51 = vrot.slane %v5085_v20, 1 }
 0xca4   :  { %v5087_v11 = vadd.f32 %v5086_v51, %v5085_v20 }
 0xca6   :  { %v11434_v57 = vand.u32 4294901760, %v5087_v11 }
 0xca8   :  { %v5170_v26 = vsub.f32 %v5087_v11, %v11434_v57 }
 0xcaa   :  { %v5171_v52 = vand.u32 4294901760, %v5170_v26 }
 0xcac   :  { %v5172_v3 = vsub.f32 %v5170_v26, %v5171_v52 }
 0xcae   :  { %v5173_v42 = vand.u32 4294901760, %v5172_v3 }
 0xcb0   :  { %8296 = vmatmul.mubr.f32.vlgmr.msra.gmra.mrb[60].mxu0 %v5173_v42 }
 0xcb1   :  { %9219 = vmatpush3.bf16.msra.mxu0 %v10098_v39  ;;  %8330 = vmatprep.mubr.msk.f32.mxu0 %vm9659_vm0, %v11646_v0 }
 0xcb2   :  { %9220 = vmatprep.subr.bf16.mxu0 %v11647_v33 }
 0xcb5   :  { %9222 = vmatpush3.bf16.msra.mxu0 %v10105_v23 }
 0xcb6   :  { %9223 = vmatprep.subr.bf16.mxu0 %v11647_v33 }
 0xcb9   :  { %9225 = vmatpush3.bf16.msra.mxu0 %v10125_v41 }
 0xcba   :  { %9226 = vmatprep.subr.bf16.mxu0 %v11647_v33 }
 0xcbd   :  { %9228 = vmatpush3.bf16.msra.mxu0 %v10161_v24 }
 0xcbe   :  { %9229 = vmatprep.subr.bf16.mxu0 %v11647_v33 }
 0xcc1   :  { %9231 = vmatpush3.bf16.msra.mxu0 %v10165_v53 }
 0xcc2   :  { %9232 = vmatprep.subr.bf16.mxu0 %v11647_v33 }
 0xcc5   :  { %9234 = vmatpush3.bf16.msra.mxu0 %v10185_v27 }
 0xcc6   :  { %9235 = vmatprep.subr.bf16.mxu0 %v11647_v33 }
 0xcc9   :  { %9237 = vmatpush3.bf16.msra.mxu0 %v10211_v8 }
 0xcca   :  { %9238 = vmatprep.subr.bf16.mxu0 %v11647_v33 }
 0xccd   :  { %9240 = vmatpush3.bf16.msra.mxu0 %v10213_v56 }
 0xcce   :  { %9241 = vmatprep.subr.bf16.mxu0 %v11647_v33 }
 0xcd0   :  { %8331 = vmatmul.mubr.f32.vlgmr.msra.gmra.mrb[60].mxu0 %v11434_v57 }
 0xcd1   :  { %9243 = vmatpush3.bf16.msra.mxu0 %v10217_v58  ;;  %8365 = vmatprep.mubr.msk.f32.mxu0 %vm9659_vm0, %v11646_v0 }
 0xcd2   :  { %9244 = vmatprep.subr.bf16.mxu0 %v11647_v33 }
 0xcd5   :  { %9246 = vmatpush3.bf16.msra.mxu0 %v10222_v54 }
 0xcd6   :  { %9247 = vmatprep.subr.bf16.mxu0 %v11647_v33 }
 0xcd9   :  { %9249 = vmatpush3.bf16.msra.mxu0 %v10228_v38 }
 0xcda   :  { %9250 = vmatprep.subr.bf16.mxu0 %v11647_v33 }
 0xcdd   :  { %9252 = vmatpush3.bf16.msra.mxu0 %v10232_v49 }
 0xcde   :  { %9253 = vmatprep.subr.bf16.mxu0 %v11647_v33 }
 0xce1   :  { %9255 = vmatpush3.bf16.msra.mxu0 %v10236_v47 }
 0xce2   :  { %9256 = vmatprep.subr.bf16.mxu0 %v11647_v33 }
 0xce5   :  { %9258 = vmatpush3.bf16.msra.mxu0 %v10240_v31 }
 0xce6   :  { %9259 = vmatprep.subr.bf16.mxu0 %v11647_v33 }
 0xce9   :  { %9261 = vmatpush3.bf16.msra.mxu0 %v10244_v35 }
 0xcea   :  { %9262 = vmatprep.subr.bf16.mxu0 %v11647_v33 }
 0xced   :  { %9264 = vmatpush3.bf16.msra.mxu0 %v10248_v19 }
 0xcee   :  { %9265 = vmatprep.subr.bf16.mxu0 %v11647_v33 }
 0xcf0   :  { %8366 = vmatmul.mubr.f32.vlgmr.msra.gmra.mrb[60].mxu0 %v5170_v26 }
 0xcf1   :  { %9267 = vmatpush3.bf16.msra.mxu0 %v9923_v30  ;;  %8400 = vmatprep.mubr.msk.f32.mxu0 %vm9659_vm0, %v11646_v0 }
 0xcf2   :  { %9268 = vmatprep.subr.bf16.mxu0 %v11647_v33 }
 0xcf5   :  { %9270 = vmatpush3.bf16.msra.mxu0 %v9945_v45 }
 0xcf6   :  { %9271 = vmatprep.subr.bf16.mxu0 %v11647_v33 }
 0xcf9   :  { %9273 = vmatpush3.bf16.msra.mxu0 %v9961_v50 }
 0xcfa   :  { %9274 = vmatprep.subr.bf16.mxu0 %v11647_v33 }
 0xcfd   :  { %9276 = vmatpush3.bf16.msra.mxu0 %v9977_v55 }
 0xcfe   :  { %9277 = vmatprep.subr.bf16.mxu0 %v11647_v33 }
 0xd01   :  { %9279 = vmatpush3.bf16.msra.mxu0 %v9993_v60 }
 0xd02   :  { %9280 = vmatprep.subr.bf16.mxu0 %v11647_v33 }
 0xd05   :  { %9282 = vmatpush3.bf16.msra.mxu0 %v10009_v2 }
 0xd06   :  { %9283 = vmatprep.subr.bf16.mxu0 %v11647_v33 }
 0xd09   :  { %9285 = vmatpush3.bf16.msra.mxu0 %v10029_v9 }
 0xd0a   :  { %9286 = vmatprep.subr.bf16.mxu0 %v11647_v33 }
 0xd0d   :  { %9288 = vmatpush3.bf16.msra.mxu0 %v10048_v16 }
 0xd0e   :  { %9289 = vmatprep.subr.bf16.mxu0 %v11647_v33 }
 0xd10   :  { %8401 = vmatmul.mubr.f32.vlgmr.msra.gmra.mrb[60].mxu0 %v5171_v52 }
 0xd11   :  { %9291 = vmatpush3.bf16.msra.mxu0 %v10320_v6  ;;  %8435 = vmatprep.mubr.msk.f32.mxu0 %vm9659_vm0, %v11646_v0 }
 0xd12   :  { %9292 = vmatprep.subr.bf16.mxu0 %v11647_v33 }
 0xd15   :  { %9294 = vmatpush3.bf16.msra.mxu0 %v10328_v44 }
 0xd16   :  { %9295 = vmatprep.subr.bf16.mxu0 %v11647_v33 }
 0xd19   :  { %9297 = vmatpush3.bf16.msra.mxu0 %v10338_v63 }
 0xd1a   :  { %9298 = vmatprep.subr.bf16.mxu0 %v11647_v33 }
 0xd1d   :  { %9300 = vmatpush3.bf16.msra.mxu0 %v10346_v29 }
 0xd1e   :  { %9301 = vmatprep.subr.bf16.mxu0 %v11647_v33 }
 0xd21   :  { %9303 = vmatpush3.bf16.msra.mxu0 %v10354_v37 }
 0xd22   :  { %9304 = vmatprep.subr.bf16.mxu0 %v11647_v33 }
 0xd25   :  { %9306 = vmatpush3.bf16.msra.mxu0 %v10362_v46 }
 0xd26   :  { %9307 = vmatprep.subr.bf16.mxu0 %v11647_v33 }
 0xd29   :  { %9309 = vmatpush3.bf16.msra.mxu0 %v10370_v61 }
 0xd2a   :  { %9310 = vmatprep.subr.bf16.mxu0 %v11647_v33 }
 0xd2d   :  { %9312 = vmatpush3.bf16.msra.mxu0 %v10378_v48 }
 0xd2e   :  { %9313 = vmatprep.subr.bf16.mxu0 %v11647_v33 }
 0xd30   :  { %8436 = vmatmul.mubr.f32.vlgmr.msra.gmra.mrb[60].mxu0 %v11434_v57 }
 0xd31   :  { %9315 = vmatpush3.bf16.msra.mxu0 %v9923_v30  ;;  %8470 = vmatprep.mubr.msk.f32.mxu0 %vm9659_vm0, %v11646_v0 }
 0xd32   :  { %9316 = vmatprep.subr.bf16.mxu0 %v11647_v33 }
 0xd35   :  { %9318 = vmatpush3.bf16.msra.mxu0 %v9945_v45 }
 0xd36   :  { %9319 = vmatprep.subr.bf16.mxu0 %v11647_v33 }
 0xd39   :  { %9321 = vmatpush3.bf16.msra.mxu0 %v9961_v50 }
 0xd3a   :  { %9322 = vmatprep.subr.bf16.mxu0 %v11647_v33 }
 0xd3d   :  { %9324 = vmatpush3.bf16.msra.mxu0 %v9977_v55 }
 0xd3e   :  { %9325 = vmatprep.subr.bf16.mxu0 %v11647_v33 }
 0xd41   :  { %9327 = vmatpush3.bf16.msra.mxu0 %v9993_v60 }
 0xd42   :  { %9328 = vmatprep.subr.bf16.mxu0 %v11647_v33 }
 0xd45   :  { %9330 = vmatpush3.bf16.msra.mxu0 %v10009_v2  ;;  %v9531_v2 = vld [vmem:[%s11557_s5] sm:$0x1] }
 0xd46   :  { %9331 = vmatprep.subr.bf16.mxu0 %v11647_v33 }
 0xd49   :  { %9333 = vmatpush3.bf16.msra.mxu0 %v10029_v9 }
 0xd4a   :  { %9334 = vmatprep.subr.bf16.mxu0 %v11647_v33 }
 0xd4d   :  { %9336 = vmatpush3.bf16.msra.mxu0 %v10048_v16 }
 0xd50   :  { %8471 = vmatmul.mubr.f32.vlgmr.msra.gmra.mrb[60].mxu0 %v11434_v57 }
 0xe23   :  { %v5725_v30 = vpop.f32.mrb[60].mxu0 }
 0xe24   :  { %v5729_v45 = vmul.f32 0.001953125, %v5725_v30  ;;  %v8472_v50 = vpop.f32.mrb[61].mxu0 }
 0xe26   :  { %v5730_v55 = vadd.f32 1e-05, %v5729_v45 }
 0xe28   :  { %9461 = vrsqrt.f32 %v5730_v55 }
 0xe32   :  { %v9462_v60 = vpop.eup %9461 }
 0xe33   :  { %v5732_v39 = vmul.f32 %v9531_v2, %v9462_v60 }
 0xe35   :  { %v5737_v23 = vrot.slane %v5732_v39, %v11724_v5 }
 0xe37   :  { %v5739_v9 = vmul.f32 %v5737_v23, %v11425_v36  ;;  %v5740_v41 = vmul.f32 %v5737_v23, %v11428_v10 }
 0xe39   :  { %v5741_v16 = vadd.f32 %v11129_v1, %v5739_v9  ;;  %v5742_v24 = vadd.f32 %v11129_v1, %v5740_v41 }
 0xe3b   :  { %v5743_v53 = vmax.f32 %v5741_v16, 0.0  ;;  %v5744_v56 = vmax.f32 %v5742_v24, 0.0 }
 0xe3d   :  { %5745 = vst [vmem:[#allocation10] sm:$0xff] %v5743_v53  ;;  %5746 = vst [vmem:[#allocation10 + $0x8] sm:$0xff] %v5744_v56 }
 0xe3e   :  { %9631 = shalt.err (!%p9628_p8)
}
 0xe3f   :  { %s9632_s19 = scalar_lea.hbm %s11559_s7, 256 }
 0xe40   :  { %p9633_p9 = scmp.ne.s32.totalorder %s11559_s7, %s9632_s19  ;;  %p9636_p10 = scmp.lt.u32.totalorder %s9632_s19, %s11559_s7 }
 0xe42   :  { %p9638_p11 = pnand %p9636_p10, %p9633_p9 }
 0xe44   :  { %9641 = shalt.err (!%p9638_p11)
}
 0xe45   :  { %5758 = dma.vmem_to_hbm [thread:$0]  %s5753_s18, 256, %s11559_s7, [#allocation4], %s9654_s1, %s9654_s1, %s9655_s25  }
 0xe46   :  { %9648 = dma.done.wait [#allocation4], 256  }
 0xe47   :  { %9649 = vsyncadd [#allocation4], 4294967040 }
 0xe48   :  { %5762 = vsyncpa [#allocation3], 1 }
 0xe49   :  { %5763 = vsyncpa [#allocation6], 1 }
 0xe4a   :  { %5764 = vsyncpa [#allocation9], 1 }
 0xe4b   :  { %5765 = vsyncpa [#allocation4], 1 }

</bundles_post_ra>
